<compile_context>
chip_gen: v5e
topology: v5e:2x2
jax: 0.10.0
libtpu: 0.0.40
codegen_flags: <defaults>
</compile_context>

<pallas_src>
import math
from functools import partial

import jax
import jax.numpy as jnp
from jax.experimental import pallas as pl
from jax.experimental.pallas import tpu as pltpu


def _round_up(x, m):
    return (x + m - 1) // m * m


def ffn_kernel(x_ref, w1_ref, b1_ref, w2_ref, b2_ref, o_ref):
    """Fused MLP tile: o = relu(x @ W1 + b1) @ W2 + b2.

    x_ref : (tm, C)  row tile of the flattened (B*T, C) input (input dtype)
    w1_ref: (C, 4C)  first Linear weight, (in, out) layout, bf16
    b1_ref: (1, 4C)  first bias, f32
    w2_ref: (4C, C)  second Linear weight, (in, out) layout, bf16
    b2_ref: (1, C)   second bias, f32
    o_ref : (tm, C)  output tile (lane-dense: C is a multiple of 128)
    """
    # Feed the MXU bf16 operands (weights are already bf16), accumulate in f32.
    x = x_ref[...].astype(w1_ref.dtype)
    h = jnp.dot(x, w1_ref[...], preferred_element_type=jnp.float32)       # (tm, 4C) f32
    # Bias + ReLU on the VPU, in f32 (v5e has no bf16 VPU).
    h = jnp.maximum(h + b1_ref[...], 0.0)

    # Second projection; hidden goes back to bf16 for the MXU, f32 accumulation.
    y = jnp.dot(h.astype(w2_ref.dtype), w2_ref[...],
                preferred_element_type=jnp.float32)                        # (tm, C) f32
    y = y + b2_ref[...]

    # TODO(synk): nn.Dropout(0.2) is identity in eval mode; training-mode random
    # dropout (pltpu.prng_seed + pltpu.prng_random_bits + 1/(1-p) scaling) not applied.
    o_ref[...] = y.astype(o_ref.dtype)


def prepare_params(w1, b1, w2, b2, *, weight_dtype=jnp.bfloat16):
    """One-time parameter layout/dtype prep (call OUTSIDE the jitted forward).

    nn.Linear stores weights as (out, in); transpose once to (in, out), cast to
    bf16 for the MXU, and keep biases as f32 (1, out) so the kernel does no
    per-step casting.
    """
    return (w1.T.astype(weight_dtype),
            b1.reshape(1, -1).astype(jnp.float32),
            w2.T.astype(weight_dtype),
            b2.reshape(1, -1).astype(jnp.float32))


@partial(jax.jit, static_argnames=("block_rows",))
def feedforward_forward(x, w1_t, b1, w2_t, b2, *, block_rows=512):
    """x: (B, T, C); w1_t: (C, 4C) bf16; b1: (1, 4C) f32; w2_t: (4C, C) bf16; b2: (1, C) f32."""
    B, T, C = x.shape
    H = w1_t.shape[1]
    M = B * T

    x2 = x.reshape(M, C)

    # Row tile: fill sublanes, and whenever M allows give the grid >=2 steps so
    # both v7x TensorCores get work. No explicit padding: Pallas masks the
    # ragged last tile.
    tm = max(8, min(block_rows, _round_up(pl.cdiv(M, 2), 8)))
    tm = _round_up(tm, 8)
    grid = (pl.cdiv(M, tm),)

    # Advisory cost hint for XLA's scheduler around the custom call.
    flops = 4 * M * C * H                      # two GEMMs, 2*M*C*H flops each
    bytes_accessed = (x2.size * x2.dtype.itemsize
                      + w1_t.size * w1_t.dtype.itemsize
                      + w2_t.size * w2_t.dtype.itemsize
                      + b1.size * b1.dtype.itemsize
                      + b2.size * b2.dtype.itemsize
                      + M * C * x.dtype.itemsize)
    cost = pl.CostEstimate(flops=flops, transcendentals=0,
                           bytes_accessed=bytes_accessed)

    grid_spec = pltpu.PrefetchScalarGridSpec(
        num_scalar_prefetch=0,
        grid=grid,
        in_specs=[
            # x rows: tiled & double-buffered (default pipelining).
            pl.BlockSpec((tm, C), lambda i: (i, 0)),
            # Weights/biases: constant block index -> single-buffer (saves VMEM).
            pl.BlockSpec((C, H), lambda i: (0, 0), pipeline_mode=pl.Buffered(1)),
            pl.BlockSpec((1, H), lambda i: (0, 0), pipeline_mode=pl.Buffered(1)),
            pl.BlockSpec((H, C), lambda i: (0, 0), pipeline_mode=pl.Buffered(1)),
            pl.BlockSpec((1, C), lambda i: (0, 0), pipeline_mode=pl.Buffered(1)),
        ],
        out_specs=pl.BlockSpec((tm, C), lambda i: (i, 0)),
    )

    y = pl.pallas_call(
        ffn_kernel,
        out_shape=jax.ShapeDtypeStruct((M, C), x.dtype),
        grid_spec=grid_spec,
        compiler_params=pltpu.CompilerParams(
            dimension_semantics=("parallel",),
            # Explicit limit so tm=512 tiles compile everywhere; 48 MiB stays
            # under v7x's 64 MiB physical VMEM and well under v5e/v6e's 128 MiB.
            vmem_limit_bytes=48 * 1024 * 1024,
        ),
        cost_estimate=cost,
    )(x2, w1_t, b1, w2_t, b2)

    return y.reshape(B, T, C)


def reference_forward(x, w1, b1, w2, b2):
    """Pure-JAX f32 reference mirroring the PyTorch forward (eval mode)."""
    h = jnp.maximum(x @ w1.T + b1, 0.0)
    return h @ w2.T + b2


if __name__ == "__main__":
    # n_embed = 384 is fixed by the module; small batch/seq for the demo.
    B, T, C = 2, 8, 384
    H = 4 * C  # 1536

    key = jax.random.PRNGKey(0)
    kx, k1, kb1, k2, kb2 = jax.random.split(key, 5)

    x = jax.random.normal(kx, (B, T, C), dtype=jnp.float32)

    # nn.Linear init: U(-1/sqrt(fan_in), +1/sqrt(fan_in)) for weight and bias.
    bound1 = 1.0 / math.sqrt(C)
    w1 = jax.random.uniform(k1, (H, C), jnp.float32, -bound1, bound1)
    b1 = jax.random.uniform(kb1, (H,), jnp.float32, -bound1, bound1)
    bound2 = 1.0 / math.sqrt(H)
    w2 = jax.random.uniform(k2, (C, H), jnp.float32, -bound2, bound2)
    b2 = jax.random.uniform(kb2, (C,), jnp.float32, -bound2, bound2)

    # One-time layout/dtype prep, kept out of the jitted forward.
    w1_t, b1_2d, w2_t, b2_2d = jax.device_put(prepare_params(w1, b1, w2, b2))

    out = feedforward_forward(x, w1_t, b1_2d, w2_t, b2_2d)
    jax.block_until_ready(out)

    ref = reference_forward(x, w1, b1, w2, b2)
    assert out.shape == (B, T, C)
    # bf16 MXU operands vs. the f32 reference: expected absolute error ~1e-2 at
    # these fan-ins, so compare with a bf16-appropriate tolerance.
    assert jnp.allclose(out, ref, atol=3e-2, rtol=3e-2), float(
        jnp.max(jnp.abs(out - ref)))

    print("KERNEL_OK")
</pallas_src>

<mosaic_0001>
module attributes {stable_mosaic.version = 11 : i64} {
  func.func @ffn_kernel(%arg0: i32, %arg1: memref<8x384xf32, #tpu.memory_space<vmem>>, %arg2: memref<384x1536xbf16, #tpu.memory_space<vmem>>, %arg3: memref<1x1536xf32, #tpu.memory_space<vmem>>, %arg4: memref<1536x384xbf16, #tpu.memory_space<vmem>>, %arg5: memref<1x384xf32, #tpu.memory_space<vmem>>, %arg6: memref<8x384xf32, #tpu.memory_space<vmem>>) attributes {dimension_semantics = [#tpu.dimension_semantics<parallel>], iteration_bounds = array<i64: 2>, scalar_prefetch = 0 : i64, scratch_operands = 0 : i64, tpu.core_type = #tpu.core_type<tc>, window_params = [{transform_indices = @transform_0, window_bounds = array<i64: 8, 384>}, {pipeline_mode = #tpu.pipeline_mode<synchronous>, transform_indices = @transform_1, window_bounds = array<i64: 384, 1536>}, {pipeline_mode = #tpu.pipeline_mode<synchronous>, transform_indices = @transform_2, window_bounds = array<i64: 1, 1536>}, {pipeline_mode = #tpu.pipeline_mode<synchronous>, transform_indices = @transform_3, window_bounds = array<i64: 1536, 384>}, {pipeline_mode = #tpu.pipeline_mode<synchronous>, transform_indices = @transform_4, window_bounds = array<i64: 1, 384>}, {transform_indices = @transform_5, window_bounds = array<i64: 8, 384>}]} {
    %c0 = arith.constant 0 : index
    %c0_0 = arith.constant 0 : index
    %0 = vector.load %arg1[%c0, %c0_0] : memref<8x384xf32, #tpu.memory_space<vmem>>, vector<8x384xf32>
    %1 = arith.truncf %0 : vector<8x384xf32> to vector<8x384xbf16>
    %c0_1 = arith.constant 0 : index
    %c0_2 = arith.constant 0 : index
    %2 = vector.load %arg2[%c0_1, %c0_2] : memref<384x1536xbf16, #tpu.memory_space<vmem>>, vector<384x1536xbf16>
    %cst = arith.constant dense<0.000000e+00> : vector<8x1536xf32>
    %3 = tpu.matmul %1, %2, %cst {dimension_numbers = #tpu.dot_dimension_numbers<[1], [0], [0], [1], [0, 0, 1, 1], [], []>} : vector<8x384xbf16>, vector<384x1536xbf16>, vector<8x1536xf32> -> vector<8x1536xf32>
    %c0_3 = arith.constant 0 : index
    %c0_4 = arith.constant 0 : index
    %4 = vector.load %arg3[%c0_3, %c0_4] : memref<1x1536xf32, #tpu.memory_space<vmem>>, vector<1x1536xf32>
    %5 = vector.broadcast %4 : vector<1x1536xf32> to vector<8x1536xf32>
    %6 = arith.addf %3, %5 : vector<8x1536xf32>
    %cst_5 = arith.constant 0.000000e+00 : f32
    %7 = vector.broadcast %cst_5 : f32 to vector<8x1536xf32>
    %8 = arith.maximumf %6, %7 : vector<8x1536xf32>
    %9 = arith.truncf %8 : vector<8x1536xf32> to vector<8x1536xbf16>
    %c0_6 = arith.constant 0 : index
    %c0_7 = arith.constant 0 : index
    %10 = vector.load %arg4[%c0_6, %c0_7] : memref<1536x384xbf16, #tpu.memory_space<vmem>>, vector<1536x384xbf16>
    %cst_8 = arith.constant dense<0.000000e+00> : vector<8x384xf32>
    %11 = tpu.matmul %9, %10, %cst_8 {dimension_numbers = #tpu.dot_dimension_numbers<[1], [0], [0], [1], [0, 0, 1, 1], [], []>} : vector<8x1536xbf16>, vector<1536x384xbf16>, vector<8x384xf32> -> vector<8x384xf32>
    %c0_9 = arith.constant 0 : index
    %c0_10 = arith.constant 0 : index
    %12 = vector.load %arg5[%c0_9, %c0_10] : memref<1x384xf32, #tpu.memory_space<vmem>>, vector<1x384xf32>
    %13 = vector.broadcast %12 : vector<1x384xf32> to vector<8x384xf32>
    %14 = arith.addf %11, %13 : vector<8x384xf32>
    %c0_11 = arith.constant 0 : index
    %c0_12 = arith.constant 0 : index
    %15 = vector.load %arg6[%c0_11, %c0_12] : memref<8x384xf32, #tpu.memory_space<vmem>>, vector<8x384xf32>
    tpu.vector_store %arg6[%c0_11, %c0_12], %14 {strides = array<i32>} : memref<8x384xf32, #tpu.memory_space<vmem>>, vector<8x384xf32>,
    return
  }
  func.func @transform_0(%arg0: i32) -> (i32, i32) {
    %c0_i32 = arith.constant 0 : i32
    %c0_i32_0 = arith.constant 0 : i32
    return %arg0, %c0_i32 : i32, i32
  }
  func.func @transform_1(%arg0: i32) -> (i32, i32) {
    %c0_i32 = arith.constant 0 : i32
    %c0_i32_0 = arith.constant 0 : i32
    %c0_i32_1 = arith.constant 0 : i32
    return %c0_i32, %c0_i32_0 : i32, i32
  }
  func.func @transform_2(%arg0: i32) -> (i32, i32) {
    %c0_i32 = arith.constant 0 : i32
    %c0_i32_0 = arith.constant 0 : i32
    %c0_i32_1 = arith.constant 0 : i32
    return %c0_i32, %c0_i32_0 : i32, i32
  }
  func.func @transform_3(%arg0: i32) -> (i32, i32) {
    %c0_i32 = arith.constant 0 : i32
    %c0_i32_0 = arith.constant 0 : i32
    %c0_i32_1 = arith.constant 0 : i32
    return %c0_i32, %c0_i32_0 : i32, i32
  }
  func.func @transform_4(%arg0: i32) -> (i32, i32) {
    %c0_i32 = arith.constant 0 : i32
    %c0_i32_0 = arith.constant 0 : i32
    %c0_i32_1 = arith.constant 0 : i32
    return %c0_i32, %c0_i32_0 : i32, i32
  }
  func.func @transform_5(%arg0: i32) -> (i32, i32) {
    %c0_i32 = arith.constant 0 : i32
    %c0_i32_0 = arith.constant 0 : i32
    return %arg0, %c0_i32 : i32, i32
  }
}

</mosaic_0001>

<bundles_post_ra>
// kernel: feedforward_forward.1
= control target key start
LH: loop header
LB: loop body
LE: loop exit
PB: predicated region body
PF: predicated region fallthrough
CT: control target
= control target key end

     0   :  { %s8698_s0 = inlined_call_operand.hbm [shape: f32[16,384], index: 0, kind: input, shape index: {}]   ;;  %s8699_s1 = inlined_call_operand.hbm [shape: bf16[384,1536], index: 1, kind: input, shape index: {}]   ;;  %s8700_s2 = inlined_call_operand.hbm [shape: f32[1,1536], index: 2, kind: input, shape index: {}]   ;;  %s8701_s3 = inlined_call_operand.hbm [shape: bf16[1536,384], index: 3, kind: input, shape index: {}]   ;;  %s8702_s4 = inlined_call_operand.hbm [shape: f32[1,384], index: 4, kind: input, shape index: {}]   ;;  %s8703_s5 = inlined_call_operand.hbm [shape: f32[16,384], index: 5, kind: output, shape index: {}]  }
   0x1   :  { %8704 = sst [smem:[#allocation16_spill]] %s8699_s1 }
   0x2   :  { %10 = vsyncpa [#allocation3], 0 }
   0x3   :  { %12 = vsyncpa [#allocation3 + $0x1], 0 }
   0x4   :  { %13 = vsyncpa [#allocation6], 0 }
   0x5   :  { %14 = vsyncpa [#allocation9], 0 }
   0x6   :  { %15 = vsyncpa [#allocation4], 0 }
   0x7   :  { %17 = vsyncpa [#allocation4 + $0x1], 0  ;;  %s8340_s18 = smov 0   ;;  %s8342_s19 = smov 0  }
   0x8   :  { %s8344_s20 = smov 0   ;;  %s8346_s21 = smov 0  }
   0x9 LB: > { %s8705_s1 = sld [smem:[#allocation16_spill]]  ;;  %s8364_s25 = sadd.s32 4294967295, %s8300_s21   ;;  %s8300_s21 = sphi %s8346_s21, %s8716_s21   ;;  %s8296_s20 = sphi %s8344_s20, %s8715_s20   ;;  %s8292_s19 = sphi %s8342_s19, %s8714_s19   ;;  %s8288_s18 = sphi %s8340_s18, %s8713_s18  }
   0xa   : > { %p5084_p0 = scmp.ge.s32.totalorder %s8300_s21, 1  ;;  %p44_p1 = scmp.eq.s32.totalorder %s8364_s25, 0 }
   0xb   : > { %p164_p2 = scmp.lt.s32.totalorder %s8300_s21, 3  ;;  %s8302_s27 = smov [#allocation5]  }
   0xc   : > { %s177_s28 = sshll.u32 %s8302_s27, 4  ;;  %s201_s6 = sshll.u32 %s8701_s3, 4  ;;  %s178_s28 = int_to_ptr.vmem [resolvable:$true] %s177_s28  ;;  %s202_s6 = int_to_ptr.hbm [resolvable:$true] %s201_s6 }
   0xd   : > { %p8369_p3 = pnand %p5084_p0, %p164_p2  ;;  %s8303_s8 = smov [#allocation8]  }
   0xe   : > { %s203_s9 = sshll.u32 %s8303_s8, 4  ;;  %s8304_s10 = smov 768   ;;  %s204_s9 = int_to_ptr.vmem [resolvable:$true] %s203_s9 }
   0xf   : > { %s175_s24 = sshll.u32 %s8705_s1, 4  ;;  %p8003_p4 = pneg %p8369_p3  ;;  %s176_s24 = int_to_ptr.hbm [resolvable:$true] %s175_s24 }
  0x10   : > { %s8305_s11 = smov 48   ;;  %s8306_s12 = smov 192  }
  0x11   : > { %p8381_p6 = pnand %p8003_p4, %p44_p1  ;;  %s8307_s13 = smov 12  }
  0x12   : > { %s190_s16 = sshll.u32 %s8700_s2, 4  ;;  %s8308_s17 = smov [#allocation7]   ;;  %s191_s16 = int_to_ptr.hbm [resolvable:$true] %s190_s16 }
  0x13   : > { %8006 = dma.hbm_to_vmem [thread:$0]  (!%p8381_p6), %s176_s24, 36864, %s178_s28, [#allocation6], %s8304_s10, %s8304_s10, %s8305_s11  }
  0x14   : > { %8012 = dma.hbm_to_vmem [thread:$0]  (!%p8381_p6), %s202_s6, 36864, %s204_s9, [#allocation9], %s8306_s12, %s8306_s12, %s8307_s13  }
  0x15   : > { %s192_s22 = sshll.u32 %s8308_s17, 4  ;;  %s216_s27 = sshll.u32 %s8702_s4, 4  ;;  %s193_s22 = int_to_ptr.vmem [resolvable:$true] %s192_s22  ;;  %s217_s27 = int_to_ptr.hbm [resolvable:$true] %s216_s27 }
  0x16   : > { %8009 = dma.hbm_to_vmem [thread:$0]  (!%p8381_p6), %s191_s16, 192, %s193_s22, [#allocation6]  }
  0x17   : > { %s8309_s28 = smov [#allocation10]   ;;  %s5083_s30 = sadd.s32 4294967294, %s8300_s21  }
  0x18   : > { %s218_s29 = sshll.u32 %s8309_s28, 4  ;;  %s8401_s6 = sadd.s32 1, %s8300_s21   ;;  %s219_s29 = int_to_ptr.vmem [resolvable:$true] %s218_s29 }
  0x19   : > { %8015 = dma.hbm_to_vmem [thread:$0]  (!%p8381_p6), %s217_s27, 48, %s219_s29, [#allocation9]  }
  0x1a   : > { %s27_s8 = ssub.s32 %s8300_s21, %s8401_s6  ;;  %s30_s9 = sadd.s32 1, %s8296_s20 }
  0x1b   : > { %p28_p7 = scmp.eq.s32.totalorder %s27_s8, 0  ;;  %p37_p8 = scmp.ne.s32.totalorder %s8296_s20, %s8292_s19 }
  0x1c   : > { %p38_p9 = scmp.eq.s32.totalorder %s8300_s21, 0  ;;  %p43_p10 = scmp.ne.s32.totalorder %s8292_s19, %s8288_s18 }
  0x1d   : > { %s8412_s10 = scalar_select %p28_p7, %s8296_s20, %s30_s9  }
  0x1e   : > { %p39_p11 = por %p38_p9, %p37_p8  ;;  %p8416_p12 = por %p44_p1, %p43_p10 }
  0x1f   : > { %p151_p13 = scmp.eq.s32.totalorder %s8364_s25, 1  ;;  %p157_p0 = scmp.eq.s32.totalorder %s5083_s30, 1 }
  0x20   : > { %p8028_p2 = scmp.lt.s32.totalorder %s8300_s21, 2  ;;  %s229_s7 = sand.u32 1, %s8296_s20  }
  0x21   : > { %p8423_p4 = por %p151_p13, %p37_p8  ;;  %p8427_p6 = por %p157_p0, %p43_p10 }
  0x22   : > { %s7979_s14 = smul.u32 24, %s229_s7  ;;  %p8432_p7 = pnand %p8028_p2, %p39_p11 }
  0x23   : > { %s7980_s15 = smul.u32 24, %s8300_s21  ;;  %s230_s29 = scalar_lea.sflag [#allocation3], %s229_s7 }
  0x24   : > { %s233_s24 = scalar_lea.vmem [#allocation2], %s7979_s14  ;;  %p8200_p9 = pneg %p8432_p7 }
  0x25   : > { %s238_s23 = scalar_lea.hbm %s8698_s0, %s7980_s15  ;;  %s242_s27 = sshll.u32 %s233_s24, 4  ;;  %s243_s27 = int_to_ptr.vmem [resolvable:$true] %s242_s27 }
  0x26   : > { %s240_s28 = sshll.u32 %s238_s23, 4  ;;  %s8203_s17 = scalar_lea.hbm %s8698_s0, 48  ;;  %s241_s28 = int_to_ptr.hbm [resolvable:$true] %s240_s28 }
  0x27   : > { %s8196_s30 = sshra.s32 %s241_s28, 4  ;;  %s8197_s30 = int_to_ptr.hbm [resolvable:$true] %s8196_s30 }
  0x28   : > { %s8198_s8 = scalar_lea.hbm %s8197_s30, 24  ;;  %p8204_p13 = scmp.lt.s32.totalorder %s8197_s30, %s8698_s0 }
  0x29   : > { %p8199_p8 = scmp.ne.s32.totalorder %s8197_s30, %s8198_s8  ;;  %p8205_p0 = scmp.lt.s32.totalorder %s8203_s17, %s8198_s8 }
  0x2b   : > { %p8201_p10 = pnand %p8200_p9, %p8199_p8  ;;  %p8206_p2 = por %p8205_p0, %p8204_p13 }
  0x2d   : > { %p8202_p11 = pneg %p8201_p10 }
  0x2f   : > { %p8207_p5 = pnand %p8206_p2, %p8202_p11 }
  0x31   : > { %8210 = shalt.err (!%p8207_p5)
}
  0x32   : > { %8019 = dma.hbm_to_vmem [thread:$0]  (!%p8432_p7), %s241_s28, 384, %s243_s27, %s230_s29  }
  0x33   : > { %251 = sbr.rel (%p8369_p3) target bundleno = 800 (0x320), region = 40  ;;  %s8452_s7 = sand.u32 (!%p8369_p3), 1, %s8292_s19  }
  0x34   : > { %s7981_s1 = smul.u32 (!%p8369_p3), 24, %s8452_s7  ;;  %s254_s14 = scalar_lea.sflag (!%p8369_p3), [#allocation3], %s8452_s7 }
  0x36   : > { %s8458_s23 = scalar_lea.vmem (!%p8369_p3), [#allocation2], %s7981_s1 }
  0x38   : > { %8271 = dma.done.wait (%p8416_p12), %s254_s14, 384  }
  0x39   : > { %8273 = vsyncadd (%p8416_p12), %s254_s14, 4294966912 }
  0x3a   : > { %8275 = dma.done.wait (%p44_p1), [#allocation6], 37056  }
  0x3b   : > { %8277 = vsyncadd (%p44_p1), [#allocation6], 4294930240 }
  0x3c   : > { %8279 = dma.done.wait (%p44_p1), [#allocation9], 36912  }
  0x3d   : > { %8281 = vsyncadd (%p44_p1), [#allocation9], 4294930384  ;;  %v5434_v0 = vld [vmem:[#allocation5 + $0x2a0] sm:$0xf]  ;;  %v7493_v1 = vld [vmem:[#allocation5 + $0x2cc] sm:$0xf0] }
  0x3e   : > { %v5818_v2 = vld [vmem:[#allocation5 + $0x5a0] sm:$0xf]  ;;  %v5435_v3 = vor.u32 %v7493_v1, %v5434_v0  ;;  %v7589_v4 = vld [vmem:[#allocation5 + $0x5cc] sm:$0xf0]  ;;  %v7487_v9 = vld [vmem:[#allocation5 + $0x2a4] sm:$0xf] }
  0x3f   : > { %v6202_v5 = vld [vmem:[#allocation5 + $0x8a0] sm:$0xf]  ;;  %v7685_v6 = vld [vmem:[#allocation5 + $0x8cc] sm:$0xf0]  ;;  %v5819_v7 = vor.u32 %v7589_v4, %v5818_v2  ;;  %v5436_v10 = vld [vmem:[#allocation5 + $0x2d0] sm:$0xf0] }
  0x40   : > { %v6203_v8 = vor.u32 %v7685_v6, %v6202_v5  ;;  %v5386_v11 = vld [vmem:[#allocation5 + $0x240] sm:$0xf]  ;;  %2067 = vmatpush.bf16.msra.mxu0 %v5435_v3  ;;  %v5439_v12 = vor.u32 %v7487_v9, %v5436_v10  ;;  %v7481_v13 = vld [vmem:[#allocation5 + $0x26c] sm:$0xf0]  ;;  %v7475_v20 = vld [vmem:[#allocation5 + $0x244] sm:$0xf] }
  0x41   : > { %v5770_v14 = vld [vmem:[#allocation5 + $0x540] sm:$0xf]  ;;  %v7577_v15 = vld [vmem:[#allocation5 + $0x56c] sm:$0xf0]  ;;  %2080 = vmatpush.bf16.msra.mxu1 %v5819_v7  ;;  %v5387_v16 = vor.u32 %v7481_v13, %v5386_v11  ;;  %v5388_v22 = vld [vmem:[#allocation5 + $0x270] sm:$0xf0] }
  0x42   : > { %2093 = vmatpush.bf16.msra.mxu2 %v6203_v8  ;;  %v5771_v17 = vor.u32 %v7577_v15, %v5770_v14  ;;  %v6154_v18 = vld [vmem:[#allocation5 + $0x840] sm:$0xf]  ;;  %v7673_v19 = vld [vmem:[#allocation5 + $0x86c] sm:$0xf0]  ;;  %2106 = vmatpush.bf16.msra.mxu3 %v5439_v12  ;;  %v5391_v25 = vor.u32 %v7475_v20, %v5388_v22  ;;  %v7463_v31 = vld [vmem:[#allocation5 + $0x1e4] sm:$0xf] }
  0x43   : > { %v6155_v21 = vor.u32 %v7673_v19, %v6154_v18  ;;  %v5338_v23 = vld [vmem:[#allocation5 + $0x1e0] sm:$0xf]  ;;  %v7469_v24 = vld [vmem:[#allocation5 + $0x20c] sm:$0xf0]  ;;  %v5340_v32 = vld [vmem:[#allocation5 + $0x210] sm:$0xf0] }
  0x44   : > { %v5722_v26 = vld [vmem:[#allocation5 + $0x4e0] sm:$0xf]  ;;  %v7565_v27 = vld [vmem:[#allocation5 + $0x50c] sm:$0xf0]  ;;  %2068 = vmatpush.bf16.msra.mxu0 %v5387_v16  ;;  %v5339_v29 = vor.u32 %v7469_v24, %v5338_v23  ;;  %v5343_v38 = vor.u32 %v7463_v31, %v5340_v32  ;;  %v7451_v42 = vld [vmem:[#allocation5 + $0x184] sm:$0xf] }
  0x45   : > { %v6106_v28 = vld [vmem:[#allocation5 + $0x7e0] sm:$0xf]  ;;  %v7661_v30 = vld [vmem:[#allocation5 + $0x80c] sm:$0xf0]  ;;  %2081 = vmatpush.bf16.msra.mxu1 %v5771_v17  ;;  %v5723_v33 = vor.u32 %v7565_v27, %v5722_v26  ;;  %v5292_v43 = vld [vmem:[#allocation5 + $0x1b0] sm:$0xf0] }
  0x46   : > { %2094 = vmatpush.bf16.msra.mxu2 %v6155_v21  ;;  %v6107_v34 = vor.u32 %v7661_v30, %v6106_v28  ;;  %v5290_v35 = vld [vmem:[#allocation5 + $0x180] sm:$0xf]  ;;  %v7457_v36 = vld [vmem:[#allocation5 + $0x1ac] sm:$0xf0]  ;;  %2107 = vmatpush.bf16.msra.mxu3 %v5391_v25  ;;  %v5295_v50 = vor.u32 %v7451_v42, %v5292_v43  ;;  %v7439_v54 = vld [vmem:[#allocation5 + $0x124] sm:$0xf] }
  0x47   : > { %v5674_v37 = vld [vmem:[#allocation5 + $0x480] sm:$0xf]  ;;  %v7553_v39 = vld [vmem:[#allocation5 + $0x4ac] sm:$0xf0]  ;;  %v5291_v44 = vor.u32 %v7457_v36, %v5290_v35  ;;  %v5244_v55 = vld [vmem:[#allocation5 + $0x150] sm:$0xf0] }
  0x48   : > { %v6058_v40 = vld [vmem:[#allocation5 + $0x780] sm:$0xf]  ;;  %v7649_v41 = vld [vmem:[#allocation5 + $0x7ac] sm:$0xf0]  ;;  %2069 = vmatpush.bf16.msra.mxu0 %v5339_v29  ;;  %v5675_v45 = vor.u32 %v7553_v39, %v5674_v37  ;;  %v5247_v62 = vor.u32 %v7439_v54, %v5244_v55  ;;  %v7427_v2 = vld [vmem:[#allocation5 + $0xc4] sm:$0xf] }
  0x49   : > { %2082 = vmatpush.bf16.msra.mxu1 %v5723_v33  ;;  %v6059_v46 = vor.u32 %v7649_v41, %v6058_v40  ;;  %v5242_v47 = vld [vmem:[#allocation5 + $0x120] sm:$0xf]  ;;  %v7445_v48 = vld [vmem:[#allocation5 + $0x14c] sm:$0xf0]  ;;  %v5196_v3 = vld [vmem:[#allocation5 + $0xf0] sm:$0xf0] }
  0x4a   : > { %2095 = vmatpush.bf16.msra.mxu2 %v6107_v34  ;;  %v5626_v49 = vld [vmem:[#allocation5 + $0x420] sm:$0xf]  ;;  %2108 = vmatpush.bf16.msra.mxu3 %v5343_v38  ;;  %v7541_v51 = vld [vmem:[#allocation5 + $0x44c] sm:$0xf0]  ;;  %v5243_v56 = vor.u32 %v7445_v48, %v5242_v47  ;;  %v5199_v10 = vor.u32 %v7427_v2, %v5196_v3  ;;  %v7415_v14 = vld [vmem:[#allocation5 + $0x64] sm:$0xf] }
  0x4b   : > { %v6010_v52 = vld [vmem:[#allocation5 + $0x720] sm:$0xf]  ;;  %v7637_v53 = vld [vmem:[#allocation5 + $0x74c] sm:$0xf0]  ;;  %v5627_v57 = vor.u32 %v7541_v51, %v5626_v49  ;;  %v5148_v15 = vld [vmem:[#allocation5 + $0x90] sm:$0xf0] }
  0x4c   : > { %2070 = vmatpush.bf16.msra.mxu0 %v5291_v44  ;;  %v6011_v58 = vor.u32 %v7637_v53, %v6010_v52  ;;  %v5194_v59 = vld [vmem:[#allocation5 + $0xc0] sm:$0xf]  ;;  %v7433_v60 = vld [vmem:[#allocation5 + $0xec] sm:$0xf0]  ;;  %v5151_v24 = vor.u32 %v7415_v14, %v5148_v15  ;;  %v7403_v26 = vld [vmem:[#allocation5 + $0x4] sm:$0xf] }
  0x4d   : > { %2083 = vmatpush.bf16.msra.mxu1 %v5675_v45  ;;  %v5578_v61 = vld [vmem:[#allocation5 + $0x3c0] sm:$0xf]  ;;  %v7529_v63 = vld [vmem:[#allocation5 + $0x3ec] sm:$0xf0]  ;;  %v5195_v4 = vor.u32 %v7433_v60, %v5194_v59  ;;  %v5100_v27 = vld [vmem:[#allocation5 + $0x30] sm:$0xf0] }
  0x4e   : > { %2096 = vmatpush.bf16.msra.mxu2 %v6059_v46  ;;  %2109 = vmatpush.bf16.msra.mxu3 %v5295_v50  ;;  %v5962_v0 = vld [vmem:[#allocation5 + $0x6c0] sm:$0xf]  ;;  %v7625_v1 = vld [vmem:[#allocation5 + $0x6ec] sm:$0xf0]  ;;  %v5579_v5 = vor.u32 %v7529_v63, %v5578_v61  ;;  %v7583_v28 = vld [vmem:[#allocation5 + $0x5a4] sm:$0xf]  ;;  %v5103_v39 = vor.u32 %v7403_v26, %v5100_v27 }
  0x4f   : > { %v5963_v6 = vor.u32 %v7625_v1, %v5962_v0  ;;  %v5146_v7 = vld [vmem:[#allocation5 + $0x60] sm:$0xf]  ;;  %v7421_v8 = vld [vmem:[#allocation5 + $0x8c] sm:$0xf0]  ;;  %v5820_v29 = vld [vmem:[#allocation5 + $0x5d0] sm:$0xf0] }
  0x50   : > { %2071 = vmatpush.bf16.msra.mxu0 %v5243_v56  ;;  %v5530_v9 = vld [vmem:[#allocation5 + $0x360] sm:$0xf]  ;;  %v7517_v11 = vld [vmem:[#allocation5 + $0x38c] sm:$0xf0]  ;;  %v5147_v16 = vor.u32 %v7421_v8, %v5146_v7  ;;  %v7679_v30 = vld [vmem:[#allocation5 + $0x8a4] sm:$0xf]  ;;  %v5823_v40 = vor.u32 %v7583_v28, %v5820_v29 }
  0x51   : > { %2084 = vmatpush.bf16.msra.mxu1 %v5627_v57  ;;  %v5914_v12 = vld [vmem:[#allocation5 + $0x660] sm:$0xf]  ;;  %v7613_v13 = vld [vmem:[#allocation5 + $0x68c] sm:$0xf0]  ;;  %v5531_v19 = vor.u32 %v7517_v11, %v5530_v9  ;;  %v6204_v32 = vld [vmem:[#allocation5 + $0x8d0] sm:$0xf0] }
  0x52   : > { %2097 = vmatpush.bf16.msra.mxu2 %v6011_v58  ;;  %2110 = vmatpush.bf16.msra.mxu3 %v5247_v62  ;;  %v5098_v17 = vld [vmem:[#allocation5] sm:$0xf]  ;;  %v7409_v18 = vld [vmem:[#allocation5 + $0x2c] sm:$0xf0]  ;;  %v5915_v20 = vor.u32 %v7613_v13, %v5914_v12  ;;  %v5442_v33 = vld [vmem:[#allocation5 + $0x2a8] sm:$0xf]  ;;  %v6207_v41 = vor.u32 %v7679_v30, %v6204_v32 }
  0x53   : > { %v5482_v21 = vld [vmem:[#allocation5 + $0x300] sm:$0xf]  ;;  %v7505_v22 = vld [vmem:[#allocation5 + $0x32c] sm:$0xf0]  ;;  %v5099_v31 = vor.u32 %v7409_v18, %v5098_v17  ;;  %v7494_v34 = vld [vmem:[#allocation5 + $0x2d4] sm:$0xf0] }
  0x54   : > { %2072 = vmatpush.bf16.msra.mxu0 %v5195_v4  ;;  %v5866_v23 = vld [vmem:[#allocation5 + $0x600] sm:$0xf]  ;;  %v7601_v25 = vld [vmem:[#allocation5 + $0x62c] sm:$0xf0]  ;;  %v5483_v35 = vor.u32 %v7505_v22, %v5482_v21  ;;  %v5826_v37 = vld [vmem:[#allocation5 + $0x5a8] sm:$0xf]  ;;  %v5443_v42 = vor.u32 %v7494_v34, %v5442_v33 }
  0x55   : > { %2085 = vmatpush.bf16.msra.mxu1 %v5579_v5  ;;  %v5867_v36 = vor.u32 %v7601_v25, %v5866_v23  ;;  %v7590_v38 = vld [vmem:[#allocation5 + $0x5d4] sm:$0xf0]  ;;  %v7571_v43 = vld [vmem:[#allocation5 + $0x544] sm:$0xf]  ;;  %v5772_v44 = vld [vmem:[#allocation5 + $0x570] sm:$0xf0] }
  0x56   : > { %2098 = vmatpush.bf16.msra.mxu2 %v5963_v6  ;;  %2111 = vmatpush.bf16.msra.mxu3 %v5199_v10  ;;  %v7667_v45 = vld [vmem:[#allocation5 + $0x844] sm:$0xf]  ;;  %v5827_v46 = vor.u32 %v7590_v38, %v5826_v37  ;;  %v6156_v47 = vld [vmem:[#allocation5 + $0x870] sm:$0xf0]  ;;  %v5394_v48 = vld [vmem:[#allocation5 + $0x248] sm:$0xf]  ;;  %v5775_v52 = vor.u32 %v7571_v43, %v5772_v44 }
  0x57   : > { %v7482_v49 = vld [vmem:[#allocation5 + $0x274] sm:$0xf0]  ;;  %v5778_v50 = vld [vmem:[#allocation5 + $0x548] sm:$0xf]  ;;  %v7559_v53 = vld [vmem:[#allocation5 + $0x4e4] sm:$0xf]  ;;  %v6159_v54 = vor.u32 %v7667_v45, %v6156_v47 }
  0x58   : > { %2073 = vmatpush.bf16.msra.mxu0 %v5147_v16  ;;  %v7578_v51 = vld [vmem:[#allocation5 + $0x574] sm:$0xf0]  ;;  %v5395_v55 = vor.u32 %v7482_v49, %v5394_v48  ;;  %v5724_v56 = vld [vmem:[#allocation5 + $0x510] sm:$0xf0]  ;;  %v7655_v57 = vld [vmem:[#allocation5 + $0x7e4] sm:$0xf] }
  0x59   : > { %2086 = vmatpush.bf16.msra.mxu1 %v5531_v19  ;;  %v6108_v58 = vld [vmem:[#allocation5 + $0x810] sm:$0xf0]  ;;  %v5779_v59 = vor.u32 %v7578_v51, %v5778_v50  ;;  %v5346_v60 = vld [vmem:[#allocation5 + $0x1e8] sm:$0xf]  ;;  %v7470_v61 = vld [vmem:[#allocation5 + $0x214] sm:$0xf0]  ;;  %v5727_v0 = vor.u32 %v7559_v53, %v5724_v56 }
  0x5a   : > { %2099 = vmatpush.bf16.msra.mxu2 %v5915_v20  ;;  %2112 = vmatpush.bf16.msra.mxu3 %v5151_v24  ;;  %v5730_v62 = vld [vmem:[#allocation5 + $0x4e8] sm:$0xf]  ;;  %v7566_v63 = vld [vmem:[#allocation5 + $0x514] sm:$0xf0]  ;;  %v6111_v1 = vor.u32 %v7655_v57, %v6108_v58  ;;  %v5347_v4 = vor.u32 %v7470_v61, %v5346_v60  ;;  %v7547_v5 = vld [vmem:[#allocation5 + $0x484] sm:$0xf] }
  0x5b   : > { %v307_v2 = vld [vmem:[%s8458_s23 + $0x10] sm:$0xff]  ;;  %v305_v3 = vld [vmem:[%s8458_s23] sm:$0xff]  ;;  %v5731_v10 = vor.u32 %v7566_v63, %v5730_v62  ;;  %v306_v16 = vld [vmem:[%s8458_s23 + $0x8] sm:$0xff]  ;;  %s8656_s26 = scalar_lea.vmem [#allocation11], %s7981_s1  ;;  %s7982_s11 = smul.u32 24, %s8364_s25 }
  0x5c   : > { %2074 = vmatpush.bf16.msra.mxu0 %v5099_v31  ;;  %v5676_v6 = vld [vmem:[#allocation5 + $0x4b0] sm:$0xf0]  ;;  %v7643_v7 = vld [vmem:[#allocation5 + $0x784] sm:$0xf]  ;;  %v8474_v8 = vpack.c.bf16 %v307_v2, %v307_v2  ;;  %v8476_v9 = vpack.c.bf16 %v305_v3, %v305_v3  ;;  %v5298_v12 = vld [vmem:[#allocation5 + $0x188] sm:$0xf]  ;;  %v8482_v18 = vpack.c.bf16 %v306_v16, %v306_v16 }
  0x5d   : > { %2087 = vmatpush.bf16.msra.mxu1 %v5483_v35  ;;  %v6060_v11 = vld [vmem:[#allocation5 + $0x7b0] sm:$0xf0]  ;;  %v7458_v13 = vld [vmem:[#allocation5 + $0x1b4] sm:$0xf0]  ;;  %v5682_v14 = vld [vmem:[#allocation5 + $0x488] sm:$0xf]  ;;  %v5679_v17 = vor.u32 %v7547_v5, %v5676_v6  ;;  %s4970_s27 = scalar_lea.hbm %s8703_s5, %s7982_s11 }
  0x5e   : > { %2100 = vmatpush.bf16.msra.mxu2 %v5867_v36  ;;  %2113 = vmatpush.bf16.msra.mxu3 %v5103_v39  ;;  %v7554_v15 = vld [vmem:[#allocation5 + $0x4b4] sm:$0xf0]  ;;  %v6063_v19 = vor.u32 %v7643_v7, %v6060_v11  ;;  %v5299_v20 = vor.u32 %v7458_v13, %v5298_v12  ;;  %v7535_v21 = vld [vmem:[#allocation5 + $0x424] sm:$0xf]  ;;  %v5628_v22 = vld [vmem:[#allocation5 + $0x450] sm:$0xf0] }
  0x5f   : > { %2075 = vmatmul.bf16.vlgmr.msra.gmra.mxu0 %v8476_v9  ;;  %v7631_v23 = vld [vmem:[#allocation5 + $0x724] sm:$0xf]  ;;  %v5683_v24 = vor.u32 %v7554_v15, %v5682_v14  ;;  %v6012_v25 = vld [vmem:[#allocation5 + $0x750] sm:$0xf0]  ;;  %v5250_v26 = vld [vmem:[#allocation5 + $0x128] sm:$0xf]  ;;  %v5631_v30 = vor.u32 %v7535_v21, %v5628_v22 }
  0x60   : > { %2119 = vmatpush.bf16.msrb.mxu0 %v5823_v40  ;;  %v7446_v27 = vld [vmem:[#allocation5 + $0x154] sm:$0xf0]  ;;  %2088 = vmatmul.bf16.vlgmr.msra.gmra.mxu1 %v8482_v18  ;;  %v5634_v28 = vld [vmem:[#allocation5 + $0x428] sm:$0xf]  ;;  %v6015_v31 = vor.u32 %v7631_v23, %v6012_v25  ;;  %v7523_v33 = vld [vmem:[#allocation5 + $0x3c4] sm:$0xf] }
  0x61   : > { %2132 = vmatpush.bf16.msrb.mxu1 %v6207_v41  ;;  %2101 = vmatmul.bf16.vlgmr.msra.gmra.mxu2 %v8474_v8  ;;  %v7542_v29 = vld [vmem:[#allocation5 + $0x454] sm:$0xf0]  ;;  %v5251_v32 = vor.u32 %v7446_v27, %v5250_v26  ;;  %v5580_v34 = vld [vmem:[#allocation5 + $0x3f0] sm:$0xf0]  ;;  %v7619_v35 = vld [vmem:[#allocation5 + $0x6c4] sm:$0xf] }
  0x62   : > { %2145 = vmatpush.bf16.msrb.mxu2 %v5443_v42  ;;  %2158 = vmatpush.bf16.msrb.mxu3 %v5827_v46  ;;  %v5635_v36 = vor.u32 %v7542_v29, %v5634_v28  ;;  %v5964_v37 = vld [vmem:[#allocation5 + $0x6f0] sm:$0xf0]  ;;  %v5202_v38 = vld [vmem:[#allocation5 + $0xc8] sm:$0xf]  ;;  %v7434_v39 = vld [vmem:[#allocation5 + $0xf4] sm:$0xf0]  ;;  %v5583_v42 = vor.u32 %v7523_v33, %v5580_v34 }
  0x63   : > { %2114 = vmatmul.bf16.vlgmr.msra.gmra.mxu3 %v8476_v9  ;;  %v5586_v40 = vld [vmem:[#allocation5 + $0x3c8] sm:$0xf]  ;;  %v7530_v41 = vld [vmem:[#allocation5 + $0x3f4] sm:$0xf0]  ;;  %v5967_v43 = vor.u32 %v7619_v35, %v5964_v37  ;;  %v5203_v44 = vor.u32 %v7434_v39, %v5202_v38  ;;  %v7511_v45 = vld [vmem:[#allocation5 + $0x364] sm:$0xf] }
  0x64   : > { %2120 = vmatpush.bf16.msrb.mxu0 %v5775_v52  ;;  %v5532_v46 = vld [vmem:[#allocation5 + $0x390] sm:$0xf0]  ;;  %v7607_v47 = vld [vmem:[#allocation5 + $0x664] sm:$0xf]  ;;  %v5587_v48 = vor.u32 %v7530_v41, %v5586_v40  ;;  %v5154_v50 = vld [vmem:[#allocation5 + $0x68] sm:$0xf] }
  0x65   : > { %2133 = vmatpush.bf16.msrb.mxu1 %v6159_v54  ;;  %v5916_v49 = vld [vmem:[#allocation5 + $0x690] sm:$0xf0]  ;;  %v7422_v51 = vld [vmem:[#allocation5 + $0x94] sm:$0xf0]  ;;  %v5538_v52 = vld [vmem:[#allocation5 + $0x368] sm:$0xf]  ;;  %v5535_v54 = vor.u32 %v7511_v45, %v5532_v46 }
  0x66   : > { %2146 = vmatpush.bf16.msrb.mxu2 %v5395_v55  ;;  %2159 = vmatpush.bf16.msrb.mxu3 %v5779_v59  ;;  %v7518_v53 = vld [vmem:[#allocation5 + $0x394] sm:$0xf0]  ;;  %v7499_v55 = vld [vmem:[#allocation5 + $0x304] sm:$0xf]  ;;  %v5484_v56 = vld [vmem:[#allocation5 + $0x330] sm:$0xf0]  ;;  %v5919_v57 = vor.u32 %v7607_v47, %v5916_v49  ;;  %v5155_v58 = vor.u32 %v7422_v51, %v5154_v50 }
  0x67   : > { %v7595_v59 = vld [vmem:[#allocation5 + $0x604] sm:$0xf]  ;;  %v5868_v60 = vld [vmem:[#allocation5 + $0x630] sm:$0xf0]  ;;  %v5106_v61 = vld [vmem:[#allocation5 + $0x8] sm:$0xf]  ;;  %v5539_v62 = vor.u32 %v7518_v53, %v5538_v52  ;;  %v5487_v5 = vor.u32 %v7499_v55, %v5484_v56 }
  0x68   : > { %2121 = vmatpush.bf16.msrb.mxu0 %v5727_v0  ;;  %v7410_v63 = vld [vmem:[#allocation5 + $0x34] sm:$0xf0]  ;;  %v5490_v0 = vld [vmem:[#allocation5 + $0x308] sm:$0xf]  ;;  %v5444_v6 = vld [vmem:[#allocation5 + $0x2d8] sm:$0xf0]  ;;  %v5871_v11 = vor.u32 %v7595_v59, %v5868_v60 }
  0x69   : > { %2134 = vmatpush.bf16.msrb.mxu1 %v6111_v1  ;;  %v7506_v1 = vld [vmem:[#allocation5 + $0x334] sm:$0xf0]  ;;  %v6210_v2 = vld [vmem:[#allocation5 + $0x8a8] sm:$0xf]  ;;  %v7584_v7 = vld [vmem:[#allocation5 + $0x5ac] sm:$0xf]  ;;  %v5107_v12 = vor.u32 %v7410_v63, %v5106_v61 }
  0x6a   : > { %2147 = vmatpush.bf16.msrb.mxu2 %v5347_v4  ;;  %2160 = vmatpush.bf16.msrb.mxu3 %v5731_v10  ;;  %v7686_v3 = vld [vmem:[#allocation5 + $0x8d4] sm:$0xf0]  ;;  %v7488_v4 = vld [vmem:[#allocation5 + $0x2ac] sm:$0xf]  ;;  %v5828_v10 = vld [vmem:[#allocation5 + $0x5d8] sm:$0xf0]  ;;  %v5491_v15 = vor.u32 %v7506_v1, %v5490_v0 }
  0x6b   : > { %v7680_v13 = vld [vmem:[#allocation5 + $0x8ac] sm:$0xf]  ;;  %v6212_v14 = vld [vmem:[#allocation5 + $0x8d8] sm:$0xf0]  ;;  %v6211_v16 = vor.u32 %v7686_v3, %v6210_v2  ;;  %v7674_v21 = vld [vmem:[#allocation5 + $0x874] sm:$0xf0] }
  0x6c   : > { %2122 = vmatpush.bf16.msrb.mxu0 %v5679_v17  ;;  %v5447_v17 = vor.u32 %v7488_v4, %v5444_v6  ;;  %v7476_v22 = vld [vmem:[#allocation5 + $0x24c] sm:$0xf]  ;;  %v6215_v23 = vor.u32 %v7680_v13, %v6212_v14  ;;  %v5780_v26 = vld [vmem:[#allocation5 + $0x578] sm:$0xf0]  ;;  %v7662_v33 = vld [vmem:[#allocation5 + $0x814] sm:$0xf0] }
  0x6d   : > { %2135 = vmatpush.bf16.msrb.mxu1 %v6063_v19  ;;  %v5831_v19 = vor.u32 %v7584_v7, %v5828_v10  ;;  %v7572_v25 = vld [vmem:[#allocation5 + $0x54c] sm:$0xf]  ;;  %v6164_v28 = vld [vmem:[#allocation5 + $0x878] sm:$0xf0]  ;;  %v7650_v45 = vld [vmem:[#allocation5 + $0x7b4] sm:$0xf0] }
  0x6e   : > { %2148 = vmatpush.bf16.msrb.mxu2 %v5299_v20  ;;  %2161 = vmatpush.bf16.msrb.mxu3 %v5683_v24  ;;  %v6162_v20 = vld [vmem:[#allocation5 + $0x848] sm:$0xf]  ;;  %v5396_v24 = vld [vmem:[#allocation5 + $0x278] sm:$0xf0]  ;;  %v7668_v27 = vld [vmem:[#allocation5 + $0x84c] sm:$0xf] }
  0x6f   : > { %v6163_v29 = vor.u32 %v7674_v21, %v6162_v20  ;;  %v7464_v34 = vld [vmem:[#allocation5 + $0x1ec] sm:$0xf]  ;;  %v6167_v35 = vor.u32 %v7668_v27, %v6164_v28  ;;  %v5732_v38 = vld [vmem:[#allocation5 + $0x518] sm:$0xf0]  ;;  %v6018_v56 = vld [vmem:[#allocation5 + $0x728] sm:$0xf] }
  0x70   : > { %2123 = vmatpush.bf16.msrb.mxu0 %v5631_v30  ;;  %v5399_v30 = vor.u32 %v7476_v22, %v5396_v24  ;;  %v7560_v37 = vld [vmem:[#allocation5 + $0x4ec] sm:$0xf]  ;;  %v6116_v40 = vld [vmem:[#allocation5 + $0x818] sm:$0xf0]  ;;  %v5970_v4 = vld [vmem:[#allocation5 + $0x6c8] sm:$0xf] }
  0x71   : > { %2136 = vmatpush.bf16.msrb.mxu1 %v6015_v31  ;;  %v5783_v31 = vor.u32 %v7572_v25, %v5780_v26  ;;  %v7656_v39 = vld [vmem:[#allocation5 + $0x7ec] sm:$0xf]  ;;  %v5684_v50 = vld [vmem:[#allocation5 + $0x4b8] sm:$0xf0]  ;;  %v7614_v20 = vld [vmem:[#allocation5 + $0x694] sm:$0xf0] }
  0x72   : > { %2149 = vmatpush.bf16.msrb.mxu2 %v5251_v32  ;;  %2162 = vmatpush.bf16.msrb.mxu3 %v5635_v36  ;;  %v6114_v32 = vld [vmem:[#allocation5 + $0x7e8] sm:$0xf]  ;;  %v5348_v36 = vld [vmem:[#allocation5 + $0x218] sm:$0xf0]  ;;  %v7452_v46 = vld [vmem:[#allocation5 + $0x18c] sm:$0xf]  ;;  %v6119_v47 = vor.u32 %v7656_v39, %v6116_v40 }
  0x73   : > { %v6115_v41 = vor.u32 %v7662_v33, %v6114_v32  ;;  %v7548_v49 = vld [vmem:[#allocation5 + $0x48c] sm:$0xf]  ;;  %v6068_v52 = vld [vmem:[#allocation5 + $0x7b8] sm:$0xf0]  ;;  %v5450_v40 = vld [vmem:[#allocation5 + $0x2b0] sm:$0xf] }
  0x74   : > { %2124 = vmatpush.bf16.msrb.mxu0 %v5583_v42  ;;  %v5351_v42 = vor.u32 %v7464_v34, %v5348_v36  ;;  %v7644_v51 = vld [vmem:[#allocation5 + $0x78c] sm:$0xf]  ;;  %v5687_v55 = vor.u32 %v7548_v49, %v5684_v50  ;;  %v5252_v60 = vld [vmem:[#allocation5 + $0x158] sm:$0xf0]  ;;  %v7489_v49 = vld [vmem:[#allocation5 + $0x2b4] sm:$0xf] }
  0x75   : > { %2137 = vmatpush.bf16.msrb.mxu1 %v5967_v43  ;;  %v5735_v43 = vor.u32 %v7560_v37, %v5732_v38  ;;  %v6071_v59 = vor.u32 %v7644_v51, %v6068_v52  ;;  %v7536_v61 = vld [vmem:[#allocation5 + $0x42c] sm:$0xf]  ;;  %v6020_v0 = vld [vmem:[#allocation5 + $0x758] sm:$0xf0]  ;;  %v5452_v50 = vld [vmem:[#allocation5 + $0x2e0] sm:$0xf0] }
  0x76   : > { %2150 = vmatpush.bf16.msrb.mxu2 %v5203_v44  ;;  %2163 = vmatpush.bf16.msrb.mxu3 %v5587_v48  ;;  %v6066_v44 = vld [vmem:[#allocation5 + $0x788] sm:$0xf]  ;;  %v5300_v48 = vld [vmem:[#allocation5 + $0x1b8] sm:$0xf0]  ;;  %v7632_v63 = vld [vmem:[#allocation5 + $0x72c] sm:$0xf] }
  0x77   : > { %v6067_v53 = vor.u32 %v7650_v45, %v6066_v44  ;;  %v7428_v6 = vld [vmem:[#allocation5 + $0xcc] sm:$0xf]  ;;  %v6023_v7 = vor.u32 %v7632_v63, %v6020_v0  ;;  %v5204_v10 = vld [vmem:[#allocation5 + $0xf8] sm:$0xf0]  ;;  %v7591_v44 = vld [vmem:[#allocation5 + $0x5dc] sm:$0xf0] }
  0x78   : > { %2125 = vmatpush.bf16.msrb.mxu0 %v5535_v54  ;;  %v5303_v54 = vor.u32 %v7452_v46, %v5300_v48  ;;  %v7620_v13 = vld [vmem:[#allocation5 + $0x6cc] sm:$0xf]  ;;  %v5972_v14 = vld [vmem:[#allocation5 + $0x6f8] sm:$0xf0]  ;;  %v6218_v45 = vld [vmem:[#allocation5 + $0x8b0] sm:$0xf] }
  0x79   : > { %2138 = vmatpush.bf16.msrb.mxu1 %v5919_v57  ;;  %v7638_v57 = vld [vmem:[#allocation5 + $0x754] sm:$0xf0]  ;;  %v7416_v21 = vld [vmem:[#allocation5 + $0x6c] sm:$0xf]  ;;  %v5975_v22 = vor.u32 %v7620_v13, %v5972_v14  ;;  %v5540_v25 = vld [vmem:[#allocation5 + $0x398] sm:$0xf0] }
  0x7a   : > { %2151 = vmatpush.bf16.msrb.mxu2 %v5155_v58  ;;  %2164 = vmatpush.bf16.msrb.mxu3 %v5539_v62  ;;  %v7440_v58 = vld [vmem:[#allocation5 + $0x12c] sm:$0xf]  ;;  %v5636_v62 = vld [vmem:[#allocation5 + $0x458] sm:$0xf0]  ;;  %v6019_v1 = vor.u32 %v7638_v57, %v6018_v56  ;;  %v7687_v46 = vld [vmem:[#allocation5 + $0x8dc] sm:$0xf0] }
  0x7b   : > { %v5255_v2 = vor.u32 %v7440_v58, %v5252_v60  ;;  %v5639_v3 = vor.u32 %v7536_v61, %v5636_v62  ;;  %v7512_v24 = vld [vmem:[#allocation5 + $0x36c] sm:$0xf]  ;;  %v5924_v27 = vld [vmem:[#allocation5 + $0x698] sm:$0xf0]  ;;  %v7483_v56 = vld [vmem:[#allocation5 + $0x27c] sm:$0xf0]  ;;  %v5455_v58 = vor.u32 %v7489_v49, %v5452_v50 }
  0x7c   : > { %2126 = vmatpush.bf16.msrb.mxu0 %v5487_v5  ;;  %v7626_v5 = vld [vmem:[#allocation5 + $0x6f4] sm:$0xf0]  ;;  %v7608_v26 = vld [vmem:[#allocation5 + $0x66c] sm:$0xf]  ;;  %v5543_v32 = vor.u32 %v7512_v24, %v5540_v25  ;;  %v5108_v34 = vld [vmem:[#allocation5 + $0x38] sm:$0xf0] }
  0x7d   : > { %2139 = vmatpush.bf16.msrb.mxu1 %v5871_v11  ;;  %v7524_v11 = vld [vmem:[#allocation5 + $0x3cc] sm:$0xf]  ;;  %v5927_v36 = vor.u32 %v7608_v26, %v5924_v27  ;;  %v5492_v37 = vld [vmem:[#allocation5 + $0x338] sm:$0xf0]  ;;  %v5786_v57 = vld [vmem:[#allocation5 + $0x550] sm:$0xf] }
  0x7e   : > { %2152 = vmatpush.bf16.msrb.mxu2 %v5107_v12  ;;  %2165 = vmatpush.bf16.msrb.mxu3 %v5491_v15  ;;  %v5588_v12 = vld [vmem:[#allocation5 + $0x3f8] sm:$0xf0]  ;;  %v5971_v15 = vor.u32 %v7626_v5, %v5970_v4  ;;  %v7404_v33 = vld [vmem:[#allocation5 + $0xc] sm:$0xf]  ;;  %v6170_v60 = vld [vmem:[#allocation5 + $0x850] sm:$0xf] }
  0x7f   : > { %2127 = vmatmul.bf16.vlgmr.msrb.gmra.mxu0 %v8482_v18  ;;  %v7596_v38 = vld [vmem:[#allocation5 + $0x60c] sm:$0xf]  ;;  %v5876_v39 = vld [vmem:[#allocation5 + $0x638] sm:$0xf0]  ;;  %v7675_v61 = vld [vmem:[#allocation5 + $0x87c] sm:$0xf0] }
  0x80   : > { %2171 = vmatpush.bf16.msra.mxu0 %v6211_v16  ;;  %2140 = vmatmul.bf16.vlgmr.msrb.gmra.mxu1 %v8474_v8  ;;  %v5207_v16 = vor.u32 %v7428_v6, %v5204_v10  ;;  %v5879_v51 = vor.u32 %v7596_v38, %v5876_v39  ;;  %v7477_v62 = vld [vmem:[#allocation5 + $0x254] sm:$0xf]  ;;  %v5404_v63 = vld [vmem:[#allocation5 + $0x280] sm:$0xf0]  ;;  %v7471_v4 = vld [vmem:[#allocation5 + $0x21c] sm:$0xf0] }
  0x81   : > { %2184 = vmatpush.bf16.msra.mxu1 %v5447_v17  ;;  %2153 = vmatmul.bf16.vlgmr.msrb.gmra.mxu2 %v8476_v9  ;;  %v5591_v17 = vor.u32 %v7524_v11, %v5588_v12  ;;  %v5738_v5 = vld [vmem:[#allocation5 + $0x4f0] sm:$0xf]  ;;  %v5407_v6 = vor.u32 %v7477_v62, %v5404_v63  ;;  %v7663_v11 = vld [vmem:[#allocation5 + $0x81c] sm:$0xf0]  ;;  %v7465_v12 = vld [vmem:[#allocation5 + $0x1f4] sm:$0xf] }
  0x82   : > { %2197 = vmatpush.bf16.msra.mxu2 %v5831_v19  ;;  %2210 = vmatpush.bf16.msra.mxu3 %v6215_v23  ;;  %v5922_v19 = vld [vmem:[#allocation5 + $0x668] sm:$0xf]  ;;  %v5156_v23 = vld [vmem:[#allocation5 + $0x98] sm:$0xf0]  ;;  %v6122_v10 = vld [vmem:[#allocation5 + $0x7f0] sm:$0xf] }
  0x83   : > { %2166 = vmatmul.bf16.vlgmr.msrb.gmra.mxu3 %v8482_v18  ;;  %v5923_v28 = vor.u32 %v7614_v20, %v5922_v19  ;;  %v5356_v13 = vld [vmem:[#allocation5 + $0x220] sm:$0xf0]  ;;  %v7459_v19 = vld [vmem:[#allocation5 + $0x1bc] sm:$0xf0]  ;;  %v5690_v20 = vld [vmem:[#allocation5 + $0x490] sm:$0xf] }
  0x84   : > { %2172 = vmatpush.bf16.msra.mxu0 %v6163_v29  ;;  %v5874_v29 = vld [vmem:[#allocation5 + $0x608] sm:$0xf]  ;;  %v7651_v24 = vld [vmem:[#allocation5 + $0x7bc] sm:$0xf0]  ;;  %v7453_v25 = vld [vmem:[#allocation5 + $0x194] sm:$0xf] }
  0x85   : > { %2185 = vmatpush.bf16.msra.mxu1 %v5399_v30  ;;  %v7602_v30 = vld [vmem:[#allocation5 + $0x634] sm:$0xf0]  ;;  %v5308_v26 = vld [vmem:[#allocation5 + $0x1c0] sm:$0xf0]  ;;  %v7429_v49 = vld [vmem:[#allocation5 + $0xd4] sm:$0xf] }
  0x86   : > { %2198 = vmatpush.bf16.msra.mxu2 %v5783_v31  ;;  %2211 = vmatpush.bf16.msra.mxu3 %v6167_v35  ;;  %v5159_v31 = vor.u32 %v7416_v21, %v5156_v23  ;;  %v7500_v35 = vld [vmem:[#allocation5 + $0x30c] sm:$0xf]  ;;  %v5359_v21 = vor.u32 %v7465_v12, %v5356_v13  ;;  %v6074_v23 = vld [vmem:[#allocation5 + $0x790] sm:$0xf]  ;;  %v5260_v38 = vld [vmem:[#allocation5 + $0x160] sm:$0xf0] }
  0x87   : > { %v5495_v48 = vor.u32 %v7500_v35, %v5492_v37  ;;  %v6026_v35 = vld [vmem:[#allocation5 + $0x730] sm:$0xf]  ;;  %v7441_v37 = vld [vmem:[#allocation5 + $0x134] sm:$0xf]  ;;  %v5212_v50 = vld [vmem:[#allocation5 + $0x100] sm:$0xf0] }
  0x88   : > { %2173 = vmatpush.bf16.msra.mxu0 %v6115_v41  ;;  %v7495_v41 = vld [vmem:[#allocation5 + $0x2dc] sm:$0xf0]  ;;  %v5164_v62 = vld [vmem:[#allocation5 + $0xa0] sm:$0xf0]  ;;  %v7585_v13 = vld [vmem:[#allocation5 + $0x5b4] sm:$0xf] }
  0x89   : > { %2186 = vmatpush.bf16.msra.mxu1 %v5351_v42  ;;  %v5834_v42 = vld [vmem:[#allocation5 + $0x5b0] sm:$0xf]  ;;  %v5451_v52 = vor.u32 %v7495_v41, %v5450_v40  ;;  %v5116_v12 = vld [vmem:[#allocation5 + $0x40] sm:$0xf0]  ;;  %s4972_s28 = sshll.u32 %s8656_s26, 4  ;;  %s4974_s29 = sshll.u32 %s4970_s27, 4  ;;  %s4973_s28 = int_to_ptr.vmem [resolvable:$true] %s4972_s28  ;;  %s4975_s29 = int_to_ptr.hbm [resolvable:$true] %s4974_s29 }
  0x8a   : > { %2199 = vmatpush.bf16.msra.mxu2 %v5735_v43  ;;  %2212 = vmatpush.bf16.msra.mxu3 %v6119_v47  ;;  %v5875_v43 = vor.u32 %v7602_v30, %v5874_v29  ;;  %v5111_v47 = vor.u32 %v7404_v33, %v5108_v34  ;;  %v6075_v29 = vor.u32 %v7651_v24, %v6074_v23  ;;  %v5258_v30 = vld [vmem:[#allocation5 + $0x130] sm:$0xf]  ;;  %v7543_v34 = vld [vmem:[#allocation5 + $0x45c] sm:$0xf0]  ;;  %v5842_v23 = vld [vmem:[#allocation5 + $0x5b8] sm:$0xf] }
  0x8b   : > { %v5311_v33 = vor.u32 %v7453_v25, %v5308_v26  ;;  %v7592_v24 = vld [vmem:[#allocation5 + $0x5e4] sm:$0xf0]  ;;  %s4959_s30 = scalar_lea.sflag [#allocation4], %s8452_s7  ;;  %s8240_s8 = sshra.s32 %s4975_s29, 4  ;;  %s8241_s8 = int_to_ptr.hbm [resolvable:$true] %s8240_s8 }
  0x8c   : > { %2174 = vmatpush.bf16.msra.mxu0 %v6067_v53  ;;  %v5835_v53 = vor.u32 %v7591_v44, %v5834_v42  ;;  %v5210_v42 = vld [vmem:[#allocation5 + $0xd0] sm:$0xf]  ;;  %s8242_s25 = scalar_lea.hbm %s8241_s8, 24  ;;  %s8246_s22 = scalar_lea.hbm %s8703_s5, 48 }
  0x8d   : > { %2187 = vmatpush.bf16.msra.mxu1 %v5303_v54  ;;  %v6219_v54 = vor.u32 %v7687_v46, %v6218_v45  ;;  %v5594_v44 = vld [vmem:[#allocation5 + $0x3d0] sm:$0xf]  ;;  %v5263_v45 = vor.u32 %v7441_v37, %v5260_v38  ;;  %v7531_v46 = vld [vmem:[#allocation5 + $0x3fc] sm:$0xf0]  ;;  %v7580_v37 = vld [vmem:[#allocation5 + $0x584] sm:$0xf0]  ;;  %p8243_p1 = scmp.ne.s32.totalorder %s8241_s8, %s8242_s25  ;;  %p8247_p12 = scmp.lt.s32.totalorder %s8241_s8, %s8703_s5 }
  0x8e   : > { %2200 = vmatpush.bf16.msra.mxu2 %v5687_v55  ;;  %2213 = vmatpush.bf16.msra.mxu3 %v6071_v59  ;;  %v5402_v55 = vld [vmem:[#allocation5 + $0x250] sm:$0xf]  ;;  %v7579_v59 = vld [vmem:[#allocation5 + $0x57c] sm:$0xf0]  ;;  %p8248_p7 = scmp.lt.s32.totalorder %s8246_s22, %s8242_s25 }
  0x8f   : > { %v5403_v0 = vor.u32 %v7483_v56, %v5402_v55  ;;  %v7423_v55 = vld [vmem:[#allocation5 + $0x9c] sm:$0xf0]  ;;  %v5546_v56 = vld [vmem:[#allocation5 + $0x370] sm:$0xf]  ;;  %p8244_p3 = pnand %p8243_p1, %p8423_p4 }
  0x90   : > { %2175 = vmatpush.bf16.msra.mxu0 %v6019_v1  ;;  %v5787_v1 = vor.u32 %v7579_v59, %v5786_v57  ;;  %v5215_v57 = vor.u32 %v7429_v49, %v5212_v50  ;;  %v5930_v59 = vld [vmem:[#allocation5 + $0x670] sm:$0xf]  ;;  %v7568_v49 = vld [vmem:[#allocation5 + $0x524] sm:$0xf0]  ;;  %p8249_p8 = por %p8248_p7, %p8247_p12 }
  0x91   : > { %2188 = vmatpush.bf16.msra.mxu1 %v5255_v2  ;;  %v6171_v2 = vor.u32 %v7675_v61, %v6170_v60  ;;  %v7615_v60 = vld [vmem:[#allocation5 + $0x69c] sm:$0xf0]  ;;  %v7417_v61 = vld [vmem:[#allocation5 + $0x74] sm:$0xf]  ;;  %p8245_p5 = pneg %p8244_p3 }
  0x92   : > { %2201 = vmatpush.bf16.msra.mxu2 %v5639_v3  ;;  %2214 = vmatpush.bf16.msra.mxu3 %v6023_v7  ;;  %v5354_v3 = vld [vmem:[#allocation5 + $0x1f0] sm:$0xf]  ;;  %v7567_v7 = vld [vmem:[#allocation5 + $0x51c] sm:$0xf0] }
  0x93   : > { %v5355_v14 = vor.u32 %v7471_v4, %v5354_v3  ;;  %v5931_v3 = vor.u32 %v7615_v60, %v5930_v59  ;;  %v5498_v4 = vld [vmem:[#allocation5 + $0x310] sm:$0xf]  ;;  %v7460_v59 = vld [vmem:[#allocation5 + $0x1c4] sm:$0xf0]  ;;  %v5698_v60 = vld [vmem:[#allocation5 + $0x498] sm:$0xf]  ;;  %p8250_p9 = pnand %p8249_p8, %p8245_p5 }
  0x94   : > { %2176 = vmatpush.bf16.msra.mxu0 %v5971_v15  ;;  %v5739_v15 = vor.u32 %v7567_v7, %v5738_v5  ;;  %v7507_v5 = vld [vmem:[#allocation5 + $0x33c] sm:$0xf0]  ;;  %v5167_v7 = vor.u32 %v7417_v61, %v5164_v62  ;;  %v7556_v61 = vld [vmem:[#allocation5 + $0x4c4] sm:$0xf0] }
  0x95   : > { %2189 = vmatpush.bf16.msra.mxu1 %v5207_v16  ;;  %v6123_v16 = vor.u32 %v7663_v11, %v6122_v10  ;;  %v7603_v10 = vld [vmem:[#allocation5 + $0x63c] sm:$0xf0]  ;;  %v7405_v11 = vld [vmem:[#allocation5 + $0x14] sm:$0xf] }
  0x96   : > { %2202 = vmatpush.bf16.msra.mxu2 %v5591_v17  ;;  %2215 = vmatpush.bf16.msra.mxu3 %v5975_v22  ;;  %v5306_v17 = vld [vmem:[#allocation5 + $0x190] sm:$0xf]  ;;  %v7555_v22 = vld [vmem:[#allocation5 + $0x4bc] sm:$0xf0]  ;;  %v5119_v25 = vor.u32 %v7405_v11, %v5116_v12  ;;  %v7544_v11 = vld [vmem:[#allocation5 + $0x464] sm:$0xf0] }
  0x97   : > { %v5307_v27 = vor.u32 %v7459_v19, %v5306_v17  ;;  %v6220_v17 = vld [vmem:[#allocation5 + $0x8e0] sm:$0xf0]  ;;  %v5458_v19 = vld [vmem:[#allocation5 + $0x2b8] sm:$0xf] }
  0x98   : > { %2177 = vmatpush.bf16.msra.mxu0 %v5923_v28  ;;  %v5691_v28 = vor.u32 %v7555_v22, %v5690_v20  ;;  %v7496_v20 = vld [vmem:[#allocation5 + $0x2e4] sm:$0xf0] }
  0x99   : > { %2190 = vmatpush.bf16.msra.mxu1 %v5159_v31  ;;  %v7447_v31 = vld [vmem:[#allocation5 + $0x15c] sm:$0xf0] }
  0x9a   : > { %2203 = vmatpush.bf16.msra.mxu2 %v5543_v32  ;;  %2216 = vmatpush.bf16.msra.mxu3 %v5927_v36  ;;  %v5642_v32 = vld [vmem:[#allocation5 + $0x430] sm:$0xf]  ;;  %v7639_v36 = vld [vmem:[#allocation5 + $0x75c] sm:$0xf0]  ;;  %v5259_v39 = vor.u32 %v7447_v31, %v5258_v30  ;;  %v5788_v30 = vld [vmem:[#allocation5 + $0x580] sm:$0xf0] }
  0x9b   : > { %v5643_v40 = vor.u32 %v7543_v34, %v5642_v32  ;;  %v6027_v41 = vor.u32 %v7639_v36, %v6026_v35  ;;  %v7669_v31 = vld [vmem:[#allocation5 + $0x854] sm:$0xf]  ;;  %v5843_v32 = vor.u32 %v7592_v24, %v5842_v23  ;;  %v5410_v34 = vld [vmem:[#allocation5 + $0x258] sm:$0xf]  ;;  %v7484_v35 = vld [vmem:[#allocation5 + $0x284] sm:$0xf0] }
  0x9c   : > { %2178 = vmatpush.bf16.msra.mxu0 %v5875_v43  ;;  %v7435_v43 = vld [vmem:[#allocation5 + $0xfc] sm:$0xf0]  ;;  %v5794_v36 = vld [vmem:[#allocation5 + $0x558] sm:$0xf]  ;;  %v7532_v24 = vld [vmem:[#allocation5 + $0x404] sm:$0xf0] }
  0x9d   : > { %2191 = vmatpush.bf16.msra.mxu1 %v5111_v47  ;;  %v5978_v47 = vld [vmem:[#allocation5 + $0x6d0] sm:$0xf]  ;;  %v5602_v23 = vld [vmem:[#allocation5 + $0x3d8] sm:$0xf] }
  0x9e   : > { %2204 = vmatpush.bf16.msra.mxu2 %v5495_v48  ;;  %2217 = vmatpush.bf16.msra.mxu3 %v5879_v51  ;;  %v7627_v48 = vld [vmem:[#allocation5 + $0x6fc] sm:$0xf0]  ;;  %v5211_v51 = vor.u32 %v7435_v43, %v5210_v42  ;;  %v5740_v42 = vld [vmem:[#allocation5 + $0x520] sm:$0xf0]  ;;  %v7657_v43 = vld [vmem:[#allocation5 + $0x7f4] sm:$0xf] }
  0x9f   : > { %2179 = vmatmul.bf16.vlgmr.msra.gmra.mxu0 %v8474_v8 }
  0xa0   : > { %2223 = vmatpush.bf16.msrb.mxu0 %v5451_v52  ;;  %2192 = vmatmul.bf16.vlgmr.msra.gmra.mxu1 %v8476_v9  ;;  %v5595_v52 = vor.u32 %v7531_v46, %v5594_v44  ;;  %v5795_v44 = vor.u32 %v7580_v37, %v5794_v36  ;;  %v5362_v46 = vld [vmem:[#allocation5 + $0x1f8] sm:$0xf]  ;;  %v7520_v36 = vld [vmem:[#allocation5 + $0x3a4] sm:$0xf0] }
  0xa1   : > { %2236 = vmatpush.bf16.msrb.mxu1 %v5835_v53  ;;  %2205 = vmatmul.bf16.vlgmr.msra.gmra.mxu2 %v8482_v18  ;;  %v5979_v53 = vor.u32 %v7627_v48, %v5978_v47  ;;  %v7472_v47 = vld [vmem:[#allocation5 + $0x224] sm:$0xf0]  ;;  %v5746_v48 = vld [vmem:[#allocation5 + $0x4f8] sm:$0xf] }
  0xa2   : > { %2249 = vmatpush.bf16.msrb.mxu2 %v6219_v54  ;;  %2262 = vmatpush.bf16.msrb.mxu3 %v5455_v58  ;;  %v5162_v54 = vld [vmem:[#allocation5 + $0x70] sm:$0xf]  ;;  %v7519_v58 = vld [vmem:[#allocation5 + $0x39c] sm:$0xf0] }
  0xa3   : > { %2218 = vmatmul.bf16.vlgmr.msra.gmra.mxu3 %v8474_v8  ;;  %v5163_v63 = vor.u32 %v7423_v55, %v5162_v54  ;;  %v5692_v54 = vld [vmem:[#allocation5 + $0x4c0] sm:$0xf0]  ;;  %v7645_v55 = vld [vmem:[#allocation5 + $0x794] sm:$0xf] }
  0xa4   : > { %2224 = vmatpush.bf16.msrb.mxu0 %v5403_v0  ;;  %v5114_v0 = vld [vmem:[#allocation5 + $0x10] sm:$0xf] }
  0xa5   : > { %2237 = vmatpush.bf16.msrb.mxu1 %v5787_v1  ;;  %v7411_v1 = vld [vmem:[#allocation5 + $0x3c] sm:$0xf0] }
  0xa6   : > { %2250 = vmatpush.bf16.msrb.mxu2 %v6171_v2  ;;  %2263 = vmatpush.bf16.msrb.mxu3 %v5407_v6  ;;  %v5547_v2 = vor.u32 %v7519_v58, %v5546_v56  ;;  %v5882_v6 = vld [vmem:[#allocation5 + $0x610] sm:$0xf]  ;;  %v5747_v56 = vor.u32 %v7568_v49, %v5746_v48  ;;  %v5314_v58 = vld [vmem:[#allocation5 + $0x198] sm:$0xf]  ;;  %v7508_v48 = vld [vmem:[#allocation5 + $0x344] sm:$0xf0] }
  0xa7   : > { %v5883_v22 = vor.u32 %v7603_v10, %v5882_v6  ;;  %v5266_v6 = vld [vmem:[#allocation5 + $0x138] sm:$0xf] }
  0xa8   : > { %2225 = vmatpush.bf16.msrb.mxu0 %v5355_v14  ;;  %v5836_v14 = vld [vmem:[#allocation5 + $0x5e0] sm:$0xf0]  ;;  %v5650_v10 = vld [vmem:[#allocation5 + $0x438] sm:$0xf] }
  0xa9   : > { %2238 = vmatpush.bf16.msrb.mxu1 %v5739_v15  ;;  %v7681_v15 = vld [vmem:[#allocation5 + $0x8b4] sm:$0xf]  ;;  %v5839_v26 = vor.u32 %v7585_v13, %v5836_v14  ;;  %v6226_v49 = vld [vmem:[#allocation5 + $0x8b8] sm:$0xf] }
  0xaa   : > { %2251 = vmatpush.bf16.msrb.mxu2 %v6123_v16  ;;  %2264 = vmatpush.bf16.msrb.mxu3 %v5359_v21  ;;  %v5115_v16 = vor.u32 %v7411_v1, %v5114_v0  ;;  %v5499_v21 = vor.u32 %v7507_v5, %v5498_v4  ;;  %v5315_v0 = vor.u32 %v7460_v59, %v5314_v58  ;;  %v7537_v1 = vld [vmem:[#allocation5 + $0x434] sm:$0xf]  ;;  %v6028_v5 = vld [vmem:[#allocation5 + $0x760] sm:$0xf0]  ;;  %v7682_v58 = vld [vmem:[#allocation5 + $0x8bc] sm:$0xf] }
  0xab   : > { %v5699_v4 = vor.u32 %v7556_v61, %v5698_v60  ;;  %v6228_v59 = vld [vmem:[#allocation5 + $0x8e8] sm:$0xf0] }
  0xac   : > { %2226 = vmatpush.bf16.msrb.mxu0 %v5307_v27  ;;  %v6223_v27 = vor.u32 %v7681_v15, %v6220_v17  ;;  %v7525_v15 = vld [vmem:[#allocation5 + $0x3d4] sm:$0xf] }
  0xad   : > { %2239 = vmatpush.bf16.msrb.mxu1 %v5691_v28  ;;  %v5459_v28 = vor.u32 %v7496_v20, %v5458_v19  ;;  %v7621_v17 = vld [vmem:[#allocation5 + $0x6d4] sm:$0xf]  ;;  %v5651_v19 = vor.u32 %v7544_v11, %v5650_v10  ;;  %v5980_v20 = vld [vmem:[#allocation5 + $0x700] sm:$0xf0]  ;;  %v6180_v10 = vld [vmem:[#allocation5 + $0x888] sm:$0xf0] }
  0xae   : > { %2252 = vmatpush.bf16.msrb.mxu2 %v6075_v29  ;;  %2265 = vmatpush.bf16.msrb.mxu3 %v5311_v33  ;;  %v7573_v29 = vld [vmem:[#allocation5 + $0x554] sm:$0xf]  ;;  %v6172_v33 = vld [vmem:[#allocation5 + $0x880] sm:$0xf0] }
  0xaf   : > { %v5791_v38 = vor.u32 %v7573_v29, %v5788_v30  ;;  %v5548_v29 = vld [vmem:[#allocation5 + $0x3a0] sm:$0xf0]  ;;  %v7609_v30 = vld [vmem:[#allocation5 + $0x674] sm:$0xf] }
  0xb0   : > { %2227 = vmatpush.bf16.msrb.mxu0 %v5259_v39  ;;  %v6175_v39 = vor.u32 %v7669_v31, %v6172_v33  ;;  %v5603_v31 = vor.u32 %v7532_v24, %v5602_v23  ;;  %v5170_v33 = vld [vmem:[#allocation5 + $0x78] sm:$0xf]  ;;  %v6132_v23 = vld [vmem:[#allocation5 + $0x828] sm:$0xf0] }
  0xb1   : > { %2240 = vmatpush.bf16.msrb.mxu1 %v5643_v40  ;;  %v5411_v40 = vor.u32 %v7484_v35, %v5410_v34  ;;  %v7424_v34 = vld [vmem:[#allocation5 + $0xa4] sm:$0xf0]  ;;  %v5554_v35 = vld [vmem:[#allocation5 + $0x378] sm:$0xf] }
  0xb2   : > { %2253 = vmatpush.bf16.msrb.mxu2 %v6027_v41  ;;  %2266 = vmatpush.bf16.msrb.mxu3 %v5263_v45  ;;  %v7561_v41 = vld [vmem:[#allocation5 + $0x4f4] sm:$0xf]  ;;  %v6124_v45 = vld [vmem:[#allocation5 + $0x820] sm:$0xf0] }
  0xb3   : > { %v5743_v50 = vor.u32 %v7561_v41, %v5740_v42  ;;  %v5171_v41 = vor.u32 %v7424_v34, %v5170_v33  ;;  %v7597_v42 = vld [vmem:[#allocation5 + $0x614] sm:$0xf]  ;;  %v5700_v33 = vld [vmem:[#allocation5 + $0x4c8] sm:$0xf0]  ;;  %v8501_v34 = vld [vmem:[#allocation7] sm:$0xff] }
  0xb4   : > { %2228 = vmatpush.bf16.msrb.mxu0 %v5211_v51  ;;  %v6127_v51 = vor.u32 %v7657_v43, %v6124_v45  ;;  %v5884_v43 = vld [vmem:[#allocation5 + $0x640] sm:$0xf0]  ;;  %v5555_v45 = vor.u32 %v7520_v36, %v5554_v35  ;;  %v7646_v35 = vld [vmem:[#allocation5 + $0x79c] sm:$0xf]  ;;  %v6084_v36 = vld [vmem:[#allocation5 + $0x7c8] sm:$0xf0] }
  0xb5   : > { %2241 = vmatpush.bf16.msrb.mxu1 %v5595_v52  ;;  %v5363_v52 = vor.u32 %v7472_v47, %v5362_v46  ;;  %v7412_v46 = vld [vmem:[#allocation5 + $0x44] sm:$0xf0]  ;;  %v5506_v47 = vld [vmem:[#allocation5 + $0x318] sm:$0xf] }
  0xb6   : > { %2254 = vmatpush.bf16.msrb.mxu2 %v5979_v53  ;;  %2267 = vmatpush.bf16.msrb.mxu3 %v5215_v57  ;;  %v7549_v53 = vld [vmem:[#allocation5 + $0x494] sm:$0xf]  ;;  %v6076_v57 = vld [vmem:[#allocation5 + $0x7c0] sm:$0xf0]  ;;  %v5507_v60 = vor.u32 %v7508_v48, %v5506_v47  ;;  %v5652_v47 = vld [vmem:[#allocation5 + $0x468] sm:$0xf0] }
  0xb7   : > { %v5695_v62 = vor.u32 %v7549_v53, %v5692_v54  ;;  %v5460_v53 = vld [vmem:[#allocation5 + $0x2e8] sm:$0xf0]  ;;  %v7586_v54 = vld [vmem:[#allocation5 + $0x5bc] sm:$0xf] }
  0xb8   : > { %2229 = vmatpush.bf16.msrb.mxu0 %v5163_v63  ;;  %v6079_v63 = vor.u32 %v7645_v55, %v6076_v57  ;;  %v5844_v55 = vld [vmem:[#allocation5 + $0x5e8] sm:$0xf0]  ;;  %v7634_v48 = vld [vmem:[#allocation5 + $0x73c] sm:$0xf] }
  0xb9   : > { %2242 = vmatpush.bf16.msrb.mxu1 %v5547_v2  ;;  %v5644_v2 = vld [vmem:[#allocation5 + $0x460] sm:$0xf0] }
  0xba   : > { %2255 = vmatpush.bf16.msrb.mxu2 %v5931_v3  ;;  %2268 = vmatpush.bf16.msrb.mxu3 %v5167_v7  ;;  %v7633_v3 = vld [vmem:[#allocation5 + $0x734] sm:$0xf]  ;;  %v7448_v7 = vld [vmem:[#allocation5 + $0x164] sm:$0xf0]  ;;  %v5647_v12 = vor.u32 %v7537_v1, %v5644_v2  ;;  %v7478_v2 = vld [vmem:[#allocation5 + $0x25c] sm:$0xf] }
  0xbb   : > { %v6031_v13 = vor.u32 %v7633_v3, %v6028_v5  ;;  %v5267_v14 = vor.u32 %v7448_v7, %v5266_v6  ;;  %v7676_v1 = vld [vmem:[#allocation5 + $0x884] sm:$0xf0]  ;;  %v6231_v3 = vor.u32 %v7682_v58, %v6228_v59  ;;  %v7574_v5 = vld [vmem:[#allocation5 + $0x55c] sm:$0xf]  ;;  %v5796_v6 = vld [vmem:[#allocation5 + $0x588] sm:$0xf0] }
  0xbc   : > { %2230 = vmatpush.bf16.msrb.mxu0 %v5115_v16  ;;  %v5596_v16 = vld [vmem:[#allocation5 + $0x400] sm:$0xf0]  ;;  %v7670_v7 = vld [vmem:[#allocation5 + $0x85c] sm:$0xf]  ;;  %v5220_v59 = vld [vmem:[#allocation5 + $0x108] sm:$0xf0] }
  0xbd   : > { %2243 = vmatpush.bf16.msrb.mxu1 %v5499_v21  ;;  %v5218_v21 = vld [vmem:[#allocation5 + $0xd8] sm:$0xf] }
  0xbe   : > { %2256 = vmatpush.bf16.msrb.mxu2 %v5883_v22  ;;  %2269 = vmatpush.bf16.msrb.mxu3 %v5119_v25  ;;  %v7436_v22 = vld [vmem:[#allocation5 + $0x104] sm:$0xf0]  ;;  %v5599_v25 = vor.u32 %v7525_v15, %v5596_v16  ;;  %v7466_v16 = vld [vmem:[#allocation5 + $0x1fc] sm:$0xf] }
  0xbf   : > { %2231 = vmatmul.bf16.vlgmr.msrb.gmra.mxu0 %v8476_v9  ;;  %v7664_v15 = vld [vmem:[#allocation5 + $0x824] sm:$0xf0] }
  0xc0   : > { %2275 = vmatpush.bf16.msra.mxu0 %v5839_v26  ;;  %2244 = vmatmul.bf16.vlgmr.msrb.gmra.mxu1 %v8482_v18  ;;  %v5983_v26 = vor.u32 %v7621_v17, %v5980_v20  ;;  %v6183_v17 = vor.u32 %v7670_v7, %v6180_v10  ;;  %v7562_v20 = vld [vmem:[#allocation5 + $0x4fc] sm:$0xf] }
  0xc1   : > { %2288 = vmatpush.bf16.msra.mxu1 %v6223_v27  ;;  %2257 = vmatmul.bf16.vlgmr.msrb.gmra.mxu2 %v8474_v8  ;;  %v5219_v27 = vor.u32 %v7436_v22, %v5218_v21  ;;  %v5748_v21 = vld [vmem:[#allocation5 + $0x528] sm:$0xf0]  ;;  %v7658_v22 = vld [vmem:[#allocation5 + $0x7fc] sm:$0xf] }
  0xc2   : > { %2301 = vmatpush.bf16.msra.mxu2 %v5459_v28  ;;  %2314 = vmatpush.bf16.msra.mxu3 %v5843_v32  ;;  %v7513_v28 = vld [vmem:[#allocation5 + $0x374] sm:$0xf]  ;;  %v5932_v32 = vld [vmem:[#allocation5 + $0x6a0] sm:$0xf0]  ;;  %v7418_v7 = vld [vmem:[#allocation5 + $0x7c] sm:$0xf] }
  0xc3   : > { %2270 = vmatmul.bf16.vlgmr.msrb.gmra.mxu3 %v8476_v9  ;;  %v5551_v37 = vor.u32 %v7513_v28, %v5548_v29  ;;  %v7652_v28 = vld [vmem:[#allocation5 + $0x7c4] sm:$0xf0]  ;;  %v7454_v29 = vld [vmem:[#allocation5 + $0x19c] sm:$0xf] }
  0xc4   : > { %2276 = vmatpush.bf16.msra.mxu0 %v5791_v38  ;;  %v7501_v38 = vld [vmem:[#allocation5 + $0x314] sm:$0xf] }
  0xc5   : > { %2289 = vmatpush.bf16.msra.mxu1 %v6175_v39  ;;  %v5500_v39 = vld [vmem:[#allocation5 + $0x340] sm:$0xf0] }
  0xc6   : > { %2302 = vmatpush.bf16.msra.mxu2 %v5411_v40  ;;  %2315 = vmatpush.bf16.msra.mxu3 %v5795_v44  ;;  %v5935_v40 = vor.u32 %v7609_v30, %v5932_v32  ;;  %v5122_v44 = vld [vmem:[#allocation5 + $0x18] sm:$0xf]  ;;  %v5316_v30 = vld [vmem:[#allocation5 + $0x1c8] sm:$0xf0]  ;;  %v7550_v32 = vld [vmem:[#allocation5 + $0x49c] sm:$0xf] }
  0xc7   : > { %v5123_v57 = vor.u32 %v7412_v46, %v5122_v44  ;;  %v6087_v44 = vor.u32 %v7646_v35, %v6084_v36  ;;  %v7538_v46 = vld [vmem:[#allocation5 + $0x43c] sm:$0xf]  ;;  %v7497_v35 = vld [vmem:[#allocation5 + $0x2ec] sm:$0xf0]  ;;  %v5850_v36 = vld [vmem:[#allocation5 + $0x5c0] sm:$0xf] }
  0xc8   : > { %2277 = vmatpush.bf16.msra.mxu0 %v5743_v50  ;;  %v7688_v50 = vld [vmem:[#allocation5 + $0x8e4] sm:$0xf0] }
  0xc9   : > { %2290 = vmatpush.bf16.msra.mxu1 %v6127_v51  ;;  %v7490_v51 = vld [vmem:[#allocation5 + $0x2bc] sm:$0xf]  ;;  %v6227_v61 = vor.u32 %v7688_v50, %v6226_v49  ;;  %v6036_v49 = vld [vmem:[#allocation5 + $0x768] sm:$0xf0] }
  0xca   : > { %2303 = vmatpush.bf16.msra.mxu2 %v5363_v52  ;;  %2316 = vmatpush.bf16.msra.mxu3 %v5747_v56  ;;  %v5503_v52 = vor.u32 %v7501_v38, %v5500_v39  ;;  %v5887_v56 = vor.u32 %v7597_v42, %v5884_v43  ;;  %v6034_v38 = vld [vmem:[#allocation5 + $0x738] sm:$0xf]  ;;  %v5319_v39 = vor.u32 %v7454_v29, %v5316_v30  ;;  %v7442_v42 = vld [vmem:[#allocation5 + $0x13c] sm:$0xf]  ;;  %v603_v43 = vperm.slane %v8501_v34, 0 }
  0xcb   : > { %v6039_v58 = vor.u32 %v7634_v48, %v6036_v49  ;;  %v5508_v30 = vld [vmem:[#allocation5 + $0x348] sm:$0xf0] }
  0xcc   : > { %2278 = vmatpush.bf16.msra.mxu0 %v5695_v62  ;;  %v5463_v62 = vor.u32 %v7490_v51, %v5460_v53  ;;  %v5655_v53 = vor.u32 %v7538_v46, %v5652_v47 }
  0xcd   : > { %2291 = vmatpush.bf16.msra.mxu1 %v6079_v63  ;;  %v5847_v63 = vor.u32 %v7586_v54, %v5844_v55  ;;  %v5986_v54 = vld [vmem:[#allocation5 + $0x6d8] sm:$0xf]  ;;  %v7628_v55 = vld [vmem:[#allocation5 + $0x704] sm:$0xf0] }
  0xce   : > { %2304 = vmatpush.bf16.msra.mxu2 %v5315_v0  ;;  %2317 = vmatpush.bf16.msra.mxu3 %v5699_v4  ;;  %v6178_v0 = vld [vmem:[#allocation5 + $0x858] sm:$0xf]  ;;  %v5412_v4 = vld [vmem:[#allocation5 + $0x288] sm:$0xf0] }
  0xcf   : > { %v6179_v11 = vor.u32 %v7676_v1, %v6178_v0  ;;  %v5987_v1 = vor.u32 %v7628_v55, %v5986_v54 }
  0xd0   : > { %2279 = vmatpush.bf16.msra.mxu0 %v5647_v12  ;;  %v5415_v12 = vor.u32 %v7478_v2, %v5412_v4 }
  0xd1   : > { %2292 = vmatpush.bf16.msra.mxu1 %v6031_v13  ;;  %v5799_v13 = vor.u32 %v7574_v5, %v5796_v6  ;;  %v5938_v5 = vld [vmem:[#allocation5 + $0x678] sm:$0xf]  ;;  %v7616_v6 = vld [vmem:[#allocation5 + $0x6a4] sm:$0xf0] }
  0xd2   : > { %2305 = vmatpush.bf16.msra.mxu2 %v5267_v14  ;;  %2318 = vmatpush.bf16.msra.mxu3 %v5651_v19  ;;  %v6130_v14 = vld [vmem:[#allocation5 + $0x7f8] sm:$0xf]  ;;  %v5364_v19 = vld [vmem:[#allocation5 + $0x228] sm:$0xf0] }
  0xd3   : > { %v6131_v24 = vor.u32 %v7664_v15, %v6130_v14  ;;  %v7610_v15 = vld [vmem:[#allocation5 + $0x67c] sm:$0xf] }
  0xd4   : > { %2280 = vmatpush.bf16.msra.mxu0 %v5599_v25  ;;  %v6082_v25 = vld [vmem:[#allocation5 + $0x798] sm:$0xf] }
  0xd5   : > { %2293 = vmatpush.bf16.msra.mxu1 %v5983_v26  ;;  %v5367_v26 = vor.u32 %v7466_v16, %v5364_v19  ;;  %v5940_v16 = vld [vmem:[#allocation5 + $0x6a8] sm:$0xf0] }
  0xd6   : > { %2306 = vmatpush.bf16.msra.mxu2 %v5219_v27  ;;  %2319 = vmatpush.bf16.msra.mxu3 %v5603_v31  ;;  %v5751_v27 = vor.u32 %v7562_v20, %v5748_v21  ;;  %v6135_v31 = vor.u32 %v7658_v22, %v6132_v23  ;;  %v5939_v20 = vor.u32 %v7616_v6, %v5938_v5  ;;  %v5890_v21 = vld [vmem:[#allocation5 + $0x618] sm:$0xf]  ;;  %v7604_v22 = vld [vmem:[#allocation5 + $0x644] sm:$0xf0]  ;;  %v7569_v5 = vld [vmem:[#allocation5 + $0x52c] sm:$0xf0] }
  0xd7   : > { %v5943_v29 = vor.u32 %v7610_v15, %v5940_v16  ;;  %v6138_v6 = vld [vmem:[#allocation5 + $0x800] sm:$0xf] }
  0xd8   : > { %2281 = vmatpush.bf16.msra.mxu0 %v5551_v37  ;;  %v6083_v37 = vor.u32 %v7652_v28, %v6082_v25  ;;  %v7502_v28 = vld [vmem:[#allocation5 + $0x31c] sm:$0xf]  ;;  %v5322_v16 = vld [vmem:[#allocation5 + $0x1a0] sm:$0xf] }
  0xd9   : > { %2294 = vmatpush.bf16.msra.mxu1 %v5935_v40  ;;  %v5703_v40 = vor.u32 %v7550_v32, %v5700_v33  ;;  %v5892_v32 = vld [vmem:[#allocation5 + $0x648] sm:$0xf0]  ;;  %v5466_v33 = vld [vmem:[#allocation5 + $0x2c0] sm:$0xf] }
  0xda   : > { %2307 = vmatpush.bf16.msra.mxu2 %v5171_v41  ;;  %2320 = vmatpush.bf16.msra.mxu3 %v5555_v45  ;;  %v7640_v41 = vld [vmem:[#allocation5 + $0x764] sm:$0xf0]  ;;  %v5268_v45 = vld [vmem:[#allocation5 + $0x168] sm:$0xf0]  ;;  %v5467_v47 = vor.u32 %v7497_v35, %v5466_v33  ;;  %v5274_v33 = vld [vmem:[#allocation5 + $0x140] sm:$0xf] }
  0xdb   : > { %v6035_v50 = vor.u32 %v7640_v41, %v6034_v38  ;;  %v5891_v38 = vor.u32 %v7604_v22, %v5890_v21  ;;  %v7689_v41 = vld [vmem:[#allocation5 + $0x8ec] sm:$0xf0]  ;;  %v5706_v21 = vld [vmem:[#allocation5 + $0x4a0] sm:$0xf] }
  0xdc   : > { %2282 = vmatpush.bf16.msra.mxu0 %v5503_v52  ;;  %v2076_v51 = vpop.f32.mrf.mxu0  ;;  %v5271_v52 = vor.u32 %v7442_v42, %v5268_v45  ;;  %v5468_v45 = vld [vmem:[#allocation5 + $0x2f0] sm:$0xf0]  ;;  %v7449_v35 = vld [vmem:[#allocation5 + $0x16c] sm:$0xf0] }
  0xdd   : > { %2295 = vmatpush.bf16.msra.mxu1 %v5887_v56  ;;  %v7430_v56 = vld [vmem:[#allocation5 + $0xdc] sm:$0xf]  ;;  %v2089_v0 = vpop.f32.mrf.mxu1 }
  0xde   : > { %2308 = vmatpush.bf16.msra.mxu2 %v5123_v57  ;;  %2321 = vmatpush.bf16.msra.mxu3 %v5507_v60  ;;  %v2077_v57 = vadd.f32 %v2076_v51, %v603_v43  ;;  %v7526_v60 = vld [vmem:[#allocation5 + $0x3dc] sm:$0xf]  ;;  %v5511_v43 = vor.u32 %v7502_v28, %v5508_v30  ;;  %v5418_v51 = vld [vmem:[#allocation5 + $0x260] sm:$0xf] }
  0xdf   : > { %2283 = vmatmul.bf16.vlgmr.msra.gmra.mxu0 %v8482_v18 }
  0xe0   : > { %2327 = vmatpush.bf16.msrb.mxu0 %v6227_v61  ;;  %2296 = vmatmul.bf16.vlgmr.msra.gmra.mxu1 %v8474_v8  ;;  %v5604_v61 = vld [vmem:[#allocation5 + $0x408] sm:$0xf0]  ;;  %v2090_v2 = vadd.f32 %v2089_v0, %v2077_v57  ;;  %v6186_v57 = vld [vmem:[#allocation5 + $0x860] sm:$0xf] }
  0xe1   : > { %2340 = vmatpush.bf16.msrb.mxu1 %v5463_v62  ;;  %2309 = vmatmul.bf16.vlgmr.msra.gmra.mxu2 %v8476_v9  ;;  %v7622_v62 = vld [vmem:[#allocation5 + $0x6dc] sm:$0xf]  ;;  %v5607_v4 = vor.u32 %v7526_v60, %v5604_v61  ;;  %v5420_v60 = vld [vmem:[#allocation5 + $0x290] sm:$0xf0] }
  0xe2   : > { %2353 = vmatpush.bf16.msrb.mxu2 %v5847_v63  ;;  %2366 = vmatpush.bf16.msrb.mxu3 %v6231_v3  ;;  %v5988_v63 = vld [vmem:[#allocation5 + $0x708] sm:$0xf0]  ;;  %v5223_v3 = vor.u32 %v7430_v56, %v5220_v59  ;;  %v7581_v56 = vld [vmem:[#allocation5 + $0x58c] sm:$0xf0]  ;;  %v7479_v59 = vld [vmem:[#allocation5 + $0x264] sm:$0xf] }
  0xe3   : > { %2322 = vmatmul.bf16.vlgmr.msra.gmra.mxu3 %v8482_v18  ;;  %v5991_v10 = vor.u32 %v7622_v62, %v5988_v63  ;;  %v604_v62 = vperm.slane %v8501_v34, 1 }
  0xe4   : > { %2328 = vmatpush.bf16.msrb.mxu0 %v6179_v11  ;;  %v5172_v11 = vld [vmem:[#allocation5 + $0xa8] sm:$0xf0]  ;;  %v2102_v14 = vpop.f32.mrf.mxu2  ;;  %v2078_v23 = vpop.f32.mrf.mxu0 }
  0xe5   : > { %2341 = vmatpush.bf16.msrb.mxu1 %v5415_v12  ;;  %v7514_v12 = vld [vmem:[#allocation5 + $0x37c] sm:$0xf]  ;;  %v7557_v23 = vld [vmem:[#allocation5 + $0x4cc] sm:$0xf0] }
  0xe6   : > { %2354 = vmatpush.bf16.msrb.mxu2 %v5799_v13  ;;  %2367 = vmatpush.bf16.msrb.mxu3 %v6183_v17  ;;  %v5556_v13 = vld [vmem:[#allocation5 + $0x3a8] sm:$0xf0]  ;;  %v8504_v17 = vadd.f32 %v2102_v14, %v2090_v2  ;;  %v8506_v19 = vpop.f32.mrf.mxu3  ;;  %v7473_v2 = vld [vmem:[#allocation5 + $0x22c] sm:$0xf0] }
  0xe7   : > { %v5559_v25 = vor.u32 %v7514_v12, %v5556_v13  ;;  %v2116_v13 = vadd.f32 %v8506_v19, %v604_v62 }
  0xe8   : > { %2329 = vmatpush.bf16.msrb.mxu0 %v6131_v24  ;;  %v5175_v24 = vor.u32 %v7418_v7, %v5172_v11  ;;  %v7665_v7 = vld [vmem:[#allocation5 + $0x82c] sm:$0xf0]  ;;  %v5372_v11 = vld [vmem:[#allocation5 + $0x230] sm:$0xf0] }
  0xe9   : > { %2342 = vmatpush.bf16.msrb.mxu1 %v5367_v26  ;;  %v7406_v26 = vld [vmem:[#allocation5 + $0x1c] sm:$0xf]  ;;  %v6139_v15 = vor.u32 %v7665_v7, %v6138_v6  ;;  %v7521_v6 = vld [vmem:[#allocation5 + $0x3ac] sm:$0xf0]  ;;  %v5946_v7 = vld [vmem:[#allocation5 + $0x680] sm:$0xf] }
  0xea   : > { %2355 = vmatpush.bf16.msrb.mxu2 %v5751_v27  ;;  %2368 = vmatpush.bf16.msrb.mxu3 %v6135_v31  ;;  %v5124_v27 = vld [vmem:[#allocation5 + $0x48] sm:$0xf0]  ;;  %v7598_v31 = vld [vmem:[#allocation5 + $0x61c] sm:$0xf] }
  0xeb   : > { %v5127_v42 = vor.u32 %v7406_v26, %v5124_v27  ;;  %v5895_v46 = vor.u32 %v7598_v31, %v5892_v32  ;;  %v7455_v26 = vld [vmem:[#allocation5 + $0x1a4] sm:$0xf]  ;;  %v5324_v27 = vld [vmem:[#allocation5 + $0x1d0] sm:$0xf0]  ;;  %v5707_v31 = vor.u32 %v7557_v23, %v5706_v21  ;;  %v5514_v21 = vld [vmem:[#allocation5 + $0x320] sm:$0xf] }
  0xec   : > { %2330 = vmatpush.bf16.msrb.mxu0 %v6083_v37  ;;  %v2091_v37 = vpop.f32.mrf.mxu1  ;;  %v2104_v48 = vpop.f32.mrf.mxu2  ;;  %v5898_v23 = vld [vmem:[#allocation5 + $0x620] sm:$0xf] }
  0xed   : > { %2343 = vmatpush.bf16.msrb.mxu1 %v5319_v39  ;;  %v7593_v39 = vld [vmem:[#allocation5 + $0x5ec] sm:$0xf0]  ;;  %v5327_v37 = vor.u32 %v7455_v26, %v5324_v27  ;;  %v5226_v48 = vld [vmem:[#allocation5 + $0xe0] sm:$0xf]  ;;  %v7407_v26 = vld [vmem:[#allocation5 + $0x24] sm:$0xf] }
  0xee   : > { %2356 = vmatpush.bf16.msrb.mxu2 %v5703_v40  ;;  %2369 = vmatpush.bf16.msrb.mxu3 %v6087_v44  ;;  %v6234_v40 = vld [vmem:[#allocation5 + $0x8c0] sm:$0xf]  ;;  %v7491_v44 = vld [vmem:[#allocation5 + $0x2c4] sm:$0xf]  ;;  %v5851_v49 = vor.u32 %v7593_v39, %v5850_v36  ;;  %v2117_v54 = vpop.f32.mrf.mxu3  ;;  %v5132_v27 = vld [vmem:[#allocation5 + $0x50] sm:$0xf0] }
  0xef   : > { %v5471_v55 = vor.u32 %v7491_v44, %v5468_v45  ;;  %v5658_v36 = vld [vmem:[#allocation5 + $0x440] sm:$0xf]  ;;  %v605_v44 = vperm.slane %v8501_v34, 2  ;;  %v5275_v45 = vor.u32 %v7449_v35, %v5274_v33  ;;  %v7629_v54 = vld [vmem:[#allocation5 + $0x70c] sm:$0xf0] }
  0xf0   : > { %2331 = vmatpush.bf16.msrb.mxu0 %v6035_v50  ;;  %v6235_v50 = vor.u32 %v7689_v41, %v6234_v40  ;;  %v6042_v39 = vld [vmem:[#allocation5 + $0x740] sm:$0xf]  ;;  %v7641_v40 = vld [vmem:[#allocation5 + $0x76c] sm:$0xf0]  ;;  %v6236_v33 = vld [vmem:[#allocation5 + $0x8f0] sm:$0xf0] }
  0xf1   : > { %2344 = vmatpush.bf16.msrb.mxu1 %v5271_v52  ;;  %v7485_v52 = vld [vmem:[#allocation5 + $0x28c] sm:$0xf0]  ;;  %v5474_v35 = vld [vmem:[#allocation5 + $0x2c8] sm:$0xf] }
  0xf2   : > { %2357 = vmatpush.bf16.msrb.mxu2 %v5655_v53  ;;  %2370 = vmatpush.bf16.msrb.mxu3 %v6039_v58  ;;  %v5802_v53 = vld [vmem:[#allocation5 + $0x560] sm:$0xf]  ;;  %v7677_v58 = vld [vmem:[#allocation5 + $0x88c] sm:$0xf0]  ;;  %v5419_v61 = vor.u32 %v7485_v52, %v5418_v51 }
  0xf3   : > { %v5803_v63 = vor.u32 %v7581_v56, %v5802_v53  ;;  %v6187_v0 = vor.u32 %v7677_v58, %v6186_v57  ;;  %v7533_v52 = vld [vmem:[#allocation5 + $0x40c] sm:$0xf0]  ;;  %v5994_v53 = vld [vmem:[#allocation5 + $0x6e0] sm:$0xf]  ;;  %v7431_v56 = vld [vmem:[#allocation5 + $0xe4] sm:$0xf] }
  0xf4   : > { %2332 = vmatpush.bf16.msrb.mxu0 %v5987_v1  ;;  %v5370_v1 = vld [vmem:[#allocation5 + $0x200] sm:$0xf]  ;;  %v5228_v57 = vld [vmem:[#allocation5 + $0x110] sm:$0xf0] }
  0xf5   : > { %2345 = vmatpush.bf16.msrb.mxu1 %v5223_v3  ;;  %v5754_v3 = vld [vmem:[#allocation5 + $0x500] sm:$0xf]  ;;  %v5371_v12 = vor.u32 %v7473_v2, %v5370_v1  ;;  %v7425_v2 = vld [vmem:[#allocation5 + $0xac] sm:$0xf0] }
  0xf6   : > { %2358 = vmatpush.bf16.msrb.mxu2 %v5607_v4  ;;  %2371 = vmatpush.bf16.msrb.mxu3 %v5991_v10  ;;  %v5423_v4 = vor.u32 %v7479_v59, %v5420_v60  ;;  %v7467_v10 = vld [vmem:[#allocation5 + $0x204] sm:$0xf]  ;;  %v5755_v14 = vor.u32 %v7569_v5, %v5754_v3  ;;  %v5178_v1 = vld [vmem:[#allocation5 + $0x80] sm:$0xf]  ;;  %v5231_v5 = vor.u32 %v7431_v56, %v5228_v57 }
  0xf7   : > { %v5375_v22 = vor.u32 %v7467_v10, %v5372_v11  ;;  %v5562_v3 = vld [vmem:[#allocation5 + $0x380] sm:$0xf]  ;;  %v7617_v10 = vld [vmem:[#allocation5 + $0x6ac] sm:$0xf0]  ;;  %v7419_v11 = vld [vmem:[#allocation5 + $0x84] sm:$0xf] }
  0xf8   : > { %2333 = vmatpush.bf16.msrb.mxu0 %v5939_v20  ;;  %v7461_v20 = vld [vmem:[#allocation5 + $0x1cc] sm:$0xf0] }
  0xf9   : > { %2346 = vmatpush.bf16.msrb.mxu1 %v5175_v24  ;;  %v6090_v24 = vld [vmem:[#allocation5 + $0x7a0] sm:$0xf] }
  0xfa   : > { %2359 = vmatpush.bf16.msrb.mxu2 %v5559_v25  ;;  %2372 = vmatpush.bf16.msrb.mxu3 %v5943_v29  ;;  %v7653_v25 = vld [vmem:[#allocation5 + $0x7cc] sm:$0xf0]  ;;  %v5323_v29 = vor.u32 %v7461_v20, %v5322_v16  ;;  %v5563_v16 = vor.u32 %v7521_v6, %v5562_v3  ;;  %v5947_v20 = vor.u32 %v7617_v10, %v5946_v7  ;;  %v7551_v7 = vld [vmem:[#allocation5 + $0x4a4] sm:$0xf]  ;;  %v5708_v10 = vld [vmem:[#allocation5 + $0x4d0] sm:$0xf0] }
  0xfb   : > { %v6091_v32 = vor.u32 %v7653_v25, %v6090_v24  ;;  %v7605_v25 = vld [vmem:[#allocation5 + $0x64c] sm:$0xf0] }
  0xfc   : > { %2334 = vmatpush.bf16.msrb.mxu0 %v5891_v38  ;;  %v2128_v28 = vpop.f32.mrf.mxu0  ;;  %v7545_v38 = vld [vmem:[#allocation5 + $0x46c] sm:$0xf0] }
  0xfd   : > { %2347 = vmatpush.bf16.msrb.mxu1 %v5127_v42  ;;  %v2129_v19 = vadd.f32 %v2128_v28, %v2116_v13  ;;  %v2141_v30 = vpop.f32.mrf.mxu1  ;;  %v7443_v42 = vld [vmem:[#allocation5 + $0x144] sm:$0xf]  ;;  %v5179_v13 = vor.u32 %v7425_v2, %v5178_v1  ;;  %v5762_v1 = vld [vmem:[#allocation5 + $0x508] sm:$0xf]  ;;  %v7570_v2 = vld [vmem:[#allocation5 + $0x534] sm:$0xf0] }
  0xfe   : > { %2360 = vmatpush.bf16.msrb.mxu2 %v5511_v43  ;;  %2373 = vmatpush.bf16.msrb.mxu3 %v5895_v46  ;;  %v5276_v43 = vld [vmem:[#allocation5 + $0x170] sm:$0xf0]  ;;  %v5659_v46 = vor.u32 %v7545_v38, %v5658_v36  ;;  %v7498_v36 = vld [vmem:[#allocation5 + $0x2f4] sm:$0xf0]  ;;  %v5899_v38 = vor.u32 %v7605_v25, %v5898_v23  ;;  %v5711_v23 = vor.u32 %v7551_v7, %v5708_v10 }
  0xff   : > { %2335 = vmatmul.bf16.vlgmr.msrb.gmra.mxu0 %v8474_v8  ;;  %v8514_v41 = vadd.f32 %v2141_v30, %v2129_v19  ;;  %v5279_v51 = vor.u32 %v7443_v42, %v5276_v43  ;;  %v5852_v19 = vld [vmem:[#allocation5 + $0x5f0] sm:$0xf0]  ;;  %v7683_v30 = vld [vmem:[#allocation5 + $0x8c4] sm:$0xf]  ;;  %v5135_v42 = vor.u32 %v7407_v26, %v5132_v27 }
 0x100   : > { %2379 = vmatpush.bf16.msra.mxu0 %v5467_v47  ;;  %2348 = vmatmul.bf16.vlgmr.msrb.gmra.mxu1 %v8476_v9  ;;  %v6043_v47 = vor.u32 %v7641_v40, %v6042_v39  ;;  %v5858_v39 = vld [vmem:[#allocation5 + $0x5c8] sm:$0xf]  ;;  %v7594_v40 = vld [vmem:[#allocation5 + $0x5f4] sm:$0xf0]  ;;  %v7539_v27 = vld [vmem:[#allocation5 + $0x444] sm:$0xf] }
 0x101   : > { %2392 = vmatpush.bf16.msra.mxu1 %v5851_v49  ;;  %2361 = vmatmul.bf16.vlgmr.msrb.gmra.mxu2 %v8482_v18  ;;  %v7437_v49 = vld [vmem:[#allocation5 + $0x10c] sm:$0xf0]  ;;  %v5516_v7 = vld [vmem:[#allocation5 + $0x350] sm:$0xf0] }
 0x102   : > { %2405 = vmatpush.bf16.msra.mxu2 %v6235_v50  ;;  %2418 = vmatpush.bf16.msra.mxu3 %v5471_v55  ;;  %v5610_v50 = vld [vmem:[#allocation5 + $0x3e0] sm:$0xf] }
 0x103   : > { %2374 = vmatmul.bf16.vlgmr.msrb.gmra.mxu3 %v8474_v8 }
 0x104   : > { %2380 = vmatpush.bf16.msra.mxu0 %v5419_v61  ;;  %v2154_v55 = vpop.f32.mrf.mxu2  ;;  %v2130_v60 = vpop.f32.mrf.mxu0  ;;  %v5227_v61 = vor.u32 %v7437_v49, %v5226_v48  ;;  %v7671_v48 = vld [vmem:[#allocation5 + $0x864] sm:$0xf]  ;;  %v5859_v49 = vor.u32 %v7594_v40, %v5858_v39 }
 0x105   : > { %2393 = vmatpush.bf16.msra.mxu1 %v5803_v63  ;;  %v2155_v58 = vadd.f32 %v2154_v55, %v605_v44  ;;  %v2143_v62 = vpop.f32.mrf.mxu1  ;;  %v5611_v63 = vor.u32 %v7533_v52, %v5610_v50  ;;  %v6239_v44 = vor.u32 %v7683_v30, %v6236_v33  ;;  %v6188_v50 = vld [vmem:[#allocation5 + $0x890] sm:$0xf0]  ;;  %v7486_v52 = vld [vmem:[#allocation5 + $0x294] sm:$0xf0]  ;;  %v7659_v60 = vld [vmem:[#allocation5 + $0x804] sm:$0xf] }
 0x106   : > { %2406 = vmatpush.bf16.msra.mxu2 %v6187_v0  ;;  %2419 = vmatpush.bf16.msra.mxu3 %v5423_v4  ;;  %v2167_v59 = vpop.f32.mrf.mxu3  ;;  %v5995_v0 = vor.u32 %v7629_v54, %v5994_v53  ;;  %v5810_v53 = vld [vmem:[#allocation5 + $0x568] sm:$0xf]  ;;  %v7582_v54 = vld [vmem:[#allocation5 + $0x594] sm:$0xf0]  ;;  %v6191_v56 = vor.u32 %v7671_v48, %v6188_v50  ;;  %v6140_v62 = vld [vmem:[#allocation5 + $0x830] sm:$0xf0] }
 0x107   : > { %v8517_v4 = vadd.f32 %v2167_v59, %v2155_v58  ;;  %v7563_v58 = vld [vmem:[#allocation5 + $0x504] sm:$0xf]  ;;  %v5756_v59 = vld [vmem:[#allocation5 + $0x530] sm:$0xf0]  ;;  %v7450_v33 = vld [vmem:[#allocation5 + $0x174] sm:$0xf0] }
 0x108   : > { %2381 = vmatpush.bf16.msra.mxu0 %v5371_v12  ;;  %v5180_v12 = vld [vmem:[#allocation5 + $0xb0] sm:$0xf0]  ;;  %v5759_v3 = vor.u32 %v7563_v58, %v5756_v59  ;;  %v7527_v40 = vld [vmem:[#allocation5 + $0x3e4] sm:$0xf]  ;;  %v5618_v50 = vld [vmem:[#allocation5 + $0x3e8] sm:$0xf] }
 0x109   : > { %2394 = vmatpush.bf16.msra.mxu1 %v5755_v14  ;;  %v5130_v14 = vld [vmem:[#allocation5 + $0x20] sm:$0xf]  ;;  %v5183_v24 = vor.u32 %v7419_v11, %v5180_v12  ;;  %v7647_v11 = vld [vmem:[#allocation5 + $0x7a4] sm:$0xf]  ;;  %v5763_v12 = vor.u32 %v7570_v2, %v5762_v1  ;;  %v5564_v58 = vld [vmem:[#allocation5 + $0x3b0] sm:$0xf0] }
 0x10a   : > { %2407 = vmatpush.bf16.msra.mxu2 %v6139_v15  ;;  %2420 = vmatpush.bf16.msra.mxu3 %v5375_v22  ;;  %v7413_v15 = vld [vmem:[#allocation5 + $0x4c] sm:$0xf0]  ;;  %v7611_v59 = vld [vmem:[#allocation5 + $0x684] sm:$0xf]  ;;  %v7426_v1 = vld [vmem:[#allocation5 + $0xb4] sm:$0xf0] }
 0x10b   : > { %v7509_v22 = vld [vmem:[#allocation5 + $0x34c] sm:$0xf0]  ;;  %v5570_v2 = vld [vmem:[#allocation5 + $0x388] sm:$0xf] }
 0x10c   : > { %2382 = vmatpush.bf16.msra.mxu0 %v5323_v29  ;;  %v2156_v28 = vpop.f32.mrf.mxu2  ;;  %v7587_v29 = vld [vmem:[#allocation5 + $0x5c4] sm:$0xf] }
 0x10d   : > { %2395 = vmatpush.bf16.msra.mxu1 %v5707_v31  ;;  %v5855_v43 = vor.u32 %v7587_v29, %v5852_v19  ;;  %v5660_v28 = vld [vmem:[#allocation5 + $0x470] sm:$0xf0]  ;;  %v7635_v29 = vld [vmem:[#allocation5 + $0x744] sm:$0xf] }
 0x10e   : > { %2408 = vmatpush.bf16.msra.mxu2 %v6091_v32  ;;  %2421 = vmatpush.bf16.msra.mxu3 %v5327_v37  ;;  %v2169_v31 = vpop.f32.mrf.mxu3  ;;  %v5131_v32 = vor.u32 %v7413_v15, %v5130_v14  ;;  %v5515_v37 = vor.u32 %v7509_v22, %v5514_v21  ;;  %v5330_v14 = vld [vmem:[#allocation5 + $0x1a8] sm:$0xf]  ;;  %v7462_v15 = vld [vmem:[#allocation5 + $0x1d4] sm:$0xf0]  ;;  %v606_v22 = vperm.slane %v8501_v34, 3 }
 0x10f   : > { %v5331_v26 = vor.u32 %v7462_v15, %v5330_v14  ;;  %v6044_v31 = vld [vmem:[#allocation5 + $0x770] sm:$0xf0]  ;;  %v5138_v14 = vld [vmem:[#allocation5 + $0x28] sm:$0xf] }
 0x110   : > { %2383 = vmatpush.bf16.msra.mxu0 %v5275_v45  ;;  %v5475_v45 = vor.u32 %v7498_v36, %v5474_v35  ;;  %v5666_v35 = vld [vmem:[#allocation5 + $0x448] sm:$0xf]  ;;  %v7546_v36 = vld [vmem:[#allocation5 + $0x474] sm:$0xf0] }
 0x111   : > { %2396 = vmatpush.bf16.msra.mxu1 %v5659_v46  ;;  %v7575_v46 = vld [vmem:[#allocation5 + $0x564] sm:$0xf] }
 0x112   : > { %2409 = vmatpush.bf16.msra.mxu2 %v6043_v47  ;;  %2422 = vmatpush.bf16.msra.mxu3 %v5279_v51  ;;  %v5804_v47 = vld [vmem:[#allocation5 + $0x590] sm:$0xf0]  ;;  %v5426_v51 = vld [vmem:[#allocation5 + $0x268] sm:$0xf] }
 0x113   : > { %v5807_v55 = vor.u32 %v7575_v46, %v5804_v47  ;;  %v5427_v57 = vor.u32 %v7486_v52, %v5426_v51  ;;  %v5234_v46 = vld [vmem:[#allocation5 + $0xe8] sm:$0xf]  ;;  %v7438_v47 = vld [vmem:[#allocation5 + $0x114] sm:$0xf0] }
 0x114   : > { %2384 = vmatpush.bf16.msra.mxu0 %v5227_v61  ;;  %v5811_v61 = vor.u32 %v7582_v54, %v5810_v53  ;;  %v7534_v51 = vld [vmem:[#allocation5 + $0x414] sm:$0xf0] }
 0x115   : > { %2397 = vmatpush.bf16.msra.mxu1 %v5611_v63  ;;  %v5378_v63 = vld [vmem:[#allocation5 + $0x208] sm:$0xf] }
 0x116   : > { %2410 = vmatpush.bf16.msra.mxu2 %v5995_v0  ;;  %2423 = vmatpush.bf16.msra.mxu3 %v5231_v5  ;;  %v7474_v0 = vld [vmem:[#allocation5 + $0x234] sm:$0xf0]  ;;  %v6143_v5 = vor.u32 %v7659_v60, %v6140_v62  ;;  %v5619_v62 = vor.u32 %v7534_v51, %v5618_v50 }
 0x117   : > { %v5379_v6 = vor.u32 %v7474_v0, %v5378_v63  ;;  %v5948_v63 = vld [vmem:[#allocation5 + $0x6b0] sm:$0xf0]  ;;  %v5186_v0 = vld [vmem:[#allocation5 + $0x88] sm:$0xf] }
 0x118   : > { %2385 = vmatpush.bf16.msra.mxu0 %v5179_v13  ;;  %v6092_v13 = vld [vmem:[#allocation5 + $0x7d0] sm:$0xf0]  ;;  %v5951_v10 = vor.u32 %v7611_v59, %v5948_v63  ;;  %v7660_v59 = vld [vmem:[#allocation5 + $0x80c] sm:$0xf]  ;;  %v6098_v63 = vld [vmem:[#allocation5 + $0x7a8] sm:$0xf] }
 0x119   : > { %2398 = vmatpush.bf16.msra.mxu1 %v5563_v16  ;;  %v5714_v16 = vld [vmem:[#allocation5 + $0x4a8] sm:$0xf]  ;;  %v6095_v25 = vor.u32 %v7647_v11, %v6092_v13  ;;  %v5187_v11 = vor.u32 %v7426_v1, %v5186_v0  ;;  %v5900_v13 = vld [vmem:[#allocation5 + $0x650] sm:$0xf0] }
 0x11a   : > { %2411 = vmatpush.bf16.msra.mxu2 %v5947_v20  ;;  %2424 = vmatpush.bf16.msra.mxu3 %v5183_v24  ;;  %v7558_v20 = vld [vmem:[#allocation5 + $0x4d4] sm:$0xf0] }
 0x11b   : > { %v5715_v30 = vor.u32 %v7558_v20, %v5714_v16  ;;  %v7414_v16 = vld [vmem:[#allocation5 + $0x54] sm:$0xf0]  ;;  %v5522_v20 = vld [vmem:[#allocation5 + $0x328] sm:$0xf] }
 0x11c   : > { %2386 = vmatpush.bf16.msra.mxu0 %v5131_v32  ;;  %v2180_v21 = vpop.f32.mrf.mxu0  ;;  %v5282_v32 = vld [vmem:[#allocation5 + $0x148] sm:$0xf] }
 0x11d   : > { %2399 = vmatpush.bf16.msra.mxu1 %v5515_v37  ;;  %v8525_v24 = vadd.f32 %v2180_v21, %v8517_v4  ;;  %v2193_v19 = vpop.f32.mrf.mxu1  ;;  %v6047_v4 = vor.u32 %v7635_v29, %v6044_v31  ;;  %v5283_v39 = vor.u32 %v7450_v33, %v5282_v32  ;;  %v7510_v21 = vld [vmem:[#allocation5 + $0x354] sm:$0xf0]  ;;  %v5476_v29 = vld [vmem:[#allocation5 + $0x2f8] sm:$0xf0]  ;;  %v5139_v32 = vor.u32 %v7414_v16, %v5138_v14  ;;  %v7684_v33 = vld [vmem:[#allocation5 + $0x8cc] sm:$0xf] }
 0x11e   : > { %2412 = vmatpush.bf16.msra.mxu2 %v5899_v38  ;;  %2425 = vmatpush.bf16.msra.mxu3 %v5135_v42  ;;  %v2194_v37 = vadd.f32 %v2193_v19, %v606_v22  ;;  %v5663_v38 = vor.u32 %v7539_v27, %v5660_v28  ;;  %v5612_v42 = vld [vmem:[#allocation5 + $0x410] sm:$0xf0]  ;;  %v7492_v27 = vld [vmem:[#allocation5 + $0x2cc] sm:$0xf] }
 0x11f   : > { %2387 = vmatmul.bf16.vlgmr.msra.gmra.mxu0 %v8476_v9  ;;  %v5615_v54 = vor.u32 %v7527_v40, %v5612_v42  ;;  %v7588_v19 = vld [vmem:[#allocation5 + $0x5cc] sm:$0xf]  ;;  %v7678_v40 = vld [vmem:[#allocation5 + $0x894] sm:$0xf0] }
 0x120   : > { %2431 = vmatpush.bf16.msrb.mxu0 %v5855_v43  ;;  %2400 = vmatmul.bf16.vlgmr.msra.gmra.mxu1 %v8482_v18  ;;  %v7623_v43 = vld [vmem:[#allocation5 + $0x6e4] sm:$0xf]  ;;  %v7480_v42 = vld [vmem:[#allocation5 + $0x26c] sm:$0xf] }
 0x121   : > { %2444 = vmatpush.bf16.msrb.mxu1 %v6239_v44  ;;  %2413 = vmatmul.bf16.vlgmr.msra.gmra.mxu2 %v8474_v8  ;;  %v5667_v44 = vor.u32 %v7546_v36, %v5666_v35  ;;  %v6244_v35 = vld [vmem:[#allocation5 + $0x8f8] sm:$0xf0]  ;;  %v5523_v36 = vor.u32 %v7510_v21, %v5522_v20  ;;  %v6050_v21 = vld [vmem:[#allocation5 + $0x748] sm:$0xf] }
 0x122   : > { %2457 = vmatpush.bf16.msrb.mxu2 %v5475_v45  ;;  %2470 = vmatpush.bf16.msrb.mxu3 %v5859_v49  ;;  %v5996_v45 = vld [vmem:[#allocation5 + $0x710] sm:$0xf0] }
 0x123   : > { %2426 = vmatmul.bf16.vlgmr.msra.gmra.mxu3 %v8476_v9 }
 0x124   : > { %2432 = vmatpush.bf16.msrb.mxu0 %v5807_v55  ;;  %v2206_v48 = vpop.f32.mrf.mxu2  ;;  %v2182_v53 = vpop.f32.mrf.mxu0  ;;  %v5999_v55 = vor.u32 %v7623_v43, %v5996_v45  ;;  %v6247_v43 = vor.u32 %v7684_v33, %v6244_v35  ;;  %v7576_v45 = vld [vmem:[#allocation5 + $0x56c] sm:$0xf] }
 0x125   : > { %2445 = vmatpush.bf16.msrb.mxu1 %v6191_v56  ;;  %v2207_v52 = vadd.f32 %v2206_v48, %v2194_v37  ;;  %v5235_v56 = vor.u32 %v7438_v47, %v5234_v46  ;;  %v5812_v46 = vld [vmem:[#allocation5 + $0x598] sm:$0xf0]  ;;  %v7672_v47 = vld [vmem:[#allocation5 + $0x86c] sm:$0xf]  ;;  %v7666_v53 = vld [vmem:[#allocation5 + $0x834] sm:$0xf0] }
 0x126   : > { %2458 = vmatpush.bf16.msrb.mxu2 %v5427_v57  ;;  %2471 = vmatpush.bf16.msrb.mxu3 %v5811_v61  ;;  %v2219_v49 = vpop.f32.mrf.mxu3  ;;  %v7515_v57 = vld [vmem:[#allocation5 + $0x384] sm:$0xf]  ;;  %v2195_v61 = vpop.f32.mrf.mxu1  ;;  %v6196_v48 = vld [vmem:[#allocation5 + $0x898] sm:$0xf0]  ;;  %v5815_v51 = vor.u32 %v7576_v45, %v5812_v46  ;;  %v7624_v46 = vld [vmem:[#allocation5 + $0x6ec] sm:$0xf] }
 0x127   : > { %v8527_v60 = vadd.f32 %v2219_v49, %v2207_v52  ;;  %v6146_v52 = vld [vmem:[#allocation5 + $0x808] sm:$0xf]  ;;  %v6148_v61 = vld [vmem:[#allocation5 + $0x838] sm:$0xf0] }
 0x128   : > { %2433 = vmatpush.bf16.msrb.mxu0 %v5759_v3  ;;  %v7522_v3 = vld [vmem:[#allocation5 + $0x3b4] sm:$0xf0] }
 0x129   : > { %2446 = vmatpush.bf16.msrb.mxu1 %v6143_v5  ;;  %v5567_v5 = vor.u32 %v7515_v57, %v5564_v58  ;;  %v5571_v15 = vor.u32 %v7522_v3, %v5570_v2  ;;  %v7564_v57 = vld [vmem:[#allocation5 + $0x50c] sm:$0xf]  ;;  %v5764_v58 = vld [vmem:[#allocation5 + $0x538] sm:$0xf0]  ;;  %v7654_v2 = vld [vmem:[#allocation5 + $0x7d4] sm:$0xf0] }
 0x12a   : > { %2459 = vmatpush.bf16.msrb.mxu2 %v5379_v6  ;;  %2472 = vmatpush.bf16.msrb.mxu3 %v5763_v12  ;;  %v7503_v6 = vld [vmem:[#allocation5 + $0x324] sm:$0xf]  ;;  %v5767_v1 = vor.u32 %v7564_v57, %v5764_v58  ;;  %v7456_v3 = vld [vmem:[#allocation5 + $0x1ac] sm:$0xf]  ;;  %v6099_v14 = vor.u32 %v7654_v2, %v6098_v63  ;;  %v5188_v57 = vld [vmem:[#allocation5 + $0xb8] sm:$0xf0] }
 0x12b   : > { %v7599_v12 = vld [vmem:[#allocation5 + $0x624] sm:$0xf]  ;;  %v5519_v28 = vor.u32 %v7503_v6, %v5516_v7  ;;  %v6151_v6 = vor.u32 %v7660_v59, %v6148_v61  ;;  %v5332_v7 = vld [vmem:[#allocation5 + $0x1d8] sm:$0xf0]  ;;  %v7516_v58 = vld [vmem:[#allocation5 + $0x38c] sm:$0xf] }
 0x12c   : > { %2434 = vmatpush.bf16.msrb.mxu0 %v5711_v23  ;;  %v2208_v22 = vpop.f32.mrf.mxu2  ;;  %v5903_v31 = vor.u32 %v7599_v12, %v5900_v13  ;;  %v7648_v12 = vld [vmem:[#allocation5 + $0x7ac] sm:$0xf]  ;;  %v6100_v13 = vld [vmem:[#allocation5 + $0x7d8] sm:$0xf0]  ;;  %v5335_v16 = vor.u32 %v7456_v3, %v5332_v7 }
 0x12d   : > { %2447 = vmatpush.bf16.msrb.mxu1 %v6095_v25  ;;  %v6242_v25 = vld [vmem:[#allocation5 + $0x8c8] sm:$0xf]  ;;  %v7642_v22 = vld [vmem:[#allocation5 + $0x774] sm:$0xf0]  ;;  %v5572_v59 = vld [vmem:[#allocation5 + $0x3b8] sm:$0xf0] }
 0x12e   : > { %2460 = vmatpush.bf16.msrb.mxu2 %v5331_v26  ;;  %2473 = vmatpush.bf16.msrb.mxu3 %v5715_v30  ;;  %v2221_v23 = vpop.f32.mrf.mxu3  ;;  %v7690_v26 = vld [vmem:[#allocation5 + $0x8f4] sm:$0xf0]  ;;  %v5860_v30 = vld [vmem:[#allocation5 + $0x5f8] sm:$0xf0]  ;;  %v7612_v61 = vld [vmem:[#allocation5 + $0x68c] sm:$0xf]  ;;  %v5575_v3 = vor.u32 %v7516_v58, %v5572_v59 }
 0x12f   : > { %v6243_v37 = vor.u32 %v7690_v26, %v6242_v25  ;;  %v7444_v23 = vld [vmem:[#allocation5 + $0x14c] sm:$0xf] }
 0x130   : > { %2435 = vmatpush.bf16.msrb.mxu0 %v5663_v38  ;;  %v5479_v38 = vor.u32 %v7492_v27, %v5476_v29  ;;  %v5284_v27 = vld [vmem:[#allocation5 + $0x178] sm:$0xf0]  ;;  %v7504_v7 = vld [vmem:[#allocation5 + $0x32c] sm:$0xf] }
 0x131   : > { %2448 = vmatpush.bf16.msrb.mxu1 %v6047_v4  ;;  %v5863_v4 = vor.u32 %v7588_v19, %v5860_v30  ;;  %v5668_v29 = vld [vmem:[#allocation5 + $0x478] sm:$0xf0]  ;;  %v7636_v19 = vld [vmem:[#allocation5 + $0x74c] sm:$0xf]  ;;  %v5287_v33 = vor.u32 %v7444_v23, %v5284_v27  ;;  %v7737_v23 = vld [vmem:[#allocation8 + $0x170] sm:$0xf0] }
 0x132   : > { %2461 = vmatpush.bf16.msrb.mxu2 %v5283_v39  ;;  %2474 = vmatpush.bf16.msrb.mxu3 %v5667_v44  ;;  %v6194_v39 = vld [vmem:[#allocation5 + $0x868] sm:$0xf]  ;;  %v5428_v44 = vld [vmem:[#allocation5 + $0x298] sm:$0xf0] }
 0x133   : > { %v6195_v49 = vor.u32 %v7678_v40, %v6194_v39  ;;  %v5431_v50 = vor.u32 %v7480_v42, %v5428_v44  ;;  %v6052_v30 = vld [vmem:[#allocation5 + $0x778] sm:$0xf0]  ;;  %v7528_v42 = vld [vmem:[#allocation5 + $0x3ec] sm:$0xf] }
 0x134   : > { %2436 = vmatpush.bf16.msrb.mxu0 %v5615_v54  ;;  %v7468_v54 = vld [vmem:[#allocation5 + $0x20c] sm:$0xf]  ;;  %v6055_v39 = vor.u32 %v7636_v19, %v6052_v30  ;;  %v5236_v40 = vld [vmem:[#allocation5 + $0x118] sm:$0xf0] }
 0x135   : > { %2449 = vmatpush.bf16.msrb.mxu1 %v5999_v55  ;;  %v6199_v55 = vor.u32 %v7672_v47, %v6196_v48  ;;  %v6004_v47 = vld [vmem:[#allocation5 + $0x718] sm:$0xf0] }
 0x136   : > { %2462 = vmatpush.bf16.msrb.mxu2 %v5235_v56  ;;  %2475 = vmatpush.bf16.msrb.mxu3 %v5619_v62  ;;  %v5380_v56 = vld [vmem:[#allocation5 + $0x238] sm:$0xf0]  ;;  %v6147_v62 = vor.u32 %v7666_v53, %v6146_v52  ;;  %v5954_v52 = vld [vmem:[#allocation5 + $0x688] sm:$0xf]  ;;  %v7618_v53 = vld [vmem:[#allocation5 + $0x6b4] sm:$0xf0] }
 0x137   : > { %v5383_v0 = vor.u32 %v7468_v54, %v5380_v56  ;;  %v7420_v54 = vld [vmem:[#allocation5 + $0x8c] sm:$0xf]  ;;  %v6007_v56 = vor.u32 %v7624_v46, %v6004_v47  ;;  %v5955_v63 = vor.u32 %v7618_v53, %v5954_v52  ;;  %v7731_v52 = vld [vmem:[#allocation8 + $0x140] sm:$0xf0]  ;;  %v6502_v53 = vld [vmem:[#allocation8 + $0x1f8] sm:$0xf] }
 0x138   : > { %2437 = vmatpush.bf16.msrb.mxu0 %v5567_v5  ;;  %v607_v5 = vperm.slane %v8501_v34, 4  ;;  %v6103_v34 = vor.u32 %v7648_v12, %v6100_v13  ;;  %v5191_v2 = vor.u32 %v7420_v54, %v5188_v57  ;;  %v5524_v12 = vld [vmem:[#allocation5 + $0x358] sm:$0xf0]  ;;  %v7600_v13 = vld [vmem:[#allocation5 + $0x62c] sm:$0xf] }
 0x139   : > { %2450 = vmatpush.bf16.msrb.mxu1 %v5951_v10  ;;  %v7552_v10 = vld [vmem:[#allocation5 + $0x4ac] sm:$0xf]  ;;  %v5527_v27 = vor.u32 %v7504_v7, %v5524_v12  ;;  %v7755_v54 = vld [vmem:[#allocation8 + $0x200] sm:$0xf0]  ;;  %v7701_v12 = vld [vmem:[#allocation8 + $0x50] sm:$0xf0] }
 0x13a   : > { %2463 = vmatpush.bf16.msrb.mxu2 %v5187_v11  ;;  %2476 = vmatpush.bf16.msrb.mxu3 %v5571_v15  ;;  %v5716_v11 = vld [vmem:[#allocation5 + $0x4d8] sm:$0xf0]  ;;  %v6503_v59 = vor.u32 %v7755_v54, %v6502_v53  ;;  %v6250_v54 = vld [vmem:[#allocation8] sm:$0xf] }
 0x13b   : > { %v5719_v20 = vor.u32 %v7552_v10, %v5716_v11 }
 0x13c   : > { %2438 = vmatpush.bf16.msrb.mxu0 %v5519_v28  ;;  %v2232_v15 = vpop.f32.mrf.mxu0  ;;  %v7540_v28 = vld [vmem:[#allocation5 + $0x44c] sm:$0xf] }
 0x13d   : > { %2451 = vmatpush.bf16.msrb.mxu1 %v5903_v31  ;;  %v2233_v25 = vadd.f32 %v2232_v15, %v607_v5  ;;  %v2245_v26 = vpop.f32.mrf.mxu1  ;;  %v5671_v35 = vor.u32 %v7540_v28, %v5668_v29  ;;  %v7408_v5 = vld [vmem:[#allocation5 + $0x2c] sm:$0xf]  ;;  %v6622_v28 = vld [vmem:[#allocation8 + $0x2e8] sm:$0xf]  ;;  %v7785_v29 = vld [vmem:[#allocation8 + $0x2f0] sm:$0xf0] }
 0x13e   : > { %2464 = vmatpush.bf16.msrb.mxu2 %v5139_v32  ;;  %2477 = vmatpush.bf16.msrb.mxu3 %v5523_v36  ;;  %v6051_v32 = vor.u32 %v7642_v22, %v6050_v21  ;;  %v6002_v36 = vld [vmem:[#allocation5 + $0x6e8] sm:$0xf]  ;;  %v6430_v21 = vld [vmem:[#allocation8 + $0x168] sm:$0xf] }
 0x13f   : > { %2439 = vmatmul.bf16.vlgmr.msrb.gmra.mxu0 %v8482_v18  ;;  %v2246_v31 = vadd.f32 %v2245_v26, %v2233_v25  ;;  %v6526_v25 = vld [vmem:[#allocation8 + $0x228] sm:$0xf]  ;;  %v7761_v26 = vld [vmem:[#allocation8 + $0x230] sm:$0xf0] }
 0x140   : > { %2483 = vmatpush.bf16.msra.mxu0 %v6243_v37  ;;  %2452 = vmatmul.bf16.vlgmr.msrb.gmra.mxu1 %v8474_v8  ;;  %v7630_v37 = vld [vmem:[#allocation5 + $0x714] sm:$0xf0] }
 0x141   : > { %2496 = vmatpush.bf16.msra.mxu1 %v5479_v38  ;;  %2465 = vmatmul.bf16.vlgmr.msrb.gmra.mxu2 %v8476_v9  ;;  %v7432_v38 = vld [vmem:[#allocation5 + $0xec] sm:$0xf]  ;;  %v6003_v48 = vor.u32 %v7630_v37, %v6002_v36  ;;  %v6418_v36 = vld [vmem:[#allocation8 + $0x150] sm:$0xf]  ;;  %v6623_v37 = vor.u32 %v7785_v29, %v6622_v28 }
 0x142   : > { %2509 = vmatpush.bf16.msra.mxu2 %v5863_v4  ;;  %2522 = vmatpush.bf16.msra.mxu3 %v6247_v43  ;;  %v5620_v43 = vld [vmem:[#allocation5 + $0x418] sm:$0xf0] }
 0x143   : > { %2478 = vmatmul.bf16.vlgmr.msrb.gmra.mxu3 %v8482_v18  ;;  %v6370_v28 = vld [vmem:[#allocation8 + $0xf0] sm:$0xf] }
 0x144   : > { %2484 = vmatpush.bf16.msra.mxu0 %v6195_v49  ;;  %v2258_v4 = vpop.f32.mrf.mxu2  ;;  %v2234_v49 = vpop.f32.mrf.mxu0 }
 0x145   : > { %2497 = vmatpush.bf16.msra.mxu1 %v5431_v50  ;;  %v8534_v44 = vadd.f32 %v2258_v4, %v2246_v31  ;;  %v5239_v50 = vor.u32 %v7432_v38, %v5236_v40  ;;  %v6431_v31 = vor.u32 %v7737_v23, %v6430_v21  ;;  %v7734_v38 = vld [vmem:[#allocation8 + $0x158] sm:$0xf0]  ;;  %v6514_v4 = vld [vmem:[#allocation8 + $0x210] sm:$0xf]  ;;  %v7707_v49 = vld [vmem:[#allocation8 + $0x80] sm:$0xf0] }
 0x146   : > { %2510 = vmatpush.bf16.msra.mxu2 %v5815_v51  ;;  %2523 = vmatpush.bf16.msra.mxu3 %v6199_v55  ;;  %v8536_v45 = vpop.f32.mrf.mxu3  ;;  %v5623_v51 = vor.u32 %v7528_v42, %v5620_v43  ;;  %v2247_v55 = vpop.f32.mrf.mxu1  ;;  %v6610_v40 = vld [vmem:[#allocation8 + $0x2d0] sm:$0xf]  ;;  %v7782_v42 = vld [vmem:[#allocation8 + $0x2d8] sm:$0xf0]  ;;  %v6419_v46 = vor.u32 %v7734_v38, %v6418_v36  ;;  %v6574_v21 = vld [vmem:[#allocation8 + $0x288] sm:$0xf] }
 0x147   : > { %v6598_v55 = vld [vmem:[#allocation8 + $0x2b8] sm:$0xf] }
 0x148   : > { %2485 = vmatpush.bf16.msra.mxu0 %v6147_v62  ;;  %v5956_v62 = vld [vmem:[#allocation5 + $0x6b8] sm:$0xf0] }
 0x149   : > { %2498 = vmatpush.bf16.msra.mxu1 %v5383_v0  ;;  %v5906_v0 = vld [vmem:[#allocation5 + $0x628] sm:$0xf]  ;;  %v5959_v11 = vor.u32 %v7612_v61, %v5956_v62  ;;  %v6298_v61 = vld [vmem:[#allocation8 + $0x60] sm:$0xf]  ;;  %v7704_v62 = vld [vmem:[#allocation8 + $0x68] sm:$0xf0] }
 0x14a   : > { %2511 = vmatpush.bf16.msra.mxu2 %v5767_v1  ;;  %2524 = vmatpush.bf16.msra.mxu3 %v6151_v6  ;;  %v7606_v1 = vld [vmem:[#allocation5 + $0x654] sm:$0xf0]  ;;  %v5140_v6 = vld [vmem:[#allocation5 + $0x58] sm:$0xf0] }
 0x14b   : > { %v5907_v22 = vor.u32 %v7606_v1, %v5906_v0  ;;  %v7728_v1 = vld [vmem:[#allocation8 + $0x128] sm:$0xf0] }
 0x14c   : > { %2486 = vmatpush.bf16.msra.mxu0 %v6099_v14  ;;  %v2260_v10 = vpop.f32.mrf.mxu2  ;;  %v5908_v14 = vld [vmem:[#allocation5 + $0x658] sm:$0xf0] }
 0x14d   : > { %2499 = vmatpush.bf16.msra.mxu1 %v5335_v16  ;;  %v6334_v16 = vld [vmem:[#allocation8 + $0xa8] sm:$0xf]  ;;  %v5911_v19 = vor.u32 %v7600_v13, %v5908_v14 }
 0x14e   : > { %2512 = vmatpush.bf16.msra.mxu2 %v5719_v20  ;;  %2525 = vmatpush.bf16.msra.mxu3 %v6103_v34  ;;  %v2273_v15 = vpop.f32.mrf.mxu3  ;;  %v7713_v20 = vld [vmem:[#allocation8 + $0xb0] sm:$0xf0]  ;;  %v5143_v34 = vor.u32 %v7408_v5, %v5140_v6  ;;  %v6382_v13 = vld [vmem:[#allocation8 + $0x108] sm:$0xf] }
 0x14f   : > { %v6335_v30 = vor.u32 %v7713_v20, %v6334_v16  ;;  %v7725_v15 = vld [vmem:[#allocation8 + $0x110] sm:$0xf0]  ;;  %v6478_v16 = vld [vmem:[#allocation8 + $0x1c8] sm:$0xf] }
 0x150   : > { %2487 = vmatpush.bf16.msra.mxu0 %v6051_v32  ;;  %v6527_v32 = vor.u32 %v7761_v26, %v6526_v25  ;;  %v7749_v20 = vld [vmem:[#allocation8 + $0x1d0] sm:$0xf0]  ;;  %v6383_v25 = vor.u32 %v7725_v15, %v6382_v13  ;;  %v2535_v13 = vmax.f32 %v8504_v17, 0.0  ;;  %v6802_v17 = vld [vmem:[#allocation8 + $0x450] sm:$0xf] }
 0x151   : > { %2500 = vmatpush.bf16.msra.mxu1 %v5287_v33  ;;  %v6322_v33 = vld [vmem:[#allocation8 + $0x90] sm:$0xf]  ;;  %v6479_v26 = vor.u32 %v7749_v20, %v6478_v16  ;;  %v2537_v20 = vmax.f32 %v8525_v24, 0.0 }
 0x152   : > { %2513 = vmatpush.bf16.msra.mxu2 %v5671_v35  ;;  %2526 = vmatpush.bf16.msra.mxu3 %v6055_v39  ;;  %v7710_v35 = vld [vmem:[#allocation8 + $0x98] sm:$0xf0] }
 0x153   : > { %v7758_v39 = vld [vmem:[#allocation8 + $0x218] sm:$0xf0]  ;;  %v6323_v43 = vor.u32 %v7710_v35, %v6322_v33  ;;  %v6562_v33 = vld [vmem:[#allocation8 + $0x270] sm:$0xf]  ;;  %v8558_v24 = vpack.c.bf16 %v2537_v20, %v2537_v20 }
 0x154   : > { %2488 = vmatpush.bf16.msra.mxu0 %v6003_v48  ;;  %v6515_v47 = vor.u32 %v7758_v39, %v6514_v4  ;;  %v6310_v48 = vld [vmem:[#allocation8 + $0x78] sm:$0xf]  ;;  %v7770_v35 = vld [vmem:[#allocation8 + $0x278] sm:$0xf0] }
 0x155   : > { %2501 = vmatpush.bf16.msra.mxu1 %v5239_v50  ;;  %v6406_v50 = vld [vmem:[#allocation8 + $0x138] sm:$0xf]  ;;  %v6311_v57 = vor.u32 %v7707_v49, %v6310_v48  ;;  %v7719_v48 = vld [vmem:[#allocation8 + $0xe0] sm:$0xf0] }
 0x156   : > { %2514 = vmatpush.bf16.msra.mxu2 %v5623_v51  ;;  %2527 = vmatpush.bf16.msra.mxu3 %v6007_v56  ;;  %v6611_v51 = vor.u32 %v7782_v42, %v6610_v40  ;;  %v7779_v56 = vld [vmem:[#allocation8 + $0x2c0] sm:$0xf0]  ;;  %v6407_v58 = vor.u32 %v7731_v52, %v6406_v50  ;;  %v6262_v42 = vld [vmem:[#allocation8 + $0x18] sm:$0xf] }
 0x157   : > { %v6599_v0 = vor.u32 %v7779_v56, %v6598_v55  ;;  %v6454_v49 = vld [vmem:[#allocation8 + $0x198] sm:$0xf]  ;;  %v7743_v50 = vld [vmem:[#allocation8 + $0x1a0] sm:$0xf0]  ;;  %v7692_v55 = vld [vmem:[#allocation8 + $0x8] sm:$0xf0] }
 0x158   : > { %2489 = vmatpush.bf16.msra.mxu0 %v5955_v63  ;;  %v6394_v63 = vld [vmem:[#allocation8 + $0x120] sm:$0xf]  ;;  %v7767_v52 = vld [vmem:[#allocation8 + $0x260] sm:$0xf0] }
 0x159   : > { %2502 = vmatpush.bf16.msra.mxu1 %v5191_v2  ;;  %v6490_v2 = vld [vmem:[#allocation8 + $0x1e0] sm:$0xf]  ;;  %v6395_v7 = vor.u32 %v7728_v1, %v6394_v63  ;;  %v7740_v63 = vld [vmem:[#allocation8 + $0x188] sm:$0xf0] }
 0x15a   : > { %2515 = vmatpush.bf16.msra.mxu2 %v5575_v3  ;;  %2528 = vmatpush.bf16.msra.mxu3 %v5959_v11  ;;  %v6586_v3 = vld [vmem:[#allocation8 + $0x2a0] sm:$0xf]  ;;  %v6286_v11 = vld [vmem:[#allocation8 + $0x48] sm:$0xf]  ;;  %v7764_v1 = vld [vmem:[#allocation8 + $0x248] sm:$0xf0] }
 0x15b   : > { %v6287_v23 = vor.u32 %v7701_v12, %v6286_v11  ;;  %v6910_v11 = vld [vmem:[#allocation8 + $0x528] sm:$0xf]  ;;  %v7857_v12 = vld [vmem:[#allocation8 + $0x530] sm:$0xf0] }
 0x15c   : > { %2490 = vmatpush.bf16.msra.mxu0 %v5907_v22  ;;  %v8542_v5 = vpop.f32.mrf.mxu0  ;;  %v7773_v22 = vld [vmem:[#allocation8 + $0x290] sm:$0xf0] }
 0x15d   : > { %2503 = vmatpush.bf16.msra.mxu1 %v5143_v34  ;;  %v8544_v6 = vpop.f32.mrf.mxu1  ;;  %v6274_v34 = vld [vmem:[#allocation8 + $0x30] sm:$0xf]  ;;  %v6575_v29 = vor.u32 %v7773_v22, %v6574_v21  ;;  %v2538_v21 = vmax.f32 %v8527_v60, 0.0 }
 0x15e   : > { %2516 = vmatpush.bf16.msra.mxu2 %v5527_v27  ;;  %2529 = vmatpush.bf16.msra.mxu3 %v5911_v19  ;;  %v7698_v27 = vld [vmem:[#allocation8 + $0x38] sm:$0xf0] }
 0x15f   : > { %2491 = vmatmul.bf16.vlgmr.msra.gmra.mxu0 %v8474_v8  ;;  %v7722_v19 = vld [vmem:[#allocation8 + $0xf8] sm:$0xf0]  ;;  %v6275_v38 = vor.u32 %v7698_v27, %v6274_v34  ;;  %v6911_v27 = vor.u32 %v7857_v12, %v6910_v11  ;;  %v7797_v11 = vld [vmem:[#allocation8 + $0x350] sm:$0xf0]  ;;  %v6766_v12 = vld [vmem:[#allocation8 + $0x408] sm:$0xf] }
 0x160   : > { %4487 = vmatpush.bf16.msrb.mxu0 %v6335_v30  ;;  %2504 = vmatmul.bf16.vlgmr.msra.gmra.mxu1 %v8476_v9  ;;  %v7752_v9 = vld [vmem:[#allocation8 + $0x1e8] sm:$0xf0]  ;;  %v6466_v30 = vld [vmem:[#allocation8 + $0x1b0] sm:$0xf]  ;;  %v6371_v39 = vor.u32 %v7722_v19, %v6370_v28 }
 0x161   : > { %4500 = vmatpush.bf16.msrb.mxu1 %v6431_v31  ;;  %2517 = vmatmul.bf16.vlgmr.msra.gmra.mxu2 %v8482_v18  ;;  %v7776_v18 = vld [vmem:[#allocation8 + $0x2a8] sm:$0xf0]  ;;  %v6491_v10 = vor.u32 %v7752_v9, %v6490_v2  ;;  %v7746_v31 = vld [vmem:[#allocation8 + $0x1b8] sm:$0xf0]  ;;  %v6718_v9 = vld [vmem:[#allocation8 + $0x3a8] sm:$0xf] }
 0x162   : > { %4513 = vmatpush.bf16.msrb.mxu2 %v6527_v32  ;;  %4526 = vmatpush.bf16.msrb.mxu3 %v6623_v37  ;;  %v6587_v14 = vor.u32 %v7776_v18, %v6586_v3  ;;  %v6467_v40 = vor.u32 %v7746_v31, %v6466_v30  ;;  %v7809_v3 = vld [vmem:[#allocation8 + $0x3b0] sm:$0xf0]  ;;  %v6814_v18 = vld [vmem:[#allocation8 + $0x468] sm:$0xf]  ;;  %v6706_v28 = vld [vmem:[#allocation8 + $0x390] sm:$0xf]  ;;  %v8554_v31 = vpack.c.bf16 %v2535_v13, %v2535_v13 }
 0x163   : > { %2530 = vmatmul.bf16.vlgmr.msra.gmra.mxu3 %v8474_v8  ;;  %v6299_v8 = vor.u32 %v7704_v62, %v6298_v61  ;;  %v6442_v61 = vld [vmem:[#allocation8 + $0x180] sm:$0xf]  ;;  %v6898_v19 = vld [vmem:[#allocation8 + $0x510] sm:$0xf]  ;;  %v7854_v30 = vld [vmem:[#allocation8 + $0x518] sm:$0xf0] }
 0x164   : > { %4488 = vmatpush.bf16.msrb.mxu0 %v6323_v43  ;;  %v8546_v32 = vpop.f32.mrf.mxu2  ;;  %v2286_v37 = vpop.f32.mrf.mxu0  ;;  %v7695_v43 = vld [vmem:[#allocation8 + $0x20] sm:$0xf0]  ;;  %v6443_v16 = vor.u32 %v7740_v63, %v6442_v61  ;;  %v6874_v61 = vld [vmem:[#allocation8 + $0x4e0] sm:$0xf]  ;;  %v8074_v63 = vld [vmem:[#allocation7] sm:$0xff] }
 0x165   : > { %4501 = vmatpush.bf16.msrb.mxu1 %v6419_v46  ;;  %v2299_v4 = vpop.f32.mrf.mxu1  ;;  %v6358_v46 = vld [vmem:[#allocation8 + $0xd8] sm:$0xf]  ;;  %v6263_v53 = vor.u32 %v7695_v43, %v6262_v42  ;;  %v6994_v37 = vld [vmem:[#allocation8 + $0x5d0] sm:$0xf]  ;;  %v7803_v43 = vld [vmem:[#allocation8 + $0x380] sm:$0xf0] }
 0x166   : > { %4514 = vmatpush.bf16.msrb.mxu2 %v6515_v47  ;;  %4527 = vmatpush.bf16.msrb.mxu3 %v6611_v51  ;;  %v8548_v36 = vpop.f32.mrf.mxu3  ;;  %v6563_v47 = vor.u32 %v7770_v35, %v6562_v33  ;;  %v6550_v51 = vld [vmem:[#allocation8 + $0x258] sm:$0xf]  ;;  %v6359_v56 = vor.u32 %v7719_v48, %v6358_v46  ;;  %v8560_v4 = vpack.c.bf16 %v2538_v21, %v2538_v21  ;;  %v609_v20 = vperm.slane %v8074_v63, 6 }
 0x167   : > { %v6551_v62 = vor.u32 %v7767_v52, %v6550_v51  ;;  %v6694_v42 = vld [vmem:[#allocation8 + $0x378] sm:$0xf]  ;;  %v610_v21 = vperm.slane %v8074_v63, 7 }
 0x168   : > { %4489 = vmatpush.bf16.msrb.mxu0 %v6311_v57  ;;  %v6455_v57 = vor.u32 %v7743_v50, %v6454_v49  ;;  %v6790_v46 = vld [vmem:[#allocation8 + $0x438] sm:$0xf]  ;;  %v7851_v49 = vld [vmem:[#allocation8 + $0x500] sm:$0xf0]  ;;  %v6695_v51 = vor.u32 %v7803_v43, %v6694_v42  ;;  %v6946_v43 = vld [vmem:[#allocation8 + $0x570] sm:$0xf] }
 0x169   : > { %4502 = vmatpush.bf16.msrb.mxu1 %v6407_v58  ;;  %v6346_v58 = vld [vmem:[#allocation8 + $0xc0] sm:$0xf]  ;;  %v6886_v48 = vld [vmem:[#allocation8 + $0x4f8] sm:$0xf] }
 0x16a   : > { %4515 = vmatpush.bf16.msrb.mxu2 %v6503_v59  ;;  %4528 = vmatpush.bf16.msrb.mxu3 %v6599_v0  ;;  %v7716_v59 = vld [vmem:[#allocation8 + $0xc8] sm:$0xf0]  ;;  %v6538_v0 = vld [vmem:[#allocation8 + $0x240] sm:$0xf]  ;;  %v6982_v52 = vld [vmem:[#allocation8 + $0x5b8] sm:$0xf] }
 0x16b   : > { %v6347_v15 = vor.u32 %v7716_v59, %v6346_v58  ;;  %v6539_v22 = vor.u32 %v7764_v1, %v6538_v0  ;;  %v6778_v58 = vld [vmem:[#allocation8 + $0x420] sm:$0xf]  ;;  %v7824_v59 = vld [vmem:[#allocation8 + $0x428] sm:$0xf0]  ;;  %v608_v0 = vperm.slane %v8074_v63, 5 }
 0x16c   : > { %4490 = vmatpush.bf16.msrb.mxu0 %v6299_v8  ;;  %v2312_v2 = vpop.f32.mrf.mxu2  ;;  %v6634_v63 = vld [vmem:[#allocation8 + $0x300] sm:$0xf] }
 0x16d   : > { %4503 = vmatpush.bf16.msrb.mxu1 %v6395_v7  ;;  %v6251_v7 = vor.u32 %v7692_v55, %v6250_v54  ;;  %v6887_v55 = vor.u32 %v7851_v49, %v6886_v48 }
 0x16e   : > { %4516 = vmatpush.bf16.msrb.mxu2 %v6491_v10  ;;  %4529 = vmatpush.bf16.msrb.mxu3 %v6587_v14  ;;  %v2325_v8 = vpop.f32.mrf.mxu3  ;;  %v7833_v10 = vld [vmem:[#allocation8 + $0x470] sm:$0xf0]  ;;  %v2536_v14 = vmax.f32 %v8514_v41, 0.0  ;;  %v7830_v41 = vld [vmem:[#allocation8 + $0x458] sm:$0xf0] }
 0x16f   : > { %v6815_v34 = vor.u32 %v7833_v10, %v6814_v18  ;;  %v6779_v8 = vor.u32 %v7824_v59, %v6778_v58  ;;  %v6670_v10 = vld [vmem:[#allocation8 + $0x348] sm:$0xf] }
 0x170   : > { %4491 = vmatpush.bf16.msrb.mxu0 %v6287_v23  ;;  %v6719_v23 = vor.u32 %v7809_v3, %v6718_v9  ;;  %v8556_v33 = vpack.c.bf16 %v2536_v14, %v2536_v14  ;;  %v6970_v9 = vld [vmem:[#allocation8 + $0x5a0] sm:$0xf]  ;;  %v7872_v3 = vld [vmem:[#allocation8 + $0x5a8] sm:$0xf0]  ;;  %v7821_v14 = vld [vmem:[#allocation8 + $0x410] sm:$0xf0] }
 0x171   : > { %4504 = vmatpush.bf16.msrb.mxu1 %v6383_v25  ;;  %v7006_v25 = vld [vmem:[#allocation8 + $0x5e8] sm:$0xf] }
 0x172   : > { %4517 = vmatpush.bf16.msrb.mxu2 %v6479_v26  ;;  %4530 = vmatpush.bf16.msrb.mxu3 %v6575_v29  ;;  %v7881_v26 = vld [vmem:[#allocation8 + $0x5f0] sm:$0xf0]  ;;  %v7806_v29 = vld [vmem:[#allocation8 + $0x398] sm:$0xf0] }
 0x173   : > { %v7007_v60 = vor.u32 %v7881_v26, %v7006_v25  ;;  %v6707_v35 = vor.u32 %v7806_v29, %v6706_v28  ;;  %v6671_v25 = vor.u32 %v7797_v11, %v6670_v10  ;;  %v6958_v26 = vld [vmem:[#allocation8 + $0x588] sm:$0xf]  ;;  %v6658_v29 = vld [vmem:[#allocation8 + $0x330] sm:$0xf] }
 0x174   : > { %4492 = vmatpush.bf16.msrb.mxu0 %v6275_v38  ;;  %v7878_v38 = vld [vmem:[#allocation8 + $0x5d8] sm:$0xf0]  ;;  %v7102_v10 = vld [vmem:[#allocation8 + $0x6a8] sm:$0xf] }
 0x175   : > { %4505 = vmatpush.bf16.msrb.mxu1 %v6371_v39  ;;  %v6803_v39 = vor.u32 %v7830_v41, %v6802_v17  ;;  %v6995_v50 = vor.u32 %v7878_v38, %v6994_v37  ;;  %v7794_v17 = vld [vmem:[#allocation8 + $0x338] sm:$0xf0]  ;;  %v6754_v41 = vld [vmem:[#allocation8 + $0x3f0] sm:$0xf] }
 0x176   : > { %4518 = vmatpush.bf16.msrb.mxu2 %v6467_v40  ;;  %4531 = vmatpush.bf16.msrb.mxu3 %v6563_v47  ;;  %v6899_v40 = vor.u32 %v7854_v30, %v6898_v19  ;;  %v7827_v47 = vld [vmem:[#allocation8 + $0x440] sm:$0xf0]  ;;  %v7818_v30 = vld [vmem:[#allocation8 + $0x3f8] sm:$0xf0]  ;;  %v6659_v42 = vor.u32 %v7794_v17, %v6658_v29 }
 0x177   : > { %v6791_v54 = vor.u32 %v7827_v47, %v6790_v46  ;;  %v7866_v46 = vld [vmem:[#allocation8 + $0x578] sm:$0xf0]  ;;  %v6755_v48 = vor.u32 %v7818_v30, %v6754_v41  ;;  %v7977_v30 = vld [vmem:[#allocation8 + $0x8f0] sm:$0xf0] }
 0x178   : > { %4493 = vmatpush.bf16.msrb.mxu0 %v6263_v53  ;;  %v7875_v53 = vld [vmem:[#allocation8 + $0x5c0] sm:$0xf0]  ;;  %v6947_v58 = vor.u32 %v7866_v46, %v6946_v43  ;;  %v7902_v41 = vld [vmem:[#allocation8 + $0x698] sm:$0xf0] }
 0x179   : > { %4506 = vmatpush.bf16.msrb.mxu1 %v6359_v56  ;;  %v6682_v56 = vld [vmem:[#allocation8 + $0x360] sm:$0xf]  ;;  %v6983_v1 = vor.u32 %v7875_v53, %v6982_v52  ;;  %v6742_v52 = vld [vmem:[#allocation8 + $0x3d8] sm:$0xf] }
 0x17a   : > { %4519 = vmatpush.bf16.msrb.mxu2 %v6455_v57  ;;  %4532 = vmatpush.bf16.msrb.mxu3 %v6551_v62  ;;  %v7800_v57 = vld [vmem:[#allocation8 + $0x368] sm:$0xf0] }
 0x17b   : > { %v7848_v62 = vld [vmem:[#allocation8 + $0x4e8] sm:$0xf0]  ;;  %v6683_v2 = vor.u32 %v7800_v57, %v6682_v56 }
 0x17c   : > { %4494 = vmatpush.bf16.msrb.mxu0 %v6251_v7  ;;  %v8566_v18 = vpop.f32.mrf.mxu0  ;;  %v6875_v7 = vor.u32 %v7848_v62, %v6874_v61  ;;  %v6934_v61 = vld [vmem:[#allocation8 + $0x558] sm:$0xf]  ;;  %v7863_v62 = vld [vmem:[#allocation8 + $0x560] sm:$0xf0] }
 0x17d   : > { %4507 = vmatpush.bf16.msrb.mxu1 %v6347_v15  ;;  %v2349_v13 = vpop.f32.mrf.mxu1  ;;  %v6862_v15 = vld [vmem:[#allocation8 + $0x4c8] sm:$0xf] }
 0x17e   : > { %4520 = vmatpush.bf16.msrb.mxu2 %v6443_v16  ;;  %4533 = vmatpush.bf16.msrb.mxu3 %v6539_v22  ;;  %v7845_v16 = vld [vmem:[#allocation8 + $0x4d0] sm:$0xf0]  ;;  %v2272_v22 = vadd.f32 %v8536_v45, %v608_v0  ;;  %v2311_v45 = vadd.f32 %v8546_v32, %v609_v20  ;;  %v2350_v38 = vadd.f32 %v2349_v13, %v610_v21  ;;  %v6838_v32 = vld [vmem:[#allocation8 + $0x498] sm:$0xf] }
 0x17f   : > { %4495 = vmatmul.bf16.vlgmr.msrb.gmra.mxu0 %v8554_v31  ;;  %v6863_v28 = vor.u32 %v7845_v16, %v6862_v15  ;;  %v7905_v13 = vld [vmem:[#allocation8 + $0x6b0] sm:$0xf0]  ;;  %v2539_v16 = vmax.f32 %v8534_v44, 0.0  ;;  %v6935_v21 = vor.u32 %v7863_v62, %v6934_v61 }
 0x180   : > { %4539 = vmatpush.bf16.msra.mxu0 %v6719_v23  ;;  %4508 = vmatmul.bf16.vlgmr.msrb.gmra.mxu1 %v8556_v33  ;;  %v6971_v23 = vor.u32 %v7872_v3, %v6970_v9  ;;  %v6730_v9 = vld [vmem:[#allocation8 + $0x3c0] sm:$0xf]  ;;  %v7812_v3 = vld [vmem:[#allocation8 + $0x3c8] sm:$0xf0]  ;;  %v7929_v15 = vld [vmem:[#allocation8 + $0x770] sm:$0xf0]  ;;  %v7103_v29 = vor.u32 %v7905_v13, %v7102_v10 }
 0x181   : > { %4552 = vmatpush.bf16.msra.mxu1 %v6815_v34  ;;  %4521 = vmatmul.bf16.vlgmr.msrb.gmra.mxu2 %v8558_v24  ;;  %v7869_v34 = vld [vmem:[#allocation8 + $0x590] sm:$0xf0]  ;;  %v7054_v13 = vld [vmem:[#allocation8 + $0x648] sm:$0xf] }
 0x182   : > { %4565 = vmatpush.bf16.msra.mxu2 %v6911_v27  ;;  %4534 = vmatmul.bf16.vlgmr.msrb.gmra.mxu3 %v8560_v4  ;;  %v6767_v27 = vor.u32 %v7821_v14, %v6766_v12  ;;  %v7198_v14 = vld [vmem:[#allocation8 + $0x768] sm:$0xf] }
 0x183   : > { %4578 = vmatpush.bf16.msra.mxu3 %v7007_v60  ;;  %v6850_v60 = vld [vmem:[#allocation8 + $0x4b0] sm:$0xf]  ;;  %v7199_v17 = vor.u32 %v7929_v15, %v7198_v14 }
 0x184   : > { %4540 = vmatpush.bf16.msra.mxu0 %v6707_v35  ;;  %v2362_v19 = vpop.f32.mrf.mxu2  ;;  %v7842_v35 = vld [vmem:[#allocation8 + $0x4b8] sm:$0xf0]  ;;  %v2338_v47 = vpop.f32.mrf.mxu0 }
 0x185   : > { %4553 = vmatpush.bf16.msra.mxu1 %v6803_v39  ;;  %v2285_v39 = vadd.f32 %v8542_v5, %v2272_v22  ;;  %v6851_v49 = vor.u32 %v7842_v35, %v6850_v60  ;;  %v2351_v53 = vpop.f32.mrf.mxu1  ;;  %v2324_v5 = vadd.f32 %v8548_v36, %v2311_v45  ;;  %v2363_v56 = vadd.f32 %v2362_v19, %v2350_v38  ;;  %v7836_v36 = vld [vmem:[#allocation8 + $0x488] sm:$0xf0]  ;;  %v7390_v19 = vld [vmem:[#allocation8 + $0x8e8] sm:$0xf]  ;;  %v7186_v35 = vld [vmem:[#allocation8 + $0x750] sm:$0xf] }
 0x186   : > { %4566 = vmatpush.bf16.msra.mxu2 %v6899_v40  ;;  %v2375_v37 = vpop.f32.mrf.mxu3  ;;  %v6959_v40 = vor.u32 %v7869_v34, %v6958_v26  ;;  %v6731_v26 = vor.u32 %v7812_v3, %v6730_v9  ;;  %v7391_v43 = vor.u32 %v7977_v30, %v7390_v19  ;;  %v7162_v9 = vld [vmem:[#allocation8 + $0x720] sm:$0xf]  ;;  %v7920_v3 = vld [vmem:[#allocation8 + $0x728] sm:$0xf0]  ;;  %v7965_v19 = vld [vmem:[#allocation8 + $0x890] sm:$0xf0] }
 0x187   : > { %4579 = vmatpush.bf16.msra.mxu3 %v6995_v50  ;;  %v6646_v50 = vld [vmem:[#allocation8 + $0x318] sm:$0xf]  ;;  %v2298_v57 = vadd.f32 %v8544_v6, %v2285_v39  ;;  %v2337_v6 = vadd.f32 %v8566_v18, %v2324_v5  ;;  %v2376_v12 = vadd.f32 %v2375_v37, %v2363_v56  ;;  %v7090_v18 = vld [vmem:[#allocation8 + $0x690] sm:$0xf]  ;;  %v7926_v37 = vld [vmem:[#allocation8 + $0x758] sm:$0xf0] }
 0x188   : > { %4541 = vmatpush.bf16.msra.mxu0 %v6695_v51  ;;  %v7791_v51 = vld [vmem:[#allocation8 + $0x320] sm:$0xf0]  ;;  %v7282_v39 = vld [vmem:[#allocation8 + $0x810] sm:$0xf]  ;;  %v7091_v47 = vor.u32 %v7902_v41, %v7090_v18  ;;  %v7270_v56 = vld [vmem:[#allocation8 + $0x7f8] sm:$0xf] }
 0x189   : > { %4554 = vmatpush.bf16.msra.mxu1 %v6791_v54  ;;  %v7815_v54 = vld [vmem:[#allocation8 + $0x3e0] sm:$0xf0]  ;;  %v6647_v59 = vor.u32 %v7791_v51, %v6646_v50  ;;  %v2540_v20 = vmax.f32 %v2298_v57, 0.0  ;;  %v2541_v44 = vmax.f32 %v2337_v6, 0.0  ;;  %v2542_v60 = vmax.f32 %v2376_v12, 0.0 }
 0x18a   : > { %4567 = vmatpush.bf16.msra.mxu2 %v6887_v55  ;;  %v7839_v55 = vld [vmem:[#allocation8 + $0x4a0] sm:$0xf0]  ;;  %v6743_v0 = vor.u32 %v7815_v54, %v6742_v52  ;;  %v7378_v50 = vld [vmem:[#allocation8 + $0x8d0] sm:$0xf]  ;;  %v7974_v51 = vld [vmem:[#allocation8 + $0x8d8] sm:$0xf0]  ;;  %v7163_v12 = vor.u32 %v7920_v3, %v7162_v9 }
 0x18b   : > { %4580 = vmatpush.bf16.msra.mxu3 %v6983_v1  ;;  %v6839_v1 = vor.u32 %v7839_v55, %v6838_v32  ;;  %v8577_v46 = vpack.c.bf16 %v2540_v20, %v2540_v20  ;;  %v8579_v52 = vpack.c.bf16 %v2541_v44, %v2541_v44  ;;  %v8581_v53 = vpack.c.bf16 %v2542_v60, %v2542_v60  ;;  %v7899_v54 = vld [vmem:[#allocation8 + $0x680] sm:$0xf0]  ;;  %v7174_v32 = vld [vmem:[#allocation8 + $0x738] sm:$0xf]  ;;  %v7968_v20 = vld [vmem:[#allocation8 + $0x8a8] sm:$0xf0] }
 0x18c   : > { %4542 = vmatpush.bf16.msra.mxu0 %v6683_v2  ;;  %v7788_v2 = vld [vmem:[#allocation8 + $0x308] sm:$0xf0]  ;;  %v7923_v55 = vld [vmem:[#allocation8 + $0x740] sm:$0xf0]  ;;  %v7342_v41 = vld [vmem:[#allocation8 + $0x888] sm:$0xf] }
 0x18d   : > { %4555 = vmatpush.bf16.msra.mxu1 %v6779_v8  ;;  %v2364_v8 = vpop.f32.mrf.mxu2  ;;  %v6635_v22 = vor.u32 %v7788_v2, %v6634_v63  ;;  %v7947_v57 = vld [vmem:[#allocation8 + $0x800] sm:$0xf0]  ;;  %v7175_v62 = vor.u32 %v7923_v55, %v7174_v32  ;;  %v8586_v63 = vld [vmem:[#allocation7 + $0x8] sm:$0xf]  ;;  %v7896_v2 = vld [vmem:[#allocation8 + $0x668] sm:$0xf0] }
 0x18e   : > { %4568 = vmatpush.bf16.msra.mxu2 %v6875_v7  ;;  %v6826_v7 = vld [vmem:[#allocation8 + $0x480] sm:$0xf]  ;;  %v2377_v11 = vpop.f32.mrf.mxu3  ;;  %v7271_v8 = vor.u32 %v7947_v57, %v7270_v56  ;;  %v611_v10 = vperm.slane %v8586_v63, 0  ;;  %v7890_v30 = vld [vmem:[#allocation8 + $0x638] sm:$0xf0] }
 0x18f   : > { %4581 = vmatpush.bf16.msra.mxu3 %v6971_v23  ;;  %v7294_v23 = vld [vmem:[#allocation8 + $0x828] sm:$0xf]  ;;  %v6827_v34 = vor.u32 %v7836_v36, %v6826_v7  ;;  %v7258_v7 = vld [vmem:[#allocation8 + $0x7e0] sm:$0xf]  ;;  %v7944_v36 = vld [vmem:[#allocation8 + $0x7e8] sm:$0xf0] }
 0x190   : > { %4543 = vmatpush.bf16.msra.mxu0 %v6671_v25  ;;  %v7953_v25 = vld [vmem:[#allocation8 + $0x830] sm:$0xf0]  ;;  %v7138_v44 = vld [vmem:[#allocation8 + $0x6f0] sm:$0xf]  ;;  %v7914_v60 = vld [vmem:[#allocation8 + $0x6f8] sm:$0xf0] }
 0x191   : > { %4556 = vmatpush.bf16.msra.mxu1 %v6767_v27  ;;  %v6922_v27 = vld [vmem:[#allocation8 + $0x540] sm:$0xf]  ;;  %v7295_v45 = vor.u32 %v7953_v25, %v7294_v23  ;;  %v7917_v23 = vld [vmem:[#allocation8 + $0x710] sm:$0xf0]  ;;  %v7259_v25 = vor.u32 %v7944_v36, %v7258_v7  ;;  %v7962_v32 = vld [vmem:[#allocation8 + $0x878] sm:$0xf0] }
 0x192   : > { %4569 = vmatpush.bf16.msra.mxu2 %v6863_v28  ;;  %v7860_v28 = vld [vmem:[#allocation8 + $0x548] sm:$0xf0]  ;;  %v7887_v55 = vld [vmem:[#allocation8 + $0x620] sm:$0xf0]  ;;  %v7318_v3 = vld [vmem:[#allocation8 + $0x858] sm:$0xf] }
 0x193   : > { %4582 = vmatpush.bf16.msra.mxu3 %v6959_v40  ;;  %v6923_v38 = vor.u32 %v7860_v28, %v6922_v27  ;;  %v7950_v40 = vld [vmem:[#allocation8 + $0x818] sm:$0xf0]  ;;  %v7911_v56 = vld [vmem:[#allocation8 + $0x6e0] sm:$0xf0]  ;;  %v7884_v9 = vld [vmem:[#allocation8 + $0x608] sm:$0xf0] }
 0x194   : > { %4544 = vmatpush.bf16.msra.mxu0 %v6659_v42  ;;  %v8575_v42 = vpack.c.bf16 %v2539_v16, %v2539_v16  ;;  %v7283_v5 = vor.u32 %v7950_v40, %v7282_v39  ;;  %v7354_v16 = vld [vmem:[#allocation8 + $0x8a0] sm:$0xf]  ;;  %v7908_v36 = vld [vmem:[#allocation8 + $0x6c8] sm:$0xf0] }
 0x195   : > { %4557 = vmatpush.bf16.msra.mxu1 %v6755_v48  ;;  %v7187_v48 = vor.u32 %v7926_v37, %v7186_v35  ;;  %v7355_v28 = vor.u32 %v7968_v20, %v7354_v16  ;;  %v7114_v7 = vld [vmem:[#allocation8 + $0x6c0] sm:$0xf] }
 0x196   : > { %4570 = vmatpush.bf16.msra.mxu2 %v6851_v49  ;;  %v7078_v49 = vld [vmem:[#allocation8 + $0x678] sm:$0xf]  ;;  %v7210_v20 = vld [vmem:[#allocation8 + $0x780] sm:$0xf] }
 0x197   : > { %4583 = vmatpush.bf16.msra.mxu3 %v6947_v58  ;;  %v7066_v58 = vld [vmem:[#allocation8 + $0x660] sm:$0xf]  ;;  %v7079_v61 = vor.u32 %v7899_v54, %v7078_v49  ;;  %v7030_v49 = vld [vmem:[#allocation8 + $0x618] sm:$0xf]  ;;  %v7330_v54 = vld [vmem:[#allocation8 + $0x870] sm:$0xf] }
 0x198   : > { %4545 = vmatpush.bf16.msra.mxu0 %v6647_v59  ;;  %v7379_v59 = vor.u32 %v7974_v51, %v7378_v50  ;;  %v7067_v6 = vor.u32 %v7896_v2, %v7066_v58  ;;  %v7222_v58 = vld [vmem:[#allocation8 + $0x798] sm:$0xf] }
 0x199   : > { %4558 = vmatpush.bf16.msra.mxu1 %v6743_v0  ;;  %v7366_v0 = vld [vmem:[#allocation8 + $0x8b8] sm:$0xf] }
 0x19a   : > { %4571 = vmatpush.bf16.msra.mxu2 %v6839_v1  ;;  %v7971_v1 = vld [vmem:[#allocation8 + $0x8c0] sm:$0xf0] }
 0x19b   : > { %4584 = vmatpush.bf16.msra.mxu3 %v6935_v21  ;;  %v7367_v11 = vor.u32 %v7971_v1, %v7366_v0  ;;  %v7893_v21 = vld [vmem:[#allocation8 + $0x650] sm:$0xf0]  ;;  %v7331_v0 = vor.u32 %v7962_v32, %v7330_v54  ;;  %v7031_v1 = vor.u32 %v7887_v55, %v7030_v49  ;;  %v612_v49 = vperm.slane %v8586_v63, 1  ;;  %v7730_v54 = vld [vmem:[#allocation8 + $0x13c] sm:$0xf] }
 0x19c   : > { %4546 = vmatpush.bf16.msra.mxu0 %v6635_v22  ;;  %v2388_v14 = vpop.f32.mrf.mxu0  ;;  %v7150_v22 = vld [vmem:[#allocation8 + $0x708] sm:$0xf]  ;;  %v7055_v18 = vor.u32 %v7893_v21, %v7054_v13  ;;  %v7736_v13 = vld [vmem:[#allocation8 + $0x16c] sm:$0xf] }
 0x19d   : > { %4559 = vmatpush.bf16.msra.mxu1 %v6731_v26  ;;  %v2401_v15 = vpop.f32.mrf.mxu1  ;;  %v7246_v26 = vld [vmem:[#allocation8 + $0x7c8] sm:$0xf]  ;;  %v2389_v27 = vadd.f32 %v2388_v14, %v611_v10  ;;  %v7712_v10 = vld [vmem:[#allocation8 + $0xac] sm:$0xf]  ;;  %v6432_v14 = vld [vmem:[#allocation8 + $0x174] sm:$0xf0] }
 0x19e   : > { %4572 = vmatpush.bf16.msra.mxu2 %v6827_v34  ;;  %v7941_v34 = vld [vmem:[#allocation8 + $0x7d0] sm:$0xf0]  ;;  %v7932_v21 = vld [vmem:[#allocation8 + $0x788] sm:$0xf0]  ;;  %v6408_v32 = vld [vmem:[#allocation8 + $0x144] sm:$0xf0] }
 0x19f   : > { %4547 = vmatmul.bf16.vlgmr.msra.gmra.mxu0 %v8575_v42  ;;  %4585 = vmatpush.bf16.msra.mxu3 %v6923_v38  ;;  %v7247_v37 = vor.u32 %v7941_v34, %v7246_v26  ;;  %v7938_v38 = vld [vmem:[#allocation8 + $0x7b8] sm:$0xf0]  ;;  %v2402_v39 = vadd.f32 %v2401_v15, %v2389_v27  ;;  %v7760_v26 = vld [vmem:[#allocation8 + $0x22c] sm:$0xf]  ;;  %v6528_v34 = vld [vmem:[#allocation8 + $0x234] sm:$0xf0] }
 0x1a0   : > { %4591 = vmatpush.bf16.msrb.mxu0 %v7103_v29  ;;  %4560 = vmatmul.bf16.vlgmr.msra.gmra.mxu1 %v8577_v46  ;;  %v7151_v29 = vor.u32 %v7917_v23, %v7150_v22 }
 0x1a1   : > { %4604 = vmatpush.bf16.msrb.mxu1 %v7199_v17  ;;  %4573 = vmatmul.bf16.vlgmr.msra.gmra.mxu2 %v8579_v52  ;;  %v7042_v17 = vld [vmem:[#allocation8 + $0x630] sm:$0xf] }
 0x1a2   : > { %4617 = vmatpush.bf16.msrb.mxu2 %v7295_v45  ;;  %4586 = vmatmul.bf16.vlgmr.msra.gmra.mxu3 %v8581_v53  ;;  %v7234_v45 = vld [vmem:[#allocation8 + $0x7b0] sm:$0xf] }
 0x1a3   : > { %4630 = vmatpush.bf16.msrb.mxu3 %v7391_v43  ;;  %v7343_v43 = vor.u32 %v7965_v19, %v7342_v41  ;;  %v7235_v57 = vor.u32 %v7938_v38, %v7234_v45  ;;  %v6324_v41 = vld [vmem:[#allocation8 + $0x9c] sm:$0xf0]  ;;  %v7733_v19 = vld [vmem:[#allocation8 + $0x154] sm:$0xf]  ;;  %v6624_v45 = vld [vmem:[#allocation8 + $0x2f4] sm:$0xf0] }
 0x1a4   : > { %4592 = vmatpush.bf16.msrb.mxu0 %v7091_v47  ;;  %v2414_v35 = vpop.f32.mrf.mxu2  ;;  %v7043_v47 = vor.u32 %v7890_v30, %v7042_v17  ;;  %v2390_v50 = vpop.f32.mrf.mxu0  ;;  %v7956_v17 = vld [vmem:[#allocation8 + $0x848] sm:$0xf0]  ;;  %v6420_v30 = vld [vmem:[#allocation8 + $0x15c] sm:$0xf0]  ;;  %v7757_v38 = vld [vmem:[#allocation8 + $0x214] sm:$0xf] }
 0x1a5   : > { %4605 = vmatpush.bf16.msrb.mxu1 %v7187_v48  ;;  %v7139_v48 = vor.u32 %v7914_v60, %v7138_v44  ;;  %v2403_v51 = vpop.f32.mrf.mxu1  ;;  %v7211_v44 = vor.u32 %v7932_v21, %v7210_v20  ;;  %v7706_v50 = vld [vmem:[#allocation8 + $0x7c] sm:$0xf]  ;;  %v7724_v21 = vld [vmem:[#allocation8 + $0x10c] sm:$0xf] }
 0x1a6   : > { %4618 = vmatpush.bf16.msrb.mxu2 %v7283_v5  ;;  %v8590_v40 = vpop.f32.mrf.mxu3  ;;  %v7126_v5 = vld [vmem:[#allocation8 + $0x6d8] sm:$0xf]  ;;  %v6312_v51 = vld [vmem:[#allocation8 + $0x84] sm:$0xf0] }
 0x1a7   : > { %4631 = vmatpush.bf16.msrb.mxu3 %v7379_v59  ;;  %v7935_v59 = vld [vmem:[#allocation8 + $0x7a0] sm:$0xf0]  ;;  %v7127_v2 = vor.u32 %v7911_v56, %v7126_v5  ;;  %v7781_v56 = vld [vmem:[#allocation8 + $0x2d4] sm:$0xf] }
 0x1a8   : > { %4593 = vmatpush.bf16.msrb.mxu0 %v7079_v61  ;;  %v2415_v61 = vadd.f32 %v2414_v35, %v2402_v39  ;;  %v6531_v35 = vor.u32 %v7760_v26, %v6528_v34  ;;  %v6516_v39 = vld [vmem:[#allocation8 + $0x21c] sm:$0xf0]  ;;  %v7775_v26 = vld [vmem:[#allocation8 + $0x2a4] sm:$0xf]  ;;  %v6588_v34 = vld [vmem:[#allocation8 + $0x2ac] sm:$0xf0] }
 0x1a9   : > { %4606 = vmatpush.bf16.msrb.mxu1 %v7175_v62  ;;  %v7018_v62 = vld [vmem:[#allocation8 + $0x600] sm:$0xf]  ;;  %v6519_v5 = vor.u32 %v7757_v38, %v6516_v39  ;;  %v7772_v38 = vld [vmem:[#allocation8 + $0x28c] sm:$0xf]  ;;  %v6576_v39 = vld [vmem:[#allocation8 + $0x294] sm:$0xf0] }
 0x1aa   : > { %4619 = vmatpush.bf16.msrb.mxu2 %v7271_v8  ;;  %v7959_v8 = vld [vmem:[#allocation8 + $0x860] sm:$0xf0]  ;;  %v2543_v15 = vmax.f32 %v2415_v61, 0.0  ;;  %v7019_v23 = vor.u32 %v7884_v9, %v7018_v62  ;;  %v6315_v61 = vor.u32 %v7706_v50, %v6312_v51  ;;  %v6411_v62 = vor.u32 %v7730_v54, %v6408_v32  ;;  %v7694_v32 = vld [vmem:[#allocation8 + $0x1c] sm:$0xf] }
 0x1ab   : > { %4632 = vmatpush.bf16.msrb.mxu3 %v7367_v11  ;;  %v7223_v11 = vor.u32 %v7935_v59, %v7222_v58  ;;  %v7319_v22 = vor.u32 %v7959_v8, %v7318_v3  ;;  %v7754_v58 = vld [vmem:[#allocation8 + $0x1fc] sm:$0xf]  ;;  %v6504_v59 = vld [vmem:[#allocation8 + $0x204] sm:$0xf0]  ;;  %v7727_v9 = vld [vmem:[#allocation8 + $0x124] sm:$0xf] }
 0x1ac   : > { %4594 = vmatpush.bf16.msrb.mxu0 %v7067_v6  ;;  %v2416_v6 = vpop.f32.mrf.mxu2  ;;  %v8592_v60 = vpack.c.bf16 %v2543_v15, %v2543_v15  ;;  %v6396_v3 = vld [vmem:[#allocation8 + $0x12c] sm:$0xf0]  ;;  %v7700_v15 = vld [vmem:[#allocation8 + $0x4c] sm:$0xf] }
 0x1ad   : > { %4607 = vmatpush.bf16.msrb.mxu1 %v7163_v12  ;;  %v6336_v12 = vld [vmem:[#allocation8 + $0xb4] sm:$0xf0]  ;;  %v6492_v6 = vld [vmem:[#allocation8 + $0x1ec] sm:$0xf0] }
 0x1ae   : > { %4620 = vmatpush.bf16.msrb.mxu2 %v7259_v25  ;;  %v2429_v16 = vpop.f32.mrf.mxu3  ;;  %v7115_v25 = vor.u32 %v7908_v36, %v7114_v7  ;;  %v6339_v27 = vor.u32 %v7712_v10, %v6336_v12  ;;  %v6507_v7 = vor.u32 %v7754_v58, %v6504_v59  ;;  %v7778_v36 = vld [vmem:[#allocation8 + $0x2bc] sm:$0xf]  ;;  %v6600_v10 = vld [vmem:[#allocation8 + $0x2c4] sm:$0xf0]  ;;  %v6579_v59 = vor.u32 %v7772_v38, %v6576_v39 }
 0x1af   : > { %4633 = vmatpush.bf16.msrb.mxu3 %v7355_v28  ;;  %v6435_v28 = vor.u32 %v7736_v13, %v6432_v14  ;;  %v6399_v14 = vor.u32 %v7727_v9, %v6396_v3  ;;  %v7802_v38 = vld [vmem:[#allocation8 + $0x37c] sm:$0xf]  ;;  %v6696_v39 = vld [vmem:[#allocation8 + $0x384] sm:$0xf0] }
 0x1b0   : > { %4595 = vmatpush.bf16.msrb.mxu0 %v7055_v18  ;;  %v7709_v18 = vld [vmem:[#allocation8 + $0x94] sm:$0xf] }
 0x1b1   : > { %4608 = vmatpush.bf16.msrb.mxu1 %v7151_v29  ;;  %v7306_v29 = vld [vmem:[#allocation8 + $0x840] sm:$0xf] }
 0x1b2   : > { %4621 = vmatpush.bf16.msrb.mxu2 %v7247_v37  ;;  %v7784_v37 = vld [vmem:[#allocation8 + $0x2ec] sm:$0xf] }
 0x1b3   : > { %4634 = vmatpush.bf16.msrb.mxu3 %v7343_v43  ;;  %v7307_v43 = vor.u32 %v7956_v17, %v7306_v29  ;;  %v6627_v55 = vor.u32 %v7784_v37, %v6624_v45  ;;  %v6591_v37 = vor.u32 %v7775_v26, %v6588_v34 }
 0x1b4   : > { %4596 = vmatpush.bf16.msrb.mxu0 %v7043_v47  ;;  %v6327_v47 = vor.u32 %v7709_v18, %v6324_v41  ;;  %v6480_v18 = vld [vmem:[#allocation8 + $0x1d4] sm:$0xf0]  ;;  %v7697_v41 = vld [vmem:[#allocation8 + $0x34] sm:$0xf] }
 0x1b5   : > { %4609 = vmatpush.bf16.msrb.mxu1 %v7139_v48  ;;  %v6423_v48 = vor.u32 %v7733_v19, %v6420_v30  ;;  %v6276_v19 = vld [vmem:[#allocation8 + $0x3c] sm:$0xf0] }
 0x1b6   : > { %4622 = vmatpush.bf16.msrb.mxu2 %v7235_v57  ;;  %v6612_v57 = vld [vmem:[#allocation8 + $0x2dc] sm:$0xf0]  ;;  %v6279_v50 = vor.u32 %v7697_v41, %v6276_v19 }
 0x1b7   : > { %4635 = vmatpush.bf16.msrb.mxu3 %v7331_v0  ;;  %v7703_v0 = vld [vmem:[#allocation8 + $0x64] sm:$0xf]  ;;  %v6615_v8 = vor.u32 %v7781_v56, %v6612_v57  ;;  %v7718_v56 = vld [vmem:[#allocation8 + $0xdc] sm:$0xf]  ;;  %v6360_v57 = vld [vmem:[#allocation8 + $0xe4] sm:$0xf0] }
 0x1b8   : > { %4597 = vmatpush.bf16.msrb.mxu0 %v7031_v1  ;;  %v2428_v1 = vadd.f32 %v8590_v40, %v612_v49  ;;  %v6288_v40 = vld [vmem:[#allocation8 + $0x54] sm:$0xf0]  ;;  %v6468_v49 = vld [vmem:[#allocation8 + $0x1bc] sm:$0xf0]  ;;  %v6363_v3 = vor.u32 %v7718_v56, %v6360_v57  ;;  %v6684_v56 = vld [vmem:[#allocation8 + $0x36c] sm:$0xf0] }
 0x1b9   : > { %4610 = vmatpush.bf16.msrb.mxu1 %v7127_v2  ;;  %v6300_v2 = vld [vmem:[#allocation8 + $0x6c] sm:$0xf0]  ;;  %v6291_v29 = vor.u32 %v7700_v15, %v6288_v40  ;;  %v7823_v57 = vld [vmem:[#allocation8 + $0x424] sm:$0xf] }
 0x1ba   : > { %4623 = vmatpush.bf16.msrb.mxu2 %v7223_v11  ;;  %v7751_v11 = vld [vmem:[#allocation8 + $0x1e4] sm:$0xf]  ;;  %v6303_v13 = vor.u32 %v7703_v0, %v6300_v2  ;;  %v6564_v0 = vld [vmem:[#allocation8 + $0x27c] sm:$0xf0]  ;;  %v6456_v2 = vld [vmem:[#allocation8 + $0x1a4] sm:$0xf0] }
 0x1bb   : > { %4636 = vmatpush.bf16.msrb.mxu3 %v7319_v22  ;;  %v6384_v22 = vld [vmem:[#allocation8 + $0x114] sm:$0xf0]  ;;  %v6444_v40 = vld [vmem:[#allocation8 + $0x18c] sm:$0xf0] }
 0x1bc   : > { %4598 = vmatpush.bf16.msrb.mxu0 %v7019_v23  ;;  %v2440_v12 = vpop.f32.mrf.mxu0  ;;  %v6603_v23 = vor.u32 %v7778_v36, %v6600_v10  ;;  %v6387_v17 = vor.u32 %v7724_v21, %v6384_v22  ;;  %v7715_v36 = vld [vmem:[#allocation8 + $0xc4] sm:$0xf]  ;;  %v6348_v10 = vld [vmem:[#allocation8 + $0xcc] sm:$0xf0]  ;;  %v7766_v21 = vld [vmem:[#allocation8 + $0x25c] sm:$0xf] }
 0x1bd   : > { %4611 = vmatpush.bf16.msrb.mxu1 %v7115_v25  ;;  %v2441_v16 = vadd.f32 %v2440_v12, %v2428_v1  ;;  %v2453_v20 = vpop.f32.mrf.mxu1  ;;  %v6495_v25 = vor.u32 %v7751_v11, %v6492_v6  ;;  %v7742_v1 = vld [vmem:[#allocation8 + $0x19c] sm:$0xf]  ;;  %v7808_v11 = vld [vmem:[#allocation8 + $0x3ac] sm:$0xf]  ;;  %v6720_v6 = vld [vmem:[#allocation8 + $0x3b4] sm:$0xf0] }
 0x1be   : > { %4624 = vmatpush.bf16.msrb.mxu2 %v7211_v44  ;;  %v7721_v44 = vld [vmem:[#allocation8 + $0xf4] sm:$0xf]  ;;  %v6459_v15 = vor.u32 %v7742_v1, %v6456_v2  ;;  %v6552_v22 = vld [vmem:[#allocation8 + $0x264] sm:$0xf0]  ;;  %v6723_v34 = vor.u32 %v7808_v11, %v6720_v6  ;;  %v6672_v2 = vld [vmem:[#allocation8 + $0x354] sm:$0xf0] }
 0x1bf   : > { %4599 = vmatmul.bf16.vlgmr.msrb.gmra.mxu0 %v8592_v60  ;;  %4637 = vmatpush.bf16.msrb.mxu3 %v7307_v43  ;;  %v6555_v19 = vor.u32 %v7766_v21, %v6552_v22  ;;  %v6900_v21 = vld [vmem:[#allocation8 + $0x51c] sm:$0xf0] }
 0x1c0   : > { %4643 = vmatpush.bf16.msra.mxu0 %v6339_v27  ;;  %v2454_v27 = vadd.f32 %v2453_v20, %v2441_v16  ;;  %v7739_v16 = vld [vmem:[#allocation8 + $0x184] sm:$0xf] }
 0x1c1   : > { %4656 = vmatpush.bf16.msra.mxu1 %v6435_v28  ;;  %v7748_v28 = vld [vmem:[#allocation8 + $0x1cc] sm:$0xf]  ;;  %v6447_v41 = vor.u32 %v7739_v16, %v6444_v40  ;;  %v7853_v40 = vld [vmem:[#allocation8 + $0x514] sm:$0xf] }
 0x1c2   : > { %4669 = vmatpush.bf16.msra.mxu2 %v6531_v35  ;;  %v2544_v30 = vmax.f32 %v2454_v27, 0.0  ;;  %v6372_v35 = vld [vmem:[#allocation8 + $0xfc] sm:$0xf0]  ;;  %v6483_v45 = vor.u32 %v7748_v28, %v6480_v18  ;;  %v7805_v28 = vld [vmem:[#allocation8 + $0x394] sm:$0xf] }
 0x1c3   : > { %4682 = vmatpush.bf16.msra.mxu3 %v6627_v55  ;;  %v6375_v51 = vor.u32 %v7721_v44, %v6372_v35  ;;  %v6708_v18 = vld [vmem:[#allocation8 + $0x39c] sm:$0xf0]  ;;  %v6540_v44 = vld [vmem:[#allocation8 + $0x24c] sm:$0xf0]  ;;  %v613_v35 = vperm.slane %v8586_v63, 2 }
 0x1c4   : > { %4644 = vmatpush.bf16.msra.mxu0 %v6327_v47  ;;  %v8597_v43 = vpack.c.bf16 %v2544_v30, %v2544_v30  ;;  %v8599_v47 = vpop.f32.mrf.mxu2  ;;  %v2442_v55 = vpop.f32.mrf.mxu0  ;;  %v7763_v30 = vld [vmem:[#allocation8 + $0x244] sm:$0xf] }
 0x1c5   : > { %4657 = vmatpush.bf16.msra.mxu1 %v6423_v48  ;;  %v7745_v48 = vld [vmem:[#allocation8 + $0x1b4] sm:$0xf]  ;;  %v2455_v58 = vpop.f32.mrf.mxu1 }
 0x1c6   : > { %4670 = vmatpush.bf16.msra.mxu2 %v6519_v5  ;;  %v8601_v54 = vpop.f32.mrf.mxu3  ;;  %4612 = vmatmul.bf16.vlgmr.msrb.gmra.mxu1 %v8597_v43  ;;  %v6264_v5 = vld [vmem:[#allocation8 + $0x24] sm:$0xf0]  ;;  %v6780_v58 = vld [vmem:[#allocation8 + $0x42c] sm:$0xf0] }
 0x1c7   : > { %4683 = vmatpush.bf16.msra.mxu3 %v6615_v8  ;;  %v6267_v9 = vor.u32 %v7694_v32, %v6264_v5  ;;  %v7691_v8 = vld [vmem:[#allocation8 + $0x4] sm:$0xf]  ;;  %v6699_v32 = vor.u32 %v7802_v38, %v6696_v39 }
 0x1c8   : > { %4645 = vmatpush.bf16.msra.mxu0 %v6315_v61  ;;  %v6471_v61 = vor.u32 %v7745_v48, %v6468_v49  ;;  %v7826_v48 = vld [vmem:[#allocation8 + $0x43c] sm:$0xf]  ;;  %v6792_v49 = vld [vmem:[#allocation8 + $0x444] sm:$0xf0]  ;;  %v7799_v5 = vld [vmem:[#allocation8 + $0x364] sm:$0xf] }
 0x1c9   : > { %4658 = vmatpush.bf16.msra.mxu1 %v6411_v62  ;;  %v7769_v62 = vld [vmem:[#allocation8 + $0x274] sm:$0xf]  ;;  %v6795_v55 = vor.u32 %v7826_v48, %v6792_v49  ;;  %v7787_v38 = vld [vmem:[#allocation8 + $0x304] sm:$0xf]  ;;  %v6636_v49 = vld [vmem:[#allocation8 + $0x30c] sm:$0xf0] }
 0x1ca   : > { %4671 = vmatpush.bf16.msra.mxu2 %v6507_v7  ;;  %v6252_v7 = vld [vmem:[#allocation8 + $0xc] sm:$0xf0]  ;;  %v6567_v12 = vor.u32 %v7769_v62, %v6564_v0  ;;  %v6687_v62 = vor.u32 %v7799_v5, %v6684_v56  ;;  %v6783_v0 = vor.u32 %v7823_v57, %v6780_v58  ;;  %v7104_v5 = vld [vmem:[#allocation8 + $0x6b4] sm:$0xf0]  ;;  %v7928_v58 = vld [vmem:[#allocation8 + $0x76c] sm:$0xf] }
 0x1cb   : > { %4684 = vmatpush.bf16.msra.mxu3 %v6603_v23  ;;  %v6255_v23 = vor.u32 %v7691_v8, %v6252_v7 }
 0x1cc   : > { %4646 = vmatpush.bf16.msra.mxu0 %v6303_v13  ;;  %v7832_v13 = vld [vmem:[#allocation8 + $0x46c] sm:$0xf]  ;;  %v2468_v20 = vpop.f32.mrf.mxu2 }
 0x1cd   : > { %4659 = vmatpush.bf16.msra.mxu1 %v6399_v14  ;;  %v6816_v14 = vld [vmem:[#allocation8 + $0x474] sm:$0xf0] }
 0x1ce   : > { %4672 = vmatpush.bf16.msra.mxu2 %v6495_v25  ;;  %v6351_v25 = vor.u32 %v7715_v36, %v6348_v10  ;;  %v2481_v26 = vpop.f32.mrf.mxu3  ;;  %v6819_v27 = vor.u32 %v7832_v13, %v6816_v14  ;;  %v7856_v36 = vld [vmem:[#allocation8 + $0x52c] sm:$0xf]  ;;  %v6912_v10 = vld [vmem:[#allocation8 + $0x534] sm:$0xf0]  ;;  %v6660_v14 = vld [vmem:[#allocation8 + $0x33c] sm:$0xf0] }
 0x1cf   : > { %4685 = vmatpush.bf16.msra.mxu3 %v6591_v37  ;;  %v6711_v37 = vor.u32 %v7805_v28, %v6708_v18  ;;  %v6915_v20 = vor.u32 %v7856_v36, %v6912_v10  ;;  %v7790_v26 = vld [vmem:[#allocation8 + $0x31c] sm:$0xf]  ;;  %v6648_v18 = vld [vmem:[#allocation8 + $0x324] sm:$0xf0]  ;;  %v7901_v10 = vld [vmem:[#allocation8 + $0x694] sm:$0xf] }
 0x1d0   : > { %4647 = vmatpush.bf16.msra.mxu0 %v6291_v29  ;;  %v7829_v29 = vld [vmem:[#allocation8 + $0x454] sm:$0xf]  ;;  %v6651_v39 = vor.u32 %v7790_v26, %v6648_v18  ;;  %v7922_v26 = vld [vmem:[#allocation8 + $0x73c] sm:$0xf]  ;;  %v6972_v18 = vld [vmem:[#allocation8 + $0x5ac] sm:$0xf0] }
 0x1d1   : > { %4660 = vmatpush.bf16.msra.mxu1 %v6387_v17  ;;  %v6804_v17 = vld [vmem:[#allocation8 + $0x45c] sm:$0xf0] }
 0x1d2   : > { %4673 = vmatpush.bf16.msra.mxu2 %v6483_v45  ;;  %v6807_v45 = vor.u32 %v7829_v29, %v6804_v17  ;;  %v7814_v29 = vld [vmem:[#allocation8 + $0x3dc] sm:$0xf]  ;;  %v6744_v17 = vld [vmem:[#allocation8 + $0x3e4] sm:$0xf0] }
 0x1d3   : > { %4686 = vmatpush.bf16.msra.mxu3 %v6579_v59  ;;  %v6747_v48 = vor.u32 %v7814_v29, %v6744_v17  ;;  %v7841_v29 = vld [vmem:[#allocation8 + $0x4b4] sm:$0xf]  ;;  %v6852_v17 = vld [vmem:[#allocation8 + $0x4bc] sm:$0xf0] }
 0x1d4   : > { %4648 = vmatpush.bf16.msra.mxu0 %v6279_v50  ;;  %v6543_v50 = vor.u32 %v7763_v30, %v6540_v44  ;;  %v7850_v30 = vld [vmem:[#allocation8 + $0x4fc] sm:$0xf]  ;;  %v6888_v44 = vld [vmem:[#allocation8 + $0x504] sm:$0xf0] }
 0x1d5   : > { %4661 = vmatpush.bf16.msra.mxu1 %v6375_v51  ;;  %v2467_v51 = vadd.f32 %v8599_v47, %v613_v35  ;;  %v7796_v47 = vld [vmem:[#allocation8 + $0x34c] sm:$0xf]  ;;  %v6891_v56 = vor.u32 %v7850_v30, %v6888_v44  ;;  %v7895_v44 = vld [vmem:[#allocation8 + $0x664] sm:$0xf] }
 0x1d6   : > { %4674 = vmatpush.bf16.msra.mxu2 %v6471_v61  ;;  %v614_v61 = vperm.slane %v8586_v63, 3  ;;  %v6675_v6 = vor.u32 %v7796_v47, %v6672_v2  ;;  %v7817_v63 = vld [vmem:[#allocation8 + $0x3f4] sm:$0xf] }
 0x1d7   : > { %4687 = vmatpush.bf16.msra.mxu3 %v6567_v12  ;;  %v2480_v59 = vadd.f32 %v8601_v54, %v2467_v51  ;;  %v7793_v12 = vld [vmem:[#allocation8 + $0x334] sm:$0xf]  ;;  %v6732_v51 = vld [vmem:[#allocation8 + $0x3cc] sm:$0xf0] }
 0x1d8   : > { %4649 = vmatpush.bf16.msra.mxu0 %v6267_v9  ;;  %v7820_v9 = vld [vmem:[#allocation8 + $0x40c] sm:$0xf]  ;;  %v7877_v47 = vld [vmem:[#allocation8 + $0x5d4] sm:$0xf] }
 0x1d9   : > { %4662 = vmatpush.bf16.msra.mxu1 %v6363_v3  ;;  %v6768_v3 = vld [vmem:[#allocation8 + $0x414] sm:$0xf0] }
 0x1da   : > { %4675 = vmatpush.bf16.msra.mxu2 %v6459_v15  ;;  %v6771_v54 = vor.u32 %v7820_v9, %v6768_v3  ;;  %v6756_v15 = vld [vmem:[#allocation8 + $0x3fc] sm:$0xf0]  ;;  %v6639_v9 = vor.u32 %v7787_v38, %v6636_v49  ;;  %v7164_v38 = vld [vmem:[#allocation8 + $0x72c] sm:$0xf0]  ;;  %v7838_v49 = vld [vmem:[#allocation8 + $0x49c] sm:$0xf] }
 0x1db   : > { %4688 = vmatpush.bf16.msra.mxu3 %v6555_v19  ;;  %v6903_v19 = vor.u32 %v7853_v40, %v6900_v21 }
 0x1dc   : > { %4650 = vmatpush.bf16.msra.mxu0 %v6255_v23  ;;  %v2492_v1 = vpop.f32.mrf.mxu0  ;;  %v6663_v23 = vor.u32 %v7793_v12, %v6660_v14  ;;  %v7925_v12 = vld [vmem:[#allocation8 + $0x754] sm:$0xf]  ;;  %v7874_v14 = vld [vmem:[#allocation8 + $0x5bc] sm:$0xf] }
 0x1dd   : > { %4663 = vmatpush.bf16.msra.mxu1 %v6351_v25  ;;  %v2493_v8 = vadd.f32 %v2492_v1, %v2480_v59  ;;  %v2505_v7 = vpop.f32.mrf.mxu1  ;;  %v6759_v25 = vor.u32 %v7817_v63, %v6756_v15  ;;  %v7200_v59 = vld [vmem:[#allocation8 + $0x774] sm:$0xf0]  ;;  %v6996_v1 = vld [vmem:[#allocation8 + $0x5dc] sm:$0xf0]  ;;  %v6984_v63 = vld [vmem:[#allocation8 + $0x5c4] sm:$0xf0] }
 0x1de   : > { %4676 = vmatpush.bf16.msra.mxu2 %v6447_v41  ;;  %v2506_v13 = vadd.f32 %v2505_v7, %v614_v61  ;;  %v7847_v61 = vld [vmem:[#allocation8 + $0x4e4] sm:$0xf]  ;;  %v7203_v36 = vor.u32 %v7928_v58, %v7200_v59  ;;  %v7844_v15 = vld [vmem:[#allocation8 + $0x4cc] sm:$0xf]  ;;  %v7152_v59 = vld [vmem:[#allocation8 + $0x714] sm:$0xf0] }
 0x1df   : > { %4651 = vmatmul.bf16.vlgmr.msra.gmra.mxu0 %v8554_v31  ;;  %4689 = vmatpush.bf16.msra.mxu3 %v6543_v50  ;;  %v2545_v11 = vmax.f32 %v2493_v8, 0.0  ;;  %v7811_v50 = vld [vmem:[#allocation8 + $0x3c4] sm:$0xf]  ;;  %v7916_v58 = vld [vmem:[#allocation8 + $0x70c] sm:$0xf] }
 0x1e0   : > { %4695 = vmatpush.bf16.msrb.mxu0 %v6723_v34  ;;  %4664 = vmatmul.bf16.vlgmr.msra.gmra.mxu1 %v8556_v33  ;;  %v6735_v3 = vor.u32 %v7811_v50, %v6732_v51  ;;  %v6840_v50 = vld [vmem:[#allocation8 + $0x4a4] sm:$0xf0]  ;;  %v7868_v51 = vld [vmem:[#allocation8 + $0x58c] sm:$0xf] }
 0x1e1   : > { %4708 = vmatpush.bf16.msrb.mxu1 %v6819_v27  ;;  %v8610_v16 = vpack.c.bf16 %v2545_v11, %v2545_v11 }
 0x1e3   : > { %4625 = vmatmul.bf16.vlgmr.msrb.gmra.mxu2 %v8610_v16 }
 0x1e4   : > { %4696 = vmatpush.bf16.msrb.mxu0 %v6711_v37  ;;  %v2518_v22 = vpop.f32.mrf.mxu2  ;;  %v2494_v28 = vpop.f32.mrf.mxu0  ;;  %4721 = vmatpush.bf16.msrb.mxu2 %v6915_v20  ;;  %v7880_v37 = vld [vmem:[#allocation8 + $0x5ec] sm:$0xf]  ;;  %v6864_v20 = vld [vmem:[#allocation8 + $0x4d4] sm:$0xf0] }
 0x1e5   : > { %4709 = vmatpush.bf16.msrb.mxu1 %v6807_v45  ;;  %v2519_v34 = vadd.f32 %v2518_v22, %v2506_v13  ;;  %v2507_v41 = vpop.f32.mrf.mxu1  ;;  %v7008_v45 = vld [vmem:[#allocation8 + $0x5f4] sm:$0xf0]  ;;  %v7188_v13 = vld [vmem:[#allocation8 + $0x75c] sm:$0xf0]  ;;  %v7898_v22 = vld [vmem:[#allocation8 + $0x67c] sm:$0xf] }
 0x1e6   : > { %v2531_v27 = vpop.f32.mrf.mxu3  ;;  %v7011_v57 = vor.u32 %v7880_v37, %v7008_v45  ;;  %v7191_v21 = vor.u32 %v7925_v12, %v7188_v13  ;;  %v7871_v28 = vld [vmem:[#allocation8 + $0x5a4] sm:$0xf]  ;;  %v8618_v41 = vld [vmem:[#allocation10] sm:$0x7]  ;;  %v7068_v37 = vld [vmem:[#allocation8 + $0x66c] sm:$0xf0] }
 0x1e7   : > { %v2532_v35 = vadd.f32 %v2531_v27, %v2519_v34  ;;  %v7176_v34 = vld [vmem:[#allocation8 + $0x744] sm:$0xf0]  ;;  %v6867_v27 = vor.u32 %v7844_v15, %v6864_v20  ;;  %v7919_v45 = vld [vmem:[#allocation8 + $0x724] sm:$0xf]  ;;  %v7044_v13 = vld [vmem:[#allocation8 + $0x63c] sm:$0xf0] }
 0x1e8   : > { %4697 = vmatpush.bf16.msrb.mxu0 %v6699_v32  ;;  %4722 = vmatpush.bf16.msrb.mxu2 %v6903_v19  ;;  %v7179_v30 = vor.u32 %v7922_v26, %v7176_v34  ;;  %v7949_v26 = vld [vmem:[#allocation8 + $0x814] sm:$0xf]  ;;  %v7284_v34 = vld [vmem:[#allocation8 + $0x81c] sm:$0xf0] }
 0x1e9   : > { %4710 = vmatpush.bf16.msrb.mxu1 %v6795_v55  ;;  %v2546_v32 = vmax.f32 %v2532_v35, 0.0  ;;  %v7904_v55 = vld [vmem:[#allocation8 + $0x6ac] sm:$0xf]  ;;  %v6975_v35 = vor.u32 %v7871_v28, %v6972_v18 }
 0x1ea   : > { %v7107_v7 = vor.u32 %v7904_v55, %v7104_v5  ;;  %v7071_v55 = vor.u32 %v7895_v44, %v7068_v37  ;;  %v7167_v5 = vor.u32 %v7919_v45, %v7164_v38  ;;  %v7859_v45 = vld [vmem:[#allocation8 + $0x544] sm:$0xf]  ;;  %v7287_v38 = vor.u32 %v7949_v26, %v7284_v34  ;;  %v7970_v26 = vld [vmem:[#allocation8 + $0x8bc] sm:$0xf]  ;;  %v7368_v34 = vld [vmem:[#allocation8 + $0x8c4] sm:$0xf0] }
 0x1ec   : > { %4698 = vmatpush.bf16.msrb.mxu0 %v6687_v62  ;;  %v8613_v62 = vpack.c.bf16 %v2546_v32, %v2546_v32  ;;  %v2520_v2 = vpop.f32.mrf.mxu2  ;;  %4723 = vmatpush.bf16.msrb.mxu2 %v6891_v56  ;;  %v6960_v32 = vld [vmem:[#allocation8 + $0x594] sm:$0xf0]  ;;  %v7892_v56 = vld [vmem:[#allocation8 + $0x64c] sm:$0xf] }
 0x1ed   : > { %4711 = vmatpush.bf16.msrb.mxu1 %v6783_v0  ;;  %v6876_v0 = vld [vmem:[#allocation8 + $0x4ec] sm:$0xf0]  ;;  %v7835_v2 = vld [vmem:[#allocation8 + $0x484] sm:$0xf] }
 0x1ee   : > { %v2533_v8 = vpop.f32.mrf.mxu3  ;;  %4638 = vmatmul.bf16.vlgmr.msrb.gmra.mxu3 %v8613_v62  ;;  %v6879_v11 = vor.u32 %v7847_v61, %v6876_v0 }
 0x1ef   : > { %4734 = vmatpush.bf16.msrb.mxu3 %v7011_v57  ;;  %v7056_v57 = vld [vmem:[#allocation8 + $0x654] sm:$0xf0]  ;;  %v7865_v8 = vld [vmem:[#allocation8 + $0x574] sm:$0xf] }
 0x1f0   : > { %4699 = vmatpush.bf16.msrb.mxu0 %v6675_v6  ;;  %v6999_v6 = vor.u32 %v7877_v47, %v6996_v1  ;;  %4724 = vmatpush.bf16.msrb.mxu2 %v6879_v11  ;;  %v6843_v47 = vor.u32 %v7838_v49, %v6840_v50  ;;  %v6963_v1 = vor.u32 %v7868_v51, %v6960_v32  ;;  %v7952_v11 = vld [vmem:[#allocation8 + $0x82c] sm:$0xf]  ;;  %v7272_v49 = vld [vmem:[#allocation8 + $0x804] sm:$0xf0] }
 0x1f1   : > { %4712 = vmatpush.bf16.msrb.mxu1 %v6771_v54  ;;  %v7092_v54 = vld [vmem:[#allocation8 + $0x69c] sm:$0xf0] }
 0x1f2   : > { %v7095_v40 = vor.u32 %v7901_v10, %v7092_v54  ;;  %v7155_v10 = vor.u32 %v7916_v58, %v7152_v59  ;;  %v7889_v54 = vld [vmem:[#allocation8 + $0x634] sm:$0xf]  ;;  %v7907_v58 = vld [vmem:[#allocation8 + $0x6c4] sm:$0xf]  ;;  %v7116_v59 = vld [vmem:[#allocation8 + $0x6cc] sm:$0xf0] }
 0x1f3   : > { %4735 = vmatpush.bf16.msrb.mxu3 %v6999_v6  ;;  %4677 = vmatmul.bf16.vlgmr.msra.gmra.mxu2 %v8558_v24  ;;  %v7296_v6 = vld [vmem:[#allocation8 + $0x834] sm:$0xf0] }
 0x1f4   : > { %4700 = vmatpush.bf16.msrb.mxu0 %v6663_v23  ;;  %v6987_v23 = vor.u32 %v7874_v14, %v6984_v63  ;;  %4725 = vmatpush.bf16.msrb.mxu2 %v6867_v27  ;;  %v7913_v14 = vld [vmem:[#allocation8 + $0x6f4] sm:$0xf]  ;;  %v7140_v63 = vld [vmem:[#allocation8 + $0x6fc] sm:$0xf0]  ;;  %v7886_v27 = vld [vmem:[#allocation8 + $0x61c] sm:$0xf] }
 0x1f5   : > { %4713 = vmatpush.bf16.msrb.mxu1 %v6759_v25  ;;  %v7080_v25 = vld [vmem:[#allocation8 + $0x684] sm:$0xf0] }
 0x1f6   : > { %v7083_v19 = vor.u32 %v7898_v22, %v7080_v25  ;;  %v6936_v22 = vld [vmem:[#allocation8 + $0x564] sm:$0xf0]  ;;  %v7143_v25 = vor.u32 %v7913_v14, %v7140_v63  ;;  %v6330_v63 = vld [vmem:[#allocation8 + $0x98] sm:$0xf] }
 0x1f7   : > { %4736 = vmatpush.bf16.msrb.mxu3 %v6987_v23  ;;  %v7047_v23 = vor.u32 %v7889_v54, %v7044_v13 }
 0x1f8   : > { %4701 = vmatpush.bf16.msrb.mxu0 %v6651_v39  ;;  %v6855_v39 = vor.u32 %v7841_v29, %v6852_v17  ;;  %v7032_v29 = vld [vmem:[#allocation8 + $0x624] sm:$0xf0]  ;;  %v7910_v17 = vld [vmem:[#allocation8 + $0x6dc] sm:$0xf] }
 0x1f9   : > { %4714 = vmatpush.bf16.msrb.mxu1 %v6747_v48  ;;  %v2945_v48 = vperm.slane %v8618_v41, 0  ;;  %v7035_v51 = vor.u32 %v7886_v27, %v7032_v29  ;;  %v7708_v29 = vld [vmem:[#allocation8 + $0x88] sm:$0xf0] }
 0x1fa   : > { %4726 = vmatpush.bf16.msrb.mxu2 %v6855_v39  ;;  %v6924_v39 = vld [vmem:[#allocation8 + $0x54c] sm:$0xf0] }
 0x1fb   : > { %4737 = vmatpush.bf16.msrb.mxu3 %v6975_v35 }
 0x1fc   : > { %4702 = vmatpush.bf16.msrb.mxu0 %v6639_v9  ;;  %v4496_v61 = vpop.f32.mrf.mxu0 }
 0x1fd   : > { %4715 = vmatpush.bf16.msrb.mxu1 %v6735_v3  ;;  %v4509_v0 = vpop.f32.mrf.mxu1  ;;  %v4497_v9 = vadd.f32 %v4496_v61, %v2945_v48  ;;  %v6828_v3 = vld [vmem:[#allocation8 + $0x48c] sm:$0xf0]  ;;  %v7946_v48 = vld [vmem:[#allocation8 + $0x7fc] sm:$0xf]  ;;  %v6927_v61 = vor.u32 %v7859_v45, %v6924_v39  ;;  %v7967_v45 = vld [vmem:[#allocation8 + $0x8a4] sm:$0xf] }
 0x1fe   : > { %4690 = vmatmul.bf16.vlgmr.msra.gmra.mxu3 %v8560_v4  ;;  %4727 = vmatpush.bf16.msrb.mxu2 %v6843_v47  ;;  %v6831_v15 = vor.u32 %v7835_v2, %v6828_v3  ;;  %v7714_v47 = vld [vmem:[#allocation8 + $0xb8] sm:$0xf0] }
 0x1ff   : > { %4703 = vmatmul.bf16.vlgmr.msrb.gmra.mxu0 %v8575_v42  ;;  %v4510_v12 = vadd.f32 %v4509_v0, %v4497_v9  ;;  %4738 = vmatpush.bf16.msrb.mxu3 %v6963_v1  ;;  %v6342_v0 = vld [vmem:[#allocation8 + $0xb0] sm:$0xf]  ;;  %v7275_v1 = vor.u32 %v7946_v48, %v7272_v49  ;;  %v7738_v3 = vld [vmem:[#allocation8 + $0x178] sm:$0xf0]  ;;  %v6306_v49 = vld [vmem:[#allocation8 + $0x68] sm:$0xf] }
 0x200   : > { %4747 = vmatpush.bf16.msra.mxu0 %v7107_v7  ;;  %4716 = vmatmul.bf16.vlgmr.msrb.gmra.mxu1 %v8577_v46  ;;  %v6948_v7 = vld [vmem:[#allocation8 + $0x57c] sm:$0xf0]  ;;  %v6438_v9 = vld [vmem:[#allocation8 + $0x170] sm:$0xf]  ;;  %v6343_v13 = vor.u32 %v7714_v47, %v6342_v0 }
 0x201   : > { %4760 = vmatpush.bf16.msra.mxu1 %v7203_v36  ;;  %v7059_v36 = vor.u32 %v7892_v56, %v7056_v57  ;;  %v6951_v20 = vor.u32 %v7865_v8, %v6948_v7  ;;  %v7883_v56 = vld [vmem:[#allocation8 + $0x604] sm:$0xf]  ;;  %v7020_v57 = vld [vmem:[#allocation8 + $0x60c] sm:$0xf0]  ;;  %v6439_v14 = vor.u32 %v7738_v3, %v6438_v9 }
 0x202   : > { %4728 = vmatpush.bf16.msrb.mxu2 %v6831_v15  ;;  %v7943_v8 = vld [vmem:[#allocation8 + $0x7e4] sm:$0xf]  ;;  %v7023_v7 = vor.u32 %v7883_v56, %v7020_v57  ;;  %v7729_v56 = vld [vmem:[#allocation8 + $0x130] sm:$0xf0]  ;;  %v7934_v57 = vld [vmem:[#allocation8 + $0x79c] sm:$0xf] }
 0x203   : > { %4739 = vmatpush.bf16.msrb.mxu3 %v6951_v20  ;;  %v7711_v15 = vld [vmem:[#allocation8 + $0xa0] sm:$0xf0] }
 0x204   : > { %4748 = vmatpush.bf16.msra.mxu0 %v7095_v40  ;;  %v7299_v40 = vor.u32 %v7952_v11, %v7296_v6  ;;  %v4522_v28 = vpop.f32.mrf.mxu2  ;;  %v4498_v44 = vpop.f32.mrf.mxu0  ;;  %v7973_v11 = vld [vmem:[#allocation8 + $0x8d4] sm:$0xf]  ;;  %v7380_v6 = vld [vmem:[#allocation8 + $0x8dc] sm:$0xf0]  ;;  %v6331_v27 = vor.u32 %v7711_v15, %v6330_v63  ;;  %v6534_v63 = vld [vmem:[#allocation8 + $0x230] sm:$0xf] }
 0x205   : > { %4761 = vmatpush.bf16.msra.mxu1 %v7191_v21  ;;  %v7862_v21 = vld [vmem:[#allocation8 + $0x55c] sm:$0xf]  ;;  %v4535_v18 = vpop.f32.mrf.mxu3  ;;  %v4511_v35 = vpop.f32.mrf.mxu1  ;;  %4729 = vmatmul.bf16.vlgmr.msrb.gmra.mxu2 %v8579_v52  ;;  %v7732_v44 = vld [vmem:[#allocation8 + $0x148] sm:$0xf0] }
 0x206   : > { %v6939_v37 = vor.u32 %v7862_v21, %v6936_v22  ;;  %4773 = vmatpush.bf16.msra.mxu2 %v7299_v40  ;;  %v7383_v40 = vor.u32 %v7973_v11, %v7380_v6  ;;  %v6426_v21 = vld [vmem:[#allocation8 + $0x158] sm:$0xf]  ;;  %v7735_v22 = vld [vmem:[#allocation8 + $0x160] sm:$0xf0]  ;;  %v7937_v35 = vld [vmem:[#allocation8 + $0x7b4] sm:$0xf] }
 0x207   : > { %v7762_v15 = vld [vmem:[#allocation8 + $0x238] sm:$0xf0] }
 0x208   : > { %4749 = vmatpush.bf16.msra.mxu0 %v7083_v19  ;;  %v7128_v19 = vld [vmem:[#allocation8 + $0x6e4] sm:$0xf0]  ;;  %4740 = vmatpush.bf16.msrb.mxu3 %v6939_v37  ;;  %v7236_v37 = vld [vmem:[#allocation8 + $0x7bc] sm:$0xf0] }
 0x209   : > { %4762 = vmatpush.bf16.msra.mxu1 %v7179_v30  ;;  %v4523_v30 = vadd.f32 %v4522_v28, %v4510_v12  ;;  %v7131_v32 = vor.u32 %v7910_v17, %v7128_v19  ;;  %v6427_v28 = vor.u32 %v7735_v22, %v6426_v21  ;;  %v7371_v19 = vor.u32 %v7970_v26, %v7368_v34  ;;  %v6282_v21 = vld [vmem:[#allocation8 + $0x38] sm:$0xf]  ;;  %v7699_v22 = vld [vmem:[#allocation8 + $0x40] sm:$0xf0] }
 0x20a   : > { %4774 = vmatpush.bf16.msra.mxu2 %v7287_v38  ;;  %v7356_v38 = vld [vmem:[#allocation8 + $0x8ac] sm:$0xf0]  ;;  %v6378_v26 = vld [vmem:[#allocation8 + $0xf8] sm:$0xf]  ;;  %v7723_v34 = vld [vmem:[#allocation8 + $0x100] sm:$0xf0] }
 0x20b   : > { %v8623_v50 = vadd.f32 %v4535_v18, %v4523_v30  ;;  %v6318_v18 = vld [vmem:[#allocation8 + $0x80] sm:$0xf] }
 0x20c   : > { %4750 = vmatpush.bf16.msra.mxu0 %v7071_v55  ;;  %v7976_v55 = vld [vmem:[#allocation8 + $0x8ec] sm:$0xf]  ;;  %v4524_v54 = vpop.f32.mrf.mxu2  ;;  %4741 = vmatpush.bf16.msrb.mxu3 %v6927_v61  ;;  %v6414_v30 = vld [vmem:[#allocation8 + $0x140] sm:$0xf]  ;;  %v6319_v39 = vor.u32 %v7708_v29, %v6318_v18  ;;  %v7344_v61 = vld [vmem:[#allocation8 + $0x894] sm:$0xf0]  ;;  %v6283_v18 = vor.u32 %v7699_v22, %v6282_v21 }
 0x20d   : > { %4763 = vmatpush.bf16.msra.mxu1 %v7167_v5  ;;  %v7392_v5 = vld [vmem:[#allocation8 + $0x8f4] sm:$0xf0]  ;;  %v4537_v12 = vpop.f32.mrf.mxu3  ;;  %v6415_v48 = vor.u32 %v7732_v44, %v6414_v30  ;;  %v7212_v54 = vld [vmem:[#allocation8 + $0x78c] sm:$0xf0]  ;;  %v6270_v30 = vld [vmem:[#allocation8 + $0x20] sm:$0xf] }
 0x20e   : > { %v7395_v2 = vor.u32 %v7976_v55, %v7392_v5  ;;  %4775 = vmatpush.bf16.msra.mxu2 %v7275_v1  ;;  %v7359_v55 = vor.u32 %v7967_v45, %v7356_v38  ;;  %v6402_v5 = vld [vmem:[#allocation8 + $0x128] sm:$0xf]  ;;  %v6294_v1 = vld [vmem:[#allocation8 + $0x50] sm:$0xf]  ;;  %v7961_v12 = vld [vmem:[#allocation8 + $0x874] sm:$0xf] }
 0x20f   : > { %4742 = vmatmul.bf16.vlgmr.msrb.gmra.mxu3 %v8581_v53  ;;  %v6403_v47 = vor.u32 %v7729_v56, %v6402_v5  ;;  %v6522_v29 = vld [vmem:[#allocation8 + $0x218] sm:$0xf]  ;;  %v7696_v44 = vld [vmem:[#allocation8 + $0x28] sm:$0xf0]  ;;  %v6366_v38 = vld [vmem:[#allocation8 + $0xe0] sm:$0xf] }
 0x210   : > { %4751 = vmatpush.bf16.msra.mxu0 %v7059_v36  ;;  %v7119_v36 = vor.u32 %v7907_v58, %v7116_v59  ;;  %4786 = vmatpush.bf16.msra.mxu3 %v7395_v2  ;;  %v7224_v58 = vld [vmem:[#allocation8 + $0x7a4] sm:$0xf0]  ;;  %v7964_v59 = vld [vmem:[#allocation8 + $0x88c] sm:$0xf]  ;;  %v7702_v2 = vld [vmem:[#allocation8 + $0x58] sm:$0xf0] }
 0x211   : > { %4764 = vmatpush.bf16.msra.mxu1 %v7155_v10  ;;  %v7260_v10 = vld [vmem:[#allocation8 + $0x7ec] sm:$0xf0]  ;;  %v7227_v3 = vor.u32 %v7934_v57, %v7224_v58  ;;  %v6510_v5 = vld [vmem:[#allocation8 + $0x200] sm:$0xf]  ;;  %v6271_v57 = vor.u32 %v7696_v44, %v6270_v30  ;;  %v7756_v58 = vld [vmem:[#allocation8 + $0x208] sm:$0xf0] }
 0x212   : > { %v7263_v20 = vor.u32 %v7943_v8, %v7260_v10  ;;  %v7347_v8 = vor.u32 %v7964_v59, %v7344_v61  ;;  %v7931_v10 = vld [vmem:[#allocation8 + $0x784] sm:$0xf]  ;;  %v6630_v59 = vld [vmem:[#allocation8 + $0x2f0] sm:$0xf]  ;;  %v7786_v61 = vld [vmem:[#allocation8 + $0x2f8] sm:$0xf0] }
 0x214   : > { %4752 = vmatpush.bf16.msra.mxu0 %v7047_v23  ;;  %v7940_v23 = vld [vmem:[#allocation8 + $0x7cc] sm:$0xf]  ;;  %4776 = vmatpush.bf16.msra.mxu2 %v7263_v20 }
 0x215   : > { %4765 = vmatpush.bf16.msra.mxu1 %v7143_v25  ;;  %v7248_v25 = vld [vmem:[#allocation8 + $0x7d4] sm:$0xf0]  ;;  %4787 = vmatpush.bf16.msra.mxu3 %v7383_v40 }
 0x216   : > { %v7251_v17 = vor.u32 %v7940_v23, %v7248_v25  ;;  %v7215_v23 = vor.u32 %v7931_v10, %v7212_v54  ;;  %v6511_v10 = vor.u32 %v7756_v58, %v6510_v5  ;;  %v7834_v54 = vld [vmem:[#allocation8 + $0x478] sm:$0xf0]  ;;  %v7801_v58 = vld [vmem:[#allocation8 + $0x370] sm:$0xf0] }
 0x218   : > { %4753 = vmatpush.bf16.msra.mxu0 %v7035_v51  ;;  %v7705_v51 = vld [vmem:[#allocation8 + $0x70] sm:$0xf0]  ;;  %4777 = vmatpush.bf16.msra.mxu2 %v7251_v17  ;;  %v7759_v17 = vld [vmem:[#allocation8 + $0x220] sm:$0xf0] }
 0x219   : > { %4766 = vmatpush.bf16.msra.mxu1 %v7131_v32  ;;  %4788 = vmatpush.bf16.msra.mxu3 %v7371_v19  ;;  %v7239_v32 = vor.u32 %v7937_v35, %v7236_v37  ;;  %v6307_v0 = vor.u32 %v7705_v51, %v6306_v49  ;;  %v6379_v19 = vor.u32 %v7723_v34, %v6378_v26 }
 0x21a   : > { %v6523_v51 = vor.u32 %v7759_v17, %v6522_v29  ;;  %v6606_v29 = vld [vmem:[#allocation8 + $0x2c0] sm:$0xf]  ;;  %v7780_v17 = vld [vmem:[#allocation8 + $0x2c8] sm:$0xf0] }
 0x21c   : > { %4754 = vmatpush.bf16.msra.mxu0 %v7023_v7  ;;  %4778 = vmatpush.bf16.msra.mxu2 %v7239_v32  ;;  %v4548_v9 = vpop.f32.mrf.mxu0  ;;  %v6390_v7 = vld [vmem:[#allocation8 + $0x110] sm:$0xf]  ;;  %v7955_v32 = vld [vmem:[#allocation8 + $0x844] sm:$0xf] }
 0x21d   : > { %4767 = vmatpush.bf16.msra.mxu1 %v7119_v36  ;;  %4789 = vmatpush.bf16.msra.mxu3 %v7359_v55  ;;  %v7726_v36 = vld [vmem:[#allocation8 + $0x118] sm:$0xf0]  ;;  %v4549_v11 = vadd.f32 %v4548_v9, %v8623_v50  ;;  %v4561_v6 = vpop.f32.mrf.mxu1  ;;  %v6535_v50 = vor.u32 %v7762_v15, %v6534_v63  ;;  %v7308_v55 = vld [vmem:[#allocation8 + $0x84c] sm:$0xf0]  ;;  %v6354_v9 = vld [vmem:[#allocation8 + $0xc8] sm:$0xf] }
 0x21e   : > { %v6391_v40 = vor.u32 %v7726_v36, %v6390_v7  ;;  %v6726_v7 = vld [vmem:[#allocation8 + $0x3b0] sm:$0xf]  ;;  %v7810_v36 = vld [vmem:[#allocation8 + $0x3b8] sm:$0xf0]  ;;  %v6618_v63 = vld [vmem:[#allocation8 + $0x2d8] sm:$0xf] }
 0x21f   : > { %4755 = vmatmul.bf16.vlgmr.msra.gmra.mxu0 %v8592_v60  ;;  %v4562_v20 = vadd.f32 %v4561_v6, %v4549_v11  ;;  %v6631_v11 = vor.u32 %v7786_v61, %v6630_v59  ;;  %v6822_v6 = vld [vmem:[#allocation8 + $0x470] sm:$0xf]  ;;  %v7783_v15 = vld [vmem:[#allocation8 + $0x2e0] sm:$0xf0]  ;;  %v6727_v21 = vor.u32 %v7810_v36, %v6726_v7  ;;  %v7798_v36 = vld [vmem:[#allocation8 + $0x358] sm:$0xf0] }
 0x220   : > { %4799 = vmatpush.bf16.msrb.mxu0 %v6343_v13  ;;  %4768 = vmatmul.bf16.vlgmr.msra.gmra.mxu1 %v8597_v43  ;;  %v7332_v13 = vld [vmem:[#allocation8 + $0x87c] sm:$0xf0]  ;;  %v6823_v22 = vor.u32 %v7834_v54, %v6822_v6  ;;  %v6619_v34 = vor.u32 %v7783_v15, %v6618_v63  ;;  %v6678_v7 = vld [vmem:[#allocation8 + $0x350] sm:$0xf]  ;;  %v7822_v54 = vld [vmem:[#allocation8 + $0x418] sm:$0xf0] }
 0x221   : > { %4812 = vmatpush.bf16.msrb.mxu1 %v6439_v14  ;;  %v6295_v14 = vor.u32 %v7702_v2, %v6294_v1  ;;  %4779 = vmatpush.bf16.msra.mxu2 %v7227_v3  ;;  %v7335_v25 = vor.u32 %v7961_v12, %v7332_v13  ;;  %v6258_v1 = vld [vmem:[#allocation8 + $0x8] sm:$0xf]  ;;  %v7693_v2 = vld [vmem:[#allocation8 + $0x10] sm:$0xf0]  ;;  %v7311_v3 = vor.u32 %v7955_v32, %v7308_v55  ;;  %v6774_v6 = vld [vmem:[#allocation8 + $0x410] sm:$0xf] }
 0x222   : > { %4790 = vmatpush.bf16.msra.mxu3 %v7347_v8  ;;  %v7717_v8 = vld [vmem:[#allocation8 + $0xd0] sm:$0xf0]  ;;  %v6498_v12 = vld [vmem:[#allocation8 + $0x1e8] sm:$0xf]  ;;  %v6259_v13 = vor.u32 %v7693_v2, %v6258_v1  ;;  %v6462_v2 = vld [vmem:[#allocation8 + $0x1a0] sm:$0xf] }
 0x223   : > { %v6594_v32 = vld [vmem:[#allocation8 + $0x2a8] sm:$0xf]  ;;  %v7777_v55 = vld [vmem:[#allocation8 + $0x2b0] sm:$0xf0]  ;;  %v6570_v63 = vld [vmem:[#allocation8 + $0x278] sm:$0xf] }
 0x224   : > { %4800 = vmatpush.bf16.msrb.mxu0 %v6331_v27  ;;  %v7958_v27 = vld [vmem:[#allocation8 + $0x85c] sm:$0xf]  ;;  %v4574_v35 = vpop.f32.mrf.mxu2  ;;  %v4550_v37 = vpop.f32.mrf.mxu0  ;;  %v6595_v61 = vor.u32 %v7777_v55, %v6594_v32  ;;  %v7825_v1 = vld [vmem:[#allocation8 + $0x430] sm:$0xf0]  ;;  %v7771_v15 = vld [vmem:[#allocation8 + $0x280] sm:$0xf0] }
 0x225   : > { %4813 = vmatpush.bf16.msrb.mxu1 %v6427_v28  ;;  %v7320_v28 = vld [vmem:[#allocation8 + $0x864] sm:$0xf0]  ;;  %4780 = vmatpush.bf16.msra.mxu2 %v7215_v23  ;;  %v4563_v49 = vpop.f32.mrf.mxu1  ;;  %v4587_v56 = vpop.f32.mrf.mxu3  ;;  %v6714_v23 = vld [vmem:[#allocation8 + $0x398] sm:$0xf]  ;;  %v7804_v37 = vld [vmem:[#allocation8 + $0x388] sm:$0xf0] }
 0x226   : > { %4791 = vmatpush.bf16.msra.mxu3 %v7335_v25  ;;  %v7323_v45 = vor.u32 %v7958_v27, %v7320_v28  ;;  %v7807_v25 = vld [vmem:[#allocation8 + $0x3a0] sm:$0xf0]  ;;  %v6486_v28 = vld [vmem:[#allocation8 + $0x1d0] sm:$0xf]  ;;  %v6474_v49 = vld [vmem:[#allocation8 + $0x1b8] sm:$0xf] }
 0x227   : > { %v7831_v27 = vld [vmem:[#allocation8 + $0x460] sm:$0xf0]  ;;  %v6715_v30 = vor.u32 %v7807_v25, %v6714_v23  ;;  %v6571_v25 = vor.u32 %v7771_v15, %v6570_v63  ;;  %v6894_v32 = vld [vmem:[#allocation8 + $0x500] sm:$0xf] }
 0x228   : > { %4801 = vmatpush.bf16.msrb.mxu0 %v6319_v39  ;;  %v7720_v39 = vld [vmem:[#allocation8 + $0xe8] sm:$0xf0]  ;;  %4781 = vmatmul.bf16.vlgmr.msra.gmra.mxu2 %v8610_v16 }
 0x229   : > { %4814 = vmatpush.bf16.msrb.mxu1 %v6415_v48  ;;  %v4575_v48 = vadd.f32 %v4574_v35, %v4562_v20  ;;  %4825 = vmatpush.bf16.msrb.mxu2 %v6535_v50  ;;  %v6355_v20 = vor.u32 %v7717_v8, %v6354_v9  ;;  %v6810_v50 = vld [vmem:[#allocation8 + $0x458] sm:$0xf]  ;;  %v6702_v35 = vld [vmem:[#allocation8 + $0x380] sm:$0xf]  ;;  %v7744_v9 = vld [vmem:[#allocation8 + $0x1a8] sm:$0xf0] }
 0x22a   : > { %4792 = vmatpush.bf16.msra.mxu3 %v7323_v45  ;;  %v6811_v44 = vor.u32 %v7831_v27, %v6810_v50  ;;  %v6703_v5 = vor.u32 %v7804_v37, %v6702_v35  ;;  %v6762_v50 = vld [vmem:[#allocation8 + $0x3f8] sm:$0xf] }
 0x22c   : > { %4802 = vmatpush.bf16.msrb.mxu0 %v6307_v0  ;;  %v8630_v0 = vadd.f32 %v4587_v56, %v4575_v48  ;;  %v7828_v48 = vld [vmem:[#allocation8 + $0x448] sm:$0xf0] }
 0x22d   : > { %4815 = vmatpush.bf16.msrb.mxu1 %v6403_v47  ;;  %v6367_v47 = vor.u32 %v7720_v39, %v6366_v38  ;;  %4826 = vmatpush.bf16.msrb.mxu2 %v6523_v51  ;;  %v6607_v38 = vor.u32 %v7780_v17, %v6606_v29  ;;  %v6798_v39 = vld [vmem:[#allocation8 + $0x440] sm:$0xf]  ;;  %v7747_v51 = vld [vmem:[#allocation8 + $0x1c0] sm:$0xf0]  ;;  %v7768_v29 = vld [vmem:[#allocation8 + $0x268] sm:$0xf0] }
 0x22e   : > { %4793 = vmatpush.bf16.msra.mxu3 %v7311_v3  ;;  %v6799_v56 = vor.u32 %v7828_v48, %v6798_v39  ;;  %v6475_v59 = vor.u32 %v7747_v51, %v6474_v49  ;;  %v7774_v3 = vld [vmem:[#allocation8 + $0x298] sm:$0xf0]  ;;  %v6906_v17 = vld [vmem:[#allocation8 + $0x518] sm:$0xf]  ;;  %v7816_v39 = vld [vmem:[#allocation8 + $0x3e8] sm:$0xf0] }
 0x22f   : > { %v6546_v49 = vld [vmem:[#allocation8 + $0x248] sm:$0xf]  ;;  %v7765_v51 = vld [vmem:[#allocation8 + $0x250] sm:$0xf0] }
 0x230   : > { %4803 = vmatpush.bf16.msrb.mxu0 %v6295_v14  ;;  %v7753_v14 = vld [vmem:[#allocation8 + $0x1f0] sm:$0xf0] }
 0x231   : > { %4816 = vmatpush.bf16.msrb.mxu1 %v6391_v40  ;;  %v4576_v40 = vpop.f32.mrf.mxu2  ;;  %4827 = vmatpush.bf16.msrb.mxu2 %v6511_v10  ;;  %v6499_v26 = vor.u32 %v7753_v14, %v6498_v12  ;;  %v6463_v10 = vor.u32 %v7744_v9, %v6462_v2  ;;  %v6450_v12 = vld [vmem:[#allocation8 + $0x188] sm:$0xf]  ;;  %v7741_v14 = vld [vmem:[#allocation8 + $0x190] sm:$0xf0] }
 0x232   : > { %4838 = vmatpush.bf16.msrb.mxu3 %v6631_v11  ;;  %v7858_v40 = vld [vmem:[#allocation8 + $0x538] sm:$0xf0]  ;;  %v6451_v23 = vor.u32 %v7741_v14, %v6450_v12  ;;  %v6738_v2 = vld [vmem:[#allocation8 + $0x3c8] sm:$0xf]  ;;  %v7813_v9 = vld [vmem:[#allocation8 + $0x3d0] sm:$0xf0] }
 0x233   : > { %4794 = vmatmul.bf16.vlgmr.msra.gmra.mxu3 %v8613_v62  ;;  %v6739_v12 = vor.u32 %v7813_v9, %v6738_v2 }
 0x234   : > { %4804 = vmatpush.bf16.msrb.mxu0 %v6283_v18  ;;  %v7750_v18 = vld [vmem:[#allocation8 + $0x1d8] sm:$0xf0] }
 0x235   : > { %4817 = vmatpush.bf16.msrb.mxu1 %v6379_v19  ;;  %v4589_v19 = vpop.f32.mrf.mxu3  ;;  %4828 = vmatpush.bf16.msrb.mxu2 %v6499_v26  ;;  %v6487_v45 = vor.u32 %v7750_v18, %v6486_v28  ;;  %v6666_v26 = vld [vmem:[#allocation8 + $0x338] sm:$0xf]  ;;  %v7819_v28 = vld [vmem:[#allocation8 + $0x400] sm:$0xf0]  ;;  %v6558_v18 = vld [vmem:[#allocation8 + $0x260] sm:$0xf] }
 0x236   : > { %4839 = vmatpush.bf16.msrb.mxu3 %v6619_v34  ;;  %v7795_v34 = vld [vmem:[#allocation8 + $0x340] sm:$0xf0]  ;;  %v6763_v35 = vor.u32 %v7819_v28, %v6762_v50  ;;  %v6559_v37 = vor.u32 %v7768_v29, %v6558_v18  ;;  %v6990_v50 = vld [vmem:[#allocation8 + $0x5c0] sm:$0xf] }
 0x237   : > { %v7855_v19 = vld [vmem:[#allocation8 + $0x520] sm:$0xf0] }
 0x238   : > { %4805 = vmatpush.bf16.msrb.mxu0 %v6271_v57  ;;  %v6690_v57 = vld [vmem:[#allocation8 + $0x368] sm:$0xf]  ;;  %v6907_v48 = vor.u32 %v7855_v19, %v6906_v17  ;;  %v7086_v17 = vld [vmem:[#allocation8 + $0x680] sm:$0xf]  ;;  %v7900_v19 = vld [vmem:[#allocation8 + $0x688] sm:$0xf0] }
 0x239   : > { %4818 = vmatpush.bf16.msrb.mxu1 %v6367_v47  ;;  %4829 = vmatpush.bf16.msrb.mxu2 %v6487_v45  ;;  %v6786_v47 = vld [vmem:[#allocation8 + $0x428] sm:$0xf]  ;;  %v7792_v45 = vld [vmem:[#allocation8 + $0x328] sm:$0xf0] }
 0x23a   : > { %4840 = vmatpush.bf16.msrb.mxu3 %v6607_v38  ;;  %v6787_v8 = vor.u32 %v7825_v1, %v6786_v47  ;;  %v6750_v38 = vld [vmem:[#allocation8 + $0x3e0] sm:$0xf]  ;;  %v6547_v47 = vor.u32 %v7765_v51, %v6546_v49  ;;  %v7789_v1 = vld [vmem:[#allocation8 + $0x310] sm:$0xf0] }
 0x23c   : > { %4806 = vmatpush.bf16.msrb.mxu0 %v6259_v13  ;;  %v8636_v13 = vpop.f32.mrf.mxu0 }
 0x23d   : > { %4819 = vmatpush.bf16.msrb.mxu1 %v6355_v20  ;;  %4830 = vmatpush.bf16.msrb.mxu2 %v6475_v59  ;;  %v6918_v20 = vld [vmem:[#allocation8 + $0x530] sm:$0xf]  ;;  %v6642_v59 = vld [vmem:[#allocation8 + $0x308] sm:$0xf] }
 0x23e   : > { %4841 = vmatpush.bf16.msrb.mxu3 %v6595_v61  ;;  %v6919_v27 = vor.u32 %v7858_v40, %v6918_v20  ;;  %v6751_v61 = vor.u32 %v7816_v39, %v6750_v38  ;;  %v7098_v40 = vld [vmem:[#allocation8 + $0x698] sm:$0xf]  ;;  %v7873_v38 = vld [vmem:[#allocation8 + $0x5b0] sm:$0xf0] }
 0x23f   : > { %4807 = vmatmul.bf16.vlgmr.msrb.gmra.mxu0 %v8554_v31  ;;  %v6582_v31 = vld [vmem:[#allocation8 + $0x290] sm:$0xf] }
 0x240   : > { %4851 = vmatpush.bf16.msra.mxu0 %v6727_v21  ;;  %4820 = vmatmul.bf16.vlgmr.msrb.gmra.mxu1 %v8556_v33  ;;  %v6691_v33 = vor.u32 %v7801_v58, %v6690_v57  ;;  %v6583_v11 = vor.u32 %v7774_v3, %v6582_v31  ;;  %v6679_v21 = vor.u32 %v7798_v36, %v6678_v7  ;;  %v7882_v57 = vld [vmem:[#allocation8 + $0x5f8] sm:$0xf0]  ;;  %v7206_v7 = vld [vmem:[#allocation8 + $0x770] sm:$0xf] }
 0x241   : > { %4864 = vmatpush.bf16.msra.mxu1 %v6823_v22  ;;  %v6775_v22 = vor.u32 %v7822_v54, %v6774_v6  ;;  %4831 = vmatpush.bf16.msrb.mxu2 %v6463_v10  ;;  %v7930_v36 = vld [vmem:[#allocation8 + $0x778] sm:$0xf0]  ;;  %v6882_v10 = vld [vmem:[#allocation8 + $0x4e8] sm:$0xf]  ;;  %v7002_v6 = vld [vmem:[#allocation8 + $0x5d8] sm:$0xf] }
 0x242   : > { %4842 = vmatpush.bf16.msrb.mxu3 %v6583_v11  ;;  %v7849_v11 = vld [vmem:[#allocation8 + $0x4f0] sm:$0xf0]  ;;  %v7879_v54 = vld [vmem:[#allocation8 + $0x5e0] sm:$0xf0]  ;;  %v7207_v15 = vor.u32 %v7930_v36, %v7206_v7  ;;  %v6834_v36 = vld [vmem:[#allocation8 + $0x488] sm:$0xf] }
 0x243   : > { %v8639_v14 = vpop.f32.mrf.mxu1  ;;  %v6883_v20 = vor.u32 %v7849_v11, %v6882_v10  ;;  %v7837_v10 = vld [vmem:[#allocation8 + $0x490] sm:$0xf0]  ;;  %v6954_v11 = vld [vmem:[#allocation8 + $0x578] sm:$0xf] }
 0x244   : > { %4852 = vmatpush.bf16.msra.mxu0 %v6715_v30  ;;  %v6667_v30 = vor.u32 %v7795_v34, %v6666_v26  ;;  %v4602_v55 = vpop.f32.mrf.mxu0  ;;  %v6870_v26 = vld [vmem:[#allocation8 + $0x4d0] sm:$0xf]  ;;  %v7846_v34 = vld [vmem:[#allocation8 + $0x4d8] sm:$0xf0] }
 0x245   : > { %4865 = vmatpush.bf16.msra.mxu1 %v6811_v44  ;;  %v6654_v44 = vld [vmem:[#allocation8 + $0x320] sm:$0xf]  ;;  %4832 = vmatpush.bf16.msrb.mxu2 %v6451_v23  ;;  %v7003_v23 = vor.u32 %v7879_v54, %v7002_v6  ;;  %v6871_v29 = vor.u32 %v7846_v34, %v6870_v26  ;;  %v7897_v55 = vld [vmem:[#allocation8 + $0x670] sm:$0xf0]  ;;  %v7302_v6 = vld [vmem:[#allocation8 + $0x830] sm:$0xf] }
 0x246   : > { %4843 = vmatpush.bf16.msrb.mxu3 %v6571_v25  ;;  %v6655_v58 = vor.u32 %v7792_v45, %v6654_v44  ;;  %v7927_v25 = vld [vmem:[#allocation8 + $0x760] sm:$0xf0]  ;;  %v6978_v45 = vld [vmem:[#allocation8 + $0x5a8] sm:$0xf]  ;;  %v7954_v54 = vld [vmem:[#allocation8 + $0x838] sm:$0xf0] }
 0x247   : > { %v7146_v26 = vld [vmem:[#allocation8 + $0x6f8] sm:$0xf]  ;;  %v7915_v34 = vld [vmem:[#allocation8 + $0x700] sm:$0xf0] }
 0x248   : > { %4853 = vmatpush.bf16.msra.mxu0 %v6703_v5  ;;  %v7852_v5 = vld [vmem:[#allocation8 + $0x508] sm:$0xf0]  ;;  %4833 = vmatmul.bf16.vlgmr.msrb.gmra.mxu2 %v8558_v24  ;;  %v6643_v24 = vor.u32 %v7789_v1, %v6642_v59  ;;  %v6966_v59 = vld [vmem:[#allocation8 + $0x590] sm:$0xf] }
 0x249   : > { %4866 = vmatpush.bf16.msra.mxu1 %v6799_v56  ;;  %4877 = vmatpush.bf16.msra.mxu2 %v6919_v27  ;;  %v7014_v56 = vld [vmem:[#allocation8 + $0x5f0] sm:$0xf]  ;;  %v6895_v31 = vor.u32 %v7852_v5, %v6894_v32  ;;  %v7876_v27 = vld [vmem:[#allocation8 + $0x5c8] sm:$0xf0]  ;;  %v7074_v32 = vld [vmem:[#allocation8 + $0x668] sm:$0xf] }
 0x24a   : > { %4844 = vmatpush.bf16.msrb.mxu3 %v6559_v37  ;;  %v7015_v3 = vor.u32 %v7882_v57, %v7014_v56  ;;  %v6991_v44 = vor.u32 %v7876_v27, %v6990_v50  ;;  %v6858_v37 = vld [vmem:[#allocation8 + $0x4b8] sm:$0xf]  ;;  %v7170_v5 = vld [vmem:[#allocation8 + $0x728] sm:$0xf]  ;;  %v7921_v56 = vld [vmem:[#allocation8 + $0x730] sm:$0xf0] }
 0x24b   : > { %v4615_v39 = vpop.f32.mrf.mxu1  ;;  %v6846_v57 = vld [vmem:[#allocation8 + $0x4a0] sm:$0xf]  ;;  %v7062_v1 = vld [vmem:[#allocation8 + $0x650] sm:$0xf]  ;;  %v7171_v2 = vor.u32 %v7921_v56, %v7170_v5  ;;  %v7864_v27 = vld [vmem:[#allocation8 + $0x568] sm:$0xf0] }
 0x24c   : > { %4854 = vmatpush.bf16.msra.mxu0 %v6691_v33  ;;  %v7110_v33 = vld [vmem:[#allocation8 + $0x6b0] sm:$0xf]  ;;  %v6942_v50 = vld [vmem:[#allocation8 + $0x560] sm:$0xf]  ;;  %v7861_v39 = vld [vmem:[#allocation8 + $0x550] sm:$0xf0] }
 0x24d   : > { %4867 = vmatpush.bf16.msra.mxu1 %v6787_v8  ;;  %4878 = vmatpush.bf16.msra.mxu2 %v6907_v48  ;;  %v7906_v8 = vld [vmem:[#allocation8 + $0x6b8] sm:$0xf0]  ;;  %v7087_v48 = vor.u32 %v7900_v19, %v7086_v17  ;;  %v7147_v17 = vor.u32 %v7915_v34, %v7146_v26  ;;  %v7038_v19 = vld [vmem:[#allocation8 + $0x620] sm:$0xf]  ;;  %v7026_v56 = vld [vmem:[#allocation8 + $0x608] sm:$0xf] }
 0x24e   : > { %4845 = vmatpush.bf16.msrb.mxu3 %v6547_v47  ;;  %v7111_v63 = vor.u32 %v7906_v8, %v7110_v33  ;;  %v7075_v47 = vor.u32 %v7897_v55, %v7074_v32  ;;  %v7918_v33 = vld [vmem:[#allocation8 + $0x718] sm:$0xf0]  ;;  %v7398_v32 = vld [vmem:[#allocation8 + $0x8f0] sm:$0xf] }
 0x24f   : > { %v7978_v55 = vld [vmem:[#allocation8 + $0x8f8] sm:$0xf0] }
 0x250   : > { %4855 = vmatpush.bf16.msra.mxu0 %v6679_v21  ;;  %v7903_v21 = vld [vmem:[#allocation8 + $0x6a0] sm:$0xf0]  ;;  %v7966_v26 = vld [vmem:[#allocation8 + $0x898] sm:$0xf0] }
 0x251   : > { %4868 = vmatpush.bf16.msra.mxu1 %v6775_v22  ;;  %4879 = vmatpush.bf16.msra.mxu2 %v6895_v31  ;;  %v7194_v22 = vld [vmem:[#allocation8 + $0x758] sm:$0xf]  ;;  %v7099_v28 = vor.u32 %v7903_v21, %v7098_v40  ;;  %v7894_v31 = vld [vmem:[#allocation8 + $0x658] sm:$0xf0]  ;;  %v7891_v21 = vld [vmem:[#allocation8 + $0x640] sm:$0xf0] }
 0x252   : > { %4890 = vmatpush.bf16.msra.mxu3 %v7015_v3  ;;  %v7195_v18 = vor.u32 %v7927_v25, %v7194_v22  ;;  %v7158_v3 = vld [vmem:[#allocation8 + $0x710] sm:$0xf]  ;;  %v7050_v40 = vld [vmem:[#allocation8 + $0x638] sm:$0xf]  ;;  %v7303_v25 = vor.u32 %v7954_v54, %v7302_v6 }
 0x253   : > { %4846 = vmatmul.bf16.vlgmr.msrb.gmra.mxu3 %v8560_v4  ;;  %v7843_v4 = vld [vmem:[#allocation8 + $0x4c0] sm:$0xf0] }
 0x254   : > { %4856 = vmatpush.bf16.msra.mxu0 %v6667_v30  ;;  %v7182_v30 = vld [vmem:[#allocation8 + $0x740] sm:$0xf]  ;;  %v6859_v51 = vor.u32 %v7843_v4, %v6858_v37 }
 0x255   : > { %4869 = vmatpush.bf16.msra.mxu1 %v6763_v35  ;;  %4880 = vmatpush.bf16.msra.mxu2 %v6883_v20  ;;  %v7924_v35 = vld [vmem:[#allocation8 + $0x748] sm:$0xf0]  ;;  %v6835_v20 = vor.u32 %v7837_v10, %v6834_v36  ;;  %v7134_v4 = vld [vmem:[#allocation8 + $0x6e0] sm:$0xf]  ;;  %v7942_v36 = vld [vmem:[#allocation8 + $0x7d8] sm:$0xf0] }
 0x256   : > { %4891 = vmatpush.bf16.msra.mxu3 %v7003_v23  ;;  %v7183_v49 = vor.u32 %v7924_v35, %v7182_v30  ;;  %v7888_v30 = vld [vmem:[#allocation8 + $0x628] sm:$0xf0]  ;;  %v6943_v35 = vor.u32 %v7864_v27, %v6942_v50  ;;  %v7374_v10 = vld [vmem:[#allocation8 + $0x8c0] sm:$0xf] }
 0x258   : > { %4857 = vmatpush.bf16.msra.mxu0 %v6655_v58  ;;  %v7840_v58 = vld [vmem:[#allocation8 + $0x4a8] sm:$0xf0] }
 0x259   : > { %4870 = vmatpush.bf16.msra.mxu1 %v6751_v61  ;;  %4881 = vmatpush.bf16.msra.mxu2 %v6871_v29  ;;  %v7870_v61 = vld [vmem:[#allocation8 + $0x598] sm:$0xf0]  ;;  %v6847_v9 = vor.u32 %v7840_v58, %v6846_v57  ;;  %v7051_v29 = vor.u32 %v7891_v21, %v7050_v40  ;;  %v7885_v57 = vld [vmem:[#allocation8 + $0x610] sm:$0xf0]  ;;  %v4601_v40 = vadd.f32 %v8636_v13, %v8630_v0  ;;  %v7230_v21 = vld [vmem:[#allocation8 + $0x7a0] sm:$0xf] }
 0x25a   : > { %4892 = vmatpush.bf16.msra.mxu3 %v6991_v44  ;;  %v6967_v7 = vor.u32 %v7870_v61, %v6966_v59  ;;  %v7122_v61 = vld [vmem:[#allocation8 + $0x6c8] sm:$0xf]  ;;  %v7338_v13 = vld [vmem:[#allocation8 + $0x878] sm:$0xf] }
 0x25c   : > { %4858 = vmatpush.bf16.msra.mxu0 %v6643_v24  ;;  %v4652_v8 = vpop.f32.mrf.mxu0  ;;  %v7867_v24 = vld [vmem:[#allocation8 + $0x580] sm:$0xf0] }
 0x25d   : > { %4871 = vmatpush.bf16.msra.mxu1 %v6739_v12  ;;  %4882 = vmatpush.bf16.msra.mxu2 %v6859_v51  ;;  %v6955_v23 = vor.u32 %v7867_v24, %v6954_v11  ;;  %v7039_v51 = vor.u32 %v7888_v30, %v7038_v19  ;;  %v7972_v11 = vld [vmem:[#allocation8 + $0x8c8] sm:$0xf0]  ;;  %v7963_v19 = vld [vmem:[#allocation8 + $0x880] sm:$0xf0] }
 0x25e   : > { %v7375_v54 = vor.u32 %v7972_v11, %v7374_v10 }
 0x25f   : > { %4859 = vmatmul.bf16.vlgmr.msra.gmra.mxu0 %v8575_v42  ;;  %v6979_v42 = vor.u32 %v7873_v38, %v6978_v45  ;;  %v7912_v45 = vld [vmem:[#allocation8 + $0x6e8] sm:$0xf0]  ;;  %v6930_v38 = vld [vmem:[#allocation8 + $0x548] sm:$0xf] }
 0x260   : > { %4903 = vmatpush.bf16.msrb.mxu0 %v7111_v63  ;;  %4872 = vmatmul.bf16.vlgmr.msra.gmra.mxu1 %v8577_v46  ;;  %v2946_v46 = vperm.slane %v8618_v41, 1  ;;  %v7063_v41 = vor.u32 %v7894_v31, %v7062_v1  ;;  %v4665_v63 = vpop.f32.mrf.mxu1  ;;  %v6931_v58 = vor.u32 %v7861_v39, %v6930_v38  ;;  %v7266_v1 = vld [vmem:[#allocation8 + $0x7e8] sm:$0xf]  ;;  %v7975_v31 = vld [vmem:[#allocation8 + $0x8e0] sm:$0xf0] }
 0x261   : > { %4916 = vmatpush.bf16.msrb.mxu1 %v7207_v15  ;;  %4893 = vmatpush.bf16.msra.mxu3 %v6979_v42  ;;  %v7159_v15 = vor.u32 %v7918_v33, %v7158_v3  ;;  %v7135_v42 = vor.u32 %v7912_v45, %v7134_v4 }
 0x262   : > { %v4653_v12 = vadd.f32 %v4652_v8, %v2946_v46  ;;  %4883 = vmatpush.bf16.msra.mxu2 %v6847_v9  ;;  %v7909_v46 = vld [vmem:[#allocation8 + $0x6d0] sm:$0xf0]  ;;  %v7386_v9 = vld [vmem:[#allocation8 + $0x8d8] sm:$0xf] }
 0x263   : > { %v7123_v3 = vor.u32 %v7909_v46, %v7122_v61  ;;  %v7387_v8 = vor.u32 %v7975_v31, %v7386_v9 }
 0x264   : > { %4904 = vmatpush.bf16.msrb.mxu0 %v7099_v28  ;;  %v8645_v22 = vadd.f32 %v4665_v63, %v4653_v12  ;;  %v7290_v28 = vld [vmem:[#allocation8 + $0x818] sm:$0xf]  ;;  %v4654_v44 = vpop.f32.mrf.mxu0  ;;  %v7362_v63 = vld [vmem:[#allocation8 + $0x8a8] sm:$0xf] }
 0x265   : > { %4917 = vmatpush.bf16.msrb.mxu1 %v7195_v18  ;;  %4894 = vmatpush.bf16.msra.mxu3 %v6967_v7  ;;  %v7951_v18 = vld [vmem:[#allocation8 + $0x820] sm:$0xf0]  ;;  %v7254_v7 = vld [vmem:[#allocation8 + $0x7d0] sm:$0xf]  ;;  %v7242_v12 = vld [vmem:[#allocation8 + $0x7b8] sm:$0xf] }
 0x266   : > { %4884 = vmatpush.bf16.msra.mxu2 %v6835_v20  ;;  %v7291_v37 = vor.u32 %v7951_v18, %v7290_v28  ;;  %v7255_v24 = vor.u32 %v7942_v36, %v7254_v7  ;;  %v4626_v6 = vpop.f32.mrf.mxu2  ;;  %v7218_v18 = vld [vmem:[#allocation8 + $0x788] sm:$0xf] }
 0x268   : > { %4905 = vmatpush.bf16.msrb.mxu0 %v7087_v48  ;;  %v7278_v48 = vld [vmem:[#allocation8 + $0x800] sm:$0xf]  ;;  %v4667_v5 = vpop.f32.mrf.mxu1 }
 0x269   : > { %4918 = vmatpush.bf16.msrb.mxu1 %v7183_v49  ;;  %4895 = vmatpush.bf16.msra.mxu3 %v6955_v23  ;;  %v7948_v49 = vld [vmem:[#allocation8 + $0x808] sm:$0xf0] }
 0x26a   : > { %4929 = vmatpush.bf16.msrb.mxu2 %v7303_v25  ;;  %v7279_v59 = vor.u32 %v7948_v49, %v7278_v48  ;;  %v7936_v23 = vld [vmem:[#allocation8 + $0x7a8] sm:$0xf0]  ;;  %v7350_v25 = vld [vmem:[#allocation8 + $0x890] sm:$0xf]  ;;  %v7314_v49 = vld [vmem:[#allocation8 + $0x848] sm:$0xf] }
 0x26b   : > { %4885 = vmatmul.bf16.vlgmr.msra.gmra.mxu2 %v8579_v52  ;;  %v7027_v52 = vor.u32 %v7885_v57, %v7026_v56  ;;  %v7231_v34 = vor.u32 %v7936_v23, %v7230_v21  ;;  %v7351_v28 = vor.u32 %v7966_v26, %v7350_v25 }
 0x26c   : > { %4906 = vmatpush.bf16.msrb.mxu0 %v7075_v47  ;;  %v7399_v47 = vor.u32 %v7978_v55, %v7398_v32 }
 0x26d   : > { %4919 = vmatpush.bf16.msrb.mxu1 %v7171_v2  ;;  %4896 = vmatpush.bf16.msra.mxu3 %v6943_v35  ;;  %v7945_v2 = vld [vmem:[#allocation8 + $0x7f0] sm:$0xf0]  ;;  %v7326_v35 = vld [vmem:[#allocation8 + $0x860] sm:$0xf] }
 0x26e   : > { %4930 = vmatpush.bf16.msrb.mxu2 %v7291_v37  ;;  %v7267_v33 = vor.u32 %v7945_v2, %v7266_v1  ;;  %v7960_v37 = vld [vmem:[#allocation8 + $0x868] sm:$0xf0] }
 0x26f   : > { %v7327_v38 = vor.u32 %v7960_v37, %v7326_v35 }
 0x270   : > { %4907 = vmatpush.bf16.msrb.mxu0 %v7063_v41  ;;  %v7939_v41 = vld [vmem:[#allocation8 + $0x7c0] sm:$0xf0] }
 0x271   : > { %4920 = vmatpush.bf16.msrb.mxu1 %v7159_v15  ;;  %4897 = vmatpush.bf16.msra.mxu3 %v6931_v58  ;;  %v7969_v15 = vld [vmem:[#allocation8 + $0x8b0] sm:$0xf0]  ;;  %v7243_v20 = vor.u32 %v7939_v41, %v7242_v12  ;;  %v4639_v0 = vpop.f32.mrf.mxu3 }
 0x272   : > { %4931 = vmatpush.bf16.msrb.mxu2 %v7279_v59 }
 0x274   : > { %4908 = vmatpush.bf16.msrb.mxu0 %v7051_v29  ;;  %4898 = vmatmul.bf16.vlgmr.msra.gmra.mxu3 %v8581_v53  ;;  %v7363_v53 = vor.u32 %v7969_v15, %v7362_v63  ;;  %v7933_v29 = vld [vmem:[#allocation8 + $0x790] sm:$0xf0] }
 0x275   : > { %4921 = vmatpush.bf16.msrb.mxu1 %v7147_v17  ;;  %4942 = vmatpush.bf16.msrb.mxu3 %v7399_v47  ;;  %v4628_v17 = vpop.f32.mrf.mxu2  ;;  %v7219_v44 = vor.u32 %v7933_v29, %v7218_v18 }
 0x276   : > { %4932 = vmatpush.bf16.msrb.mxu2 %v7267_v33 }
 0x278   : > { %4909 = vmatpush.bf16.msrb.mxu0 %v7039_v51  ;;  %v7957_v51 = vld [vmem:[#allocation8 + $0x850] sm:$0xf0] }
 0x279   : > { %4922 = vmatpush.bf16.msrb.mxu1 %v7135_v42  ;;  %4943 = vmatpush.bf16.msrb.mxu3 %v7387_v8  ;;  %v4641_v39 = vpop.f32.mrf.mxu3  ;;  %v7315_v32 = vor.u32 %v7957_v51, %v7314_v49 }
 0x27a   : > { %4933 = vmatpush.bf16.msrb.mxu2 %v7255_v24 }
 0x27c   : > { %4910 = vmatpush.bf16.msrb.mxu0 %v7027_v52 }
 0x27d   : > { %4923 = vmatpush.bf16.msrb.mxu1 %v7123_v3  ;;  %4944 = vmatpush.bf16.msrb.mxu3 %v7375_v54  ;;  %v4717_v27 = vpop.f32.mrf.mxu1  ;;  %v4678_v48 = vpop.f32.mrf.mxu2 }
 0x27e   : > { %4934 = vmatpush.bf16.msrb.mxu2 %v7243_v20  ;;  %v4679_v46 = vadd.f32 %v4678_v48, %v8645_v22 }
 0x27f   : > { %4911 = vmatmul.bf16.vlgmr.msrb.gmra.mxu0 %v8592_v60  ;;  %v4614_v60 = vadd.f32 %v8639_v14, %v4601_v40  ;;  %v7339_v14 = vor.u32 %v7963_v19, %v7338_v13 }
 0x280   : > { %4924 = vmatmul.bf16.vlgmr.msrb.gmra.mxu1 %v8597_v43  ;;  %v4704_v43 = vpop.f32.mrf.mxu0 }
 0x281   : > { %v4627_v50 = vadd.f32 %v4626_v6, %v4614_v60  ;;  %4945 = vmatpush.bf16.msrb.mxu3 %v7363_v53  ;;  %v4691_v5 = vpop.f32.mrf.mxu3 }
 0x282   : > { %4935 = vmatpush.bf16.msrb.mxu2 %v7231_v34  ;;  %v4692_v2 = vadd.f32 %v4691_v5, %v4679_v46 }
 0x283   : > { %v4640_v30 = vadd.f32 %v4639_v0, %v4627_v50 }
 0x285   : > { %4955 = vst [vmem:[%s8656_s26] sm:$0xff] %v4640_v30  ;;  %4946 = vmatpush.bf16.msrb.mxu3 %v7351_v28  ;;  %v4719_v45 = vpop.f32.mrf.mxu1  ;;  %v4680_v55 = vpop.f32.mrf.mxu2 }
 0x286   : > { %4936 = vmatpush.bf16.msrb.mxu2 %v7219_v44 }
 0x288   : > { %v4706_v4 = vpop.f32.mrf.mxu0 }
 0x289   : > { %4947 = vmatpush.bf16.msrb.mxu3 %v7339_v14  ;;  %4937 = vmatmul.bf16.vlgmr.msrb.gmra.mxu2 %v8610_v16  ;;  %v4693_v42 = vpop.f32.mrf.mxu3  ;;  %v4705_v16 = vadd.f32 %v4704_v43, %v4692_v2 }
 0x28b   : > { %v4718_v9 = vadd.f32 %v4717_v27, %v4705_v16 }
 0x28d   : > { %4948 = vmatpush.bf16.msrb.mxu3 %v7327_v38  ;;  %v4730_v56 = vpop.f32.mrf.mxu2 }
 0x28e   : > { %v4731_v31 = vadd.f32 %v4730_v56, %v4718_v9 }
 0x291   : > { %4949 = vmatpush.bf16.msrb.mxu3 %v7315_v32 }
 0x292   : > { %v4743_v61 = vpop.f32.mrf.mxu3 }
 0x293   : > { %v4744_v3 = vadd.f32 %v4743_v61, %v4731_v31 }
 0x294   : > { %4950 = vmatmul.bf16.vlgmr.msrb.gmra.mxu3 %v8613_v62  ;;  %v8075_v62 = vld [vmem:[#allocation10] sm:$0x7] }
 0x295   : > { %v4732_v59 = vpop.f32.mrf.mxu2  ;;  %v2947_v7 = vperm.slane %v8075_v62, 2 }
 0x29a   : > { %v4745_v52 = vpop.f32.mrf.mxu3 }
 0x29c   : > { %v4756_v57 = vpop.f32.mrf.mxu0 }
 0x29d   : > { %v4769_v58 = vpop.f32.mrf.mxu1  ;;  %v4757_v8 = vadd.f32 %v4756_v57, %v4744_v3 }
 0x29f   : > { %v4770_v36 = vadd.f32 %v4769_v58, %v4757_v8 }
 0x2a4   : > { %v4758_v47 = vpop.f32.mrf.mxu0 }
 0x2a5   : > { %v4771_v1 = vpop.f32.mrf.mxu1 }
 0x2ab   : > { %v4782_v33 = vpop.f32.mrf.mxu2 }
 0x2ac   : > { %v4783_v6 = vadd.f32 %v4782_v33, %v4770_v36 }
 0x2b3   : > { %v4784_v22 = vpop.f32.mrf.mxu2 }
 0x2b6   : > { %v4795_v12 = vpop.f32.mrf.mxu3 }
 0x2b7   : > { %v4796_v41 = vadd.f32 %v4795_v12, %v4783_v6 }
 0x2b9   : > { %4956 = vst [vmem:[%s8656_s26 + $0x8] sm:$0xff] %v4796_v41 }
 0x2bc   : > { %v4808_v10 = vpop.f32.mrf.mxu0 }
 0x2bd   : > { %v4821_v11 = vpop.f32.mrf.mxu1  ;;  %v4809_v24 = vadd.f32 %v4808_v10, %v2947_v7 }
 0x2be   : > { %v4797_v20 = vpop.f32.mrf.mxu3 }
 0x2bf   : > { %v4822_v54 = vadd.f32 %v4821_v11, %v4809_v24 }
 0x2c4   : > { %v4810_v63 = vpop.f32.mrf.mxu0 }
 0x2c5   : > { %v4823_v15 = vpop.f32.mrf.mxu1 }
 0x2cb   : > { %v4834_v40 = vpop.f32.mrf.mxu2 }
 0x2cc   : > { %v4835_v29 = vadd.f32 %v4834_v40, %v4822_v54 }
 0x2d3   : > { %v4836_v23 = vpop.f32.mrf.mxu2 }
 0x2d6   : > { %v4847_v25 = vpop.f32.mrf.mxu3 }
 0x2d7   : > { %v4848_v13 = vadd.f32 %v4847_v25, %v4835_v29 }
 0x2dc   : > { %v4860_v53 = vpop.f32.mrf.mxu0 }
 0x2dd   : > { %v4873_v21 = vpop.f32.mrf.mxu1  ;;  %v4861_v30 = vadd.f32 %v4860_v53, %v4848_v13 }
 0x2de   : > { %v4849_v34 = vpop.f32.mrf.mxu3 }
 0x2df   : > { %v4874_v44 = vadd.f32 %v4873_v21, %v4861_v30 }
 0x2e4   : > { %v4862_v26 = vpop.f32.mrf.mxu0 }
 0x2e5   : > { %v4875_v60 = vpop.f32.mrf.mxu1 }
 0x2ee   : > { %v4886_v50 = vpop.f32.mrf.mxu2 }
 0x2ef   : > { %v4887_v14 = vadd.f32 %v4886_v50, %v4874_v44 }
 0x2f6   : > { %v4888_v28 = vpop.f32.mrf.mxu2 }
 0x2f7   : > { %v4899_v18 = vpop.f32.mrf.mxu3 }
 0x2f8   : > { %v4900_v35 = vadd.f32 %v4899_v18, %v4887_v14 }
 0x2fc   : > { %v4912_v43 = vpop.f32.mrf.mxu0 }
 0x2fd   : > { %v4925_v27 = vpop.f32.mrf.mxu1  ;;  %v4913_v4 = vadd.f32 %v4912_v43, %v4900_v35 }
 0x2ff   : > { %v4901_v19 = vpop.f32.mrf.mxu3  ;;  %v4926_v45 = vadd.f32 %v4925_v27, %v4913_v4 }
 0x304   : > { %v4914_v17 = vpop.f32.mrf.mxu0 }
 0x305   : > { %v4927_v0 = vpop.f32.mrf.mxu1 }
 0x30c   : > { %v4938_v37 = vpop.f32.mrf.mxu2 }
 0x30d   : > { %v4939_v38 = vadd.f32 %v4938_v37, %v4926_v45 }
 0x314   : > { %v4940_v39 = vpop.f32.mrf.mxu2 }
 0x317   : > { %v4951_v48 = vpop.f32.mrf.mxu3 }
 0x318   : > { %v4952_v49 = vadd.f32 %v4951_v48, %v4939_v38 }
 0x31a   : > { %4957 = vst [vmem:[%s8656_s26 + $0x10] sm:$0xff] %v4952_v49 }
 0x31b   : > { %8253 = shalt.err (!%p8250_p9)
}
 0x31c   : > { %8001 = dma.vmem_to_hbm [thread:$0]  (%p8423_p4), %s4973_s28, 384, %s4975_s29, %s4959_s30  }
 0x31f   : > { %v4953_v51 = vpop.f32.mrf.mxu3 }
 0x320 PF: > { %s4986_s7 = sand.u32 1, %s8288_s18   ;;  %p8712_p10 = scmp.ge.s32.totalorder %s8300_s21, 2 }
 0x321   : > { %s4987_s14 = scalar_lea.sflag [#allocation4], %s4986_s7 }
 0x322   : > { %p8021_p11 = pnand %p8712_p10, %p8427_p6 }
 0x324   : > { %p8022_p13 = pneg %p8021_p11 }
 0x326   : > { %8283 = dma.done.wait (%p8022_p13), %s4987_s14, 384  }
 0x327   : > { %8285 = vsyncadd (%p8022_p13), %s4987_s14, 4294966912  ;;  %p20_p0 = scmp.ge.s32.totalorder %s8401_s6, 4   ;;  %s8713_s18 = smov %s8292_s19 }
 0x328   : > { %s8714_s19 = smov %s8296_s20  ;;  %s8715_s20 = smov %s8412_s10 }
 0x329   : > { %s8716_s21 = smov %s8401_s6  ;;  %22 = sbr.rel (!%p20_p0) target bundleno = 9 (0x9), region = 101 }
 0x32e   :  { %4993 = vsyncpa [#allocation3], 1 }
 0x32f   :  { %4995 = vsyncpa [#allocation3 + $0x1], 1 }
 0x330   :  { %4996 = vsyncpa [#allocation6], 1 }
 0x331   :  { %4997 = vsyncpa [#allocation9], 1 }
 0x332   :  { %4998 = vsyncpa [#allocation4], 1 }
 0x333   :  { %5000 = vsyncpa [#allocation4 + $0x1], 1 }

</bundles_post_ra>
